<compile_context>
chip_gen: v5e
topology: v5e:2x2
jax: 0.10.0
libtpu: 0.0.40
codegen_flags: <defaults>
</compile_context>

<pallas_src>
import functools

import numpy as np
import jax
import jax.numpy as jnp
from jax.experimental import pallas as pl
from jax.experimental.pallas import tpu as pltpu

_MAX_ROW_TILE = 512          # larger row tiles amortize per-grid-step overhead
_MAX_K_TILE = 1152           # K larger than this gets a reduction grid axis


def _round_up(x, m):
    return (x + m - 1) // m * m


# ---------------------------------------------------------------------------
# Lazy feature / hardware probes.
# ---------------------------------------------------------------------------
_BUFFERED_OK = None
_VMEM_LIMIT = None


def _buffered_ok():
    """True iff pl.Buffered(1) (single-buffered resident blocks) lowers here."""
    global _BUFFERED_OK
    if _BUFFERED_OK is None:
        try:
            def _k(x_ref, o_ref):
                o_ref[...] = x_ref[...]

            f = pl.pallas_call(
                _k,
                out_shape=jax.ShapeDtypeStruct((16, 128), jnp.float32),
                grid_spec=pltpu.PrefetchScalarGridSpec(
                    num_scalar_prefetch=0,
                    grid=(2,),
                    in_specs=[pl.BlockSpec((8, 128), lambda i: (0, 0),
                                           pipeline_mode=pl.Buffered(1))],
                    out_specs=pl.BlockSpec((8, 128), lambda i: (i, 0)),
                ),
            )
            jax.block_until_ready(f(jnp.zeros((16, 128), jnp.float32)))
            _BUFFERED_OK = True
        except Exception:
            _BUFFERED_OK = False
    return _BUFFERED_OK


def _vmem_limit_bytes():
    """Scoped-VMEM budget ~3/4 of physical, capped at 96 MiB.
    v5e/v6e: 128 MiB physical -> 96 MiB; v7x: 64 MiB physical -> 48 MiB.
    (v5e's *default* scoped limit is only 16 MiB, so raising it is required.)"""
    global _VMEM_LIMIT
    if _VMEM_LIMIT is None:
        cap = 64 * 1024 * 1024
        try:
            info = pltpu.get_tpu_info()
            cap = int(getattr(info, "vmem_capacity_bytes", cap))
        except Exception:
            pass
        _VMEM_LIMIT = max(32 * 1024 * 1024, min(cap * 3 // 4, 96 * 1024 * 1024))
    return _VMEM_LIMIT


def _block_spec(shape, index_map, resident=False):
    """BlockSpec; grid-constant ('resident') blocks are single-buffered."""
    if resident and _buffered_ok():
        return pl.BlockSpec(shape, index_map, pipeline_mode=pl.Buffered(1))
    return pl.BlockSpec(shape, index_map)


# ---------------------------------------------------------------------------
# Fused Pallas kernels:
#   acc(f32) += x(bf16) @ w(bf16);  at last K step:
#   out(bf16) = [relu]( acc * scale + shift [+ residual] )
# ---------------------------------------------------------------------------
def _gemm_bn_kernel(x_ref, w_ref, s_ref, b_ref, o_ref, acc_ref, *, relu):
    @pl.when(pl.program_id(2) == 0)
    def _():
        acc_ref[...] = jnp.zeros_like(acc_ref)

    acc_ref[...] += jnp.dot(x_ref[...], w_ref[...],
                            preferred_element_type=jnp.float32)

    @pl.when(pl.program_id(2) == pl.num_programs(2) - 1)
    def _():
        y = acc_ref[...] * s_ref[...] + b_ref[...]
        if relu:
            y = jnp.maximum(y, 0.0)
        o_ref[...] = y.astype(o_ref.dtype)


def _gemm_bn_res_kernel(x_ref, w_ref, s_ref, b_ref, r_ref, o_ref, acc_ref, *,
                        relu):
    @pl.when(pl.program_id(2) == 0)
    def _():
        acc_ref[...] = jnp.zeros_like(acc_ref)

    acc_ref[...] += jnp.dot(x_ref[...], w_ref[...],
                            preferred_element_type=jnp.float32)

    @pl.when(pl.program_id(2) == pl.num_programs(2) - 1)
    def _():
        y = (acc_ref[...] * s_ref[...] + b_ref[...]
             + r_ref[...].astype(jnp.float32))
        if relu:
            y = jnp.maximum(y, 0.0)
        o_ref[...] = y.astype(o_ref.dtype)


# ---------------------------------------------------------------------------
# Tile selection.
# ---------------------------------------------------------------------------
def _pick_row_tile(m):
    m8 = _round_up(m, 8)
    if m8 <= _MAX_ROW_TILE:
        return m8, m8                       # single row tile == full (padded) M
    for t in (512, 384, 256, 128):          # exact divisor -> no pad copy at all
        if m % t == 0:
            return t, m
    return 256, _round_up(m, 256)           # rare ragged fallback


def _pick_col_tile(n):
    # Split wide outputs (layer3/4: N=256/512) into two >=128-lane column tiles
    # so both v7x TensorCores get work and per-core weight traffic halves.
    return n // 2 if n >= 256 else n


def _pick_k_tile(k):
    if k > _MAX_K_TILE and k % 128 == 0:
        for t in (1152, 1024, 896, 768, 640, 512, 384, 256, 128):
            if k % t == 0:
                return t
    return k


def fused_conv_gemm(patches, w2d, scale, shift, residual=None, relu=True):
    """(M,K)@(K,N) GEMM with BN scale/shift, optional residual add and ReLU
    fused in the epilogue. bf16 MXU operands, f32 accumulation/epilogue, bf16
    output. Grid = (row tiles, col tiles, K tiles)."""
    m, k = patches.shape
    n = w2d.shape[1]

    patches = patches.astype(jnp.bfloat16)
    w2d = w2d.astype(jnp.bfloat16)
    if residual is not None:
        residual = residual.astype(jnp.bfloat16)

    tm, m_pad = _pick_row_tile(m)
    if m_pad != m:
        # Only the ragged-M fallback; tile choice above makes this a no-op for
        # the usual B*H*W row counts (no extra HBM copy of the patch matrix).
        patches = jnp.pad(patches, ((0, m_pad - m), (0, 0)))
        if residual is not None:
            residual = jnp.pad(residual, ((0, m_pad - m), (0, 0)))

    tn = _pick_col_tile(n)
    tk = _pick_k_tile(k)
    nm, nn, nk = m_pad // tm, n // tn, k // tk

    x_spec = pl.BlockSpec((tm, tk), lambda i, j, kk: (i, kk))
    w_spec = _block_spec((tk, tn), lambda i, j, kk: (kk, j),
                         resident=(nn == 1 and nk == 1))
    v_spec = _block_spec((1, tn), lambda i, j, kk: (0, j), resident=(nn == 1))
    r_spec = pl.BlockSpec((tm, tn), lambda i, j, kk: (i, j))
    o_spec = pl.BlockSpec((tm, tn), lambda i, j, kk: (i, j))

    if residual is None:
        kernel = functools.partial(_gemm_bn_kernel, relu=relu)
        in_specs = [x_spec, w_spec, v_spec, v_spec]
        operands = (patches, w2d, scale, shift)
        res_bytes = 0
    else:
        kernel = functools.partial(_gemm_bn_res_kernel, relu=relu)
        in_specs = [x_spec, w_spec, v_spec, v_spec, r_spec]
        operands = (patches, w2d, scale, shift, residual)
        res_bytes = 2 * m_pad * n

    cost = pl.CostEstimate(
        flops=2 * m_pad * k * n,
        transcendentals=0,
        bytes_accessed=2 * (m_pad * k + k * n + m_pad * n) + 8 * n + res_bytes,
    )

    out = pl.pallas_call(
        kernel,
        out_shape=jax.ShapeDtypeStruct((m_pad, n), jnp.bfloat16),
        grid_spec=pltpu.PrefetchScalarGridSpec(
            num_scalar_prefetch=0,
            grid=(nm, nn, nk),
            in_specs=in_specs,
            out_specs=o_spec,
            scratch_shapes=[pltpu.VMEM((tm, tn), jnp.float32)],
        ),
        compiler_params=pltpu.CompilerParams(
            dimension_semantics=("parallel", "parallel", "arbitrary"),
            vmem_limit_bytes=_vmem_limit_bytes(),
        ),
        cost_estimate=cost,
    )(*operands)
    return out[:m]


# ---------------------------------------------------------------------------
# Convolution = im2col (data movement, left to XLA, bf16) + fused Pallas GEMM.
# ---------------------------------------------------------------------------
def _im2col(x, kh, kw, stride, pad):
    if pad:
        x = jnp.pad(x, ((0, 0), (pad, pad), (pad, pad), (0, 0)))
    b, h, w, c = x.shape
    ho = (h - kh) // stride + 1
    wo = (w - kw) // stride + 1
    cols = []
    for i in range(kh):
        for j in range(kw):
            cols.append(x[:, i:i + stride * (ho - 1) + 1:stride,
                            j:j + stride * (wo - 1) + 1:stride, :])
    patches = jnp.stack(cols, axis=3)            # (B, ho, wo, KH*KW, C)
    return patches.reshape(b * ho * wo, kh * kw * c), ho, wo


def conv_bn(x, p, *, stride, pad, relu, residual=None):
    b = x.shape[0]
    kh, kw, cin, cout = p['w'].shape
    w = p['w']
    if cin % 8 != 0:
        # Stem only: zero-pad Cin 3 -> 8 so the GEMM K dim is sublane-aligned.
        cpad = _round_up(cin, 8) - cin
        x = jnp.pad(x, ((0, 0), (0, 0), (0, 0), (0, cpad)))
        w = jnp.pad(w, ((0, 0), (0, 0), (0, cpad), (0, 0)))
        cin += cpad
    patches, ho, wo = _im2col(x, kh, kw, stride, pad)
    w2d = w.reshape(kh * kw * cin, cout)         # contiguous view, no transpose
    res2d = None if residual is None else residual.reshape(b * ho * wo, cout)
    out = fused_conv_gemm(patches, w2d, p['scale'], p['shift'],
                          residual=res2d, relu=relu)
    return out.reshape(b, ho, wo, cout)


def _maxpool_3x3_s2(x):
    # ResNet stem maxpool: kernel 3, stride 2, pad 1 (NHWC, bf16).
    xp = jnp.pad(x, ((0, 0), (1, 1), (1, 1), (0, 0)), constant_values=-jnp.inf)
    b, h, w, c = xp.shape
    ho = (h - 3) // 2 + 1
    wo = (w - 3) // 2 + 1
    out = None
    for i in range(3):
        for j in range(3):
            s = xp[:, i:i + 2 * (ho - 1) + 1:2, j:j + 2 * (wo - 1) + 1:2, :]
            out = s if out is None else jnp.maximum(out, s)
    return out


# ---------------------------------------------------------------------------
# Bilinear resize (F.interpolate, align_corners=False) as two small separable
# interpolation matmuls.
# ---------------------------------------------------------------------------
def _bilinear_matrix(in_size, out_size):
    o = np.arange(out_size, dtype=np.float64)
    src = np.maximum((o + 0.5) * (in_size / out_size) - 0.5, 0.0)
    i0 = np.minimum(np.floor(src), in_size - 1).astype(np.int64)
    i1 = np.minimum(i0 + 1, in_size - 1)
    w1 = (src - i0).astype(np.float32)
    mat = np.zeros((out_size, in_size), dtype=np.float32)
    mat[np.arange(out_size), i0] += 1.0 - w1
    mat[np.arange(out_size), i1] += w1
    return jnp.asarray(mat)


def _bilinear_resize_nchw_to_nhwc(imgs, out_size):
    _, _, h, w = imgs.shape
    ah = _bilinear_matrix(h, out_size)
    aw = _bilinear_matrix(w, out_size)
    x = jnp.einsum('oh,bchw->bcow', ah, imgs)
    x = jnp.einsum('pw,bcow->bcop', aw, x)
    return jnp.transpose(x, (0, 2, 3, 1))        # NHWC


# ---------------------------------------------------------------------------
# Deterministic ResNet-18 parameters (eval-mode BN folded to scale/shift).
# ---------------------------------------------------------------------------
def _make_conv_bn_params(key, kh, kw, cin, cout):
    k_w, k_g, k_b, k_m, k_v = jax.random.split(key, 5)
    fan_in = kh * kw * cin
    w = jax.random.normal(k_w, (kh, kw, cin, cout), jnp.float32) * np.sqrt(2.0 / fan_in)
    gamma = 1.0 + 0.1 * jax.random.normal(k_g, (cout,), jnp.float32)
    beta = 0.1 * jax.random.normal(k_b, (cout,), jnp.float32)
    mean = 0.1 * jax.random.normal(k_m, (cout,), jnp.float32)
    var = 1.0 + 0.1 * jnp.abs(jax.random.normal(k_v, (cout,), jnp.float32))
    scale = gamma * jax.lax.rsqrt(var + 1e-5)
    shift = beta - mean * scale
    return {'w': w, 'scale': scale.reshape(1, cout), 'shift': shift.reshape(1, cout)}


def make_res18_params(key):
    keys = iter(jax.random.split(key, 32))
    params = {'conv1': _make_conv_bn_params(next(keys), 7, 7, 3, 64)}
    cin = 64
    for li, cout in enumerate((64, 128, 256, 512)):
        blocks = []
        for bi in range(2):
            stride = 2 if (li > 0 and bi == 0) else 1
            needs_ds = (stride != 1) or (cin != cout)
            blocks.append({
                'stride': stride,
                'conv1': _make_conv_bn_params(next(keys), 3, 3, cin, cout),
                'conv2': _make_conv_bn_params(next(keys), 3, 3, cout, cout),
                'downsample': (_make_conv_bn_params(next(keys), 1, 1, cin, cout)
                               if needs_ds else None),
            })
            cin = cout
        params[f'layer{li + 1}'] = blocks
    return params


# ---------------------------------------------------------------------------
# Full forward (Pallas conv path, bf16 activations).
# ---------------------------------------------------------------------------
def res18_backbone_forward(imgs, params, input_resolution=64):
    """Res18Backbone.forward: (B, 3, H, W) NCHW images -> (B, 512) features."""
    x = _bilinear_resize_nchw_to_nhwc(imgs, input_resolution)
    x = conv_bn(x, params['conv1'], stride=2, pad=3, relu=True)      # stem
    x = _maxpool_3x3_s2(x)
    for name in ('layer1', 'layer2', 'layer3', 'layer4'):
        for bp in params[name]:
            identity = x
            out = conv_bn(x, bp['conv1'], stride=bp['stride'], pad=1, relu=True)
            if bp['downsample'] is not None:
                identity = conv_bn(x, bp['downsample'], stride=bp['stride'],
                                   pad=0, relu=False)
            x = conv_bn(out, bp['conv2'], stride=1, pad=1, relu=True,
                        residual=identity)
    x = jnp.mean(x.astype(jnp.float32), axis=(1, 2))                 # avgpool(1)
    return x.reshape(x.shape[0], -1)                                 # .view(B,-1)


# ---------------------------------------------------------------------------
# Pure-JAX f32 reference (lax conv / reduce_window) for correctness checking.
# ---------------------------------------------------------------------------
def _reference_forward(imgs, params, input_resolution=64):
    def conv(x, p, stride, pad):
        return jax.lax.conv_general_dilated(
            x, p['w'], window_strides=(stride, stride),
            padding=((pad, pad), (pad, pad)),
            dimension_numbers=('NHWC', 'HWIO', 'NHWC'),
            precision=jax.lax.Precision.HIGHEST)

    def conv_bn_ref(x, p, stride, pad, relu, residual=None):
        y = conv(x, p, stride, pad)
        y = y * p['scale'].reshape(1, 1, 1, -1) + p['shift'].reshape(1, 1, 1, -1)
        if residual is not None:
            y = y + residual
        return jnp.maximum(y, 0.0) if relu else y

    x = _bilinear_resize_nchw_to_nhwc(imgs, input_resolution)
    x = conv_bn_ref(x, params['conv1'], 2, 3, True)
    x = jax.lax.reduce_window(x, -jnp.inf, jax.lax.max,
                              (1, 3, 3, 1), (1, 2, 2, 1),
                              ((0, 0), (1, 1), (1, 1), (0, 0)))
    for name in ('layer1', 'layer2', 'layer3', 'layer4'):
        for bp in params[name]:
            identity = x
            out = conv_bn_ref(x, bp['conv1'], bp['stride'], 1, True)
            if bp['downsample'] is not None:
                identity = conv_bn_ref(x, bp['downsample'], bp['stride'], 0, False)
            x = conv_bn_ref(out, bp['conv2'], 1, 1, True, residual=identity)
    return jnp.mean(x, axis=(1, 2))


if __name__ == "__main__":
    key = jax.random.PRNGKey(0)
    k_img, k_par = jax.random.split(key)

    # Small but non-degenerate shapes: 2 RGB images, resized to 64x64 inside
    # the backbone (the module's input_resolution knob; 224 in production).
    imgs = jax.random.normal(k_img, (2, 3, 24, 32), dtype=jnp.float32)
    params = make_res18_params(k_par)

    out = res18_backbone_forward(imgs, params, input_resolution=64)
    out = jax.block_until_ready(out)
    assert out.shape == (2, 512)

    ref = jax.block_until_ready(_reference_forward(imgs, params, input_resolution=64))
    # Tolerance sized for the bf16-operand MXU path through 20 fused convs
    # (f32 accumulation / epilogue); an all-f32 path measures ~1e-6 here.
    rel_err = float(jnp.max(jnp.abs(out - ref)) / (jnp.max(jnp.abs(ref)) + 1e-6))
    assert rel_err < 5e-2, rel_err

    print("KERNEL_OK")
</pallas_src>

<mosaic_0001>
module attributes {stable_mosaic.version = 11 : i64} {
  func.func @_k(%arg0: i32, %arg1: memref<8x128xf32, #tpu.memory_space<vmem>>, %arg2: memref<8x128xf32, #tpu.memory_space<vmem>>) attributes {dimension_semantics = [#tpu.dimension_semantics<arbitrary>], iteration_bounds = array<i64: 2>, scalar_prefetch = 0 : i64, scratch_operands = 0 : i64, tpu.core_type = #tpu.core_type<tc>, window_params = [{pipeline_mode = #tpu.pipeline_mode<synchronous>, transform_indices = @transform_0, window_bounds = array<i64: 8, 128>}, {transform_indices = @transform_1, window_bounds = array<i64: 8, 128>}]} {
    %c0 = arith.constant 0 : index
    %c0_0 = arith.constant 0 : index
    %0 = vector.load %arg1[%c0, %c0_0] : memref<8x128xf32, #tpu.memory_space<vmem>>, vector<8x128xf32>
    %c0_1 = arith.constant 0 : index
    %c0_2 = arith.constant 0 : index
    %1 = vector.load %arg2[%c0_1, %c0_2] : memref<8x128xf32, #tpu.memory_space<vmem>>, vector<8x128xf32>
    tpu.vector_store %arg2[%c0_1, %c0_2], %0 {strides = array<i32>} : memref<8x128xf32, #tpu.memory_space<vmem>>, vector<8x128xf32>,
    return
  }
  func.func @transform_0(%arg0: i32) -> (i32, i32) {
    %c0_i32 = arith.constant 0 : i32
    %c0_i32_0 = arith.constant 0 : i32
    %c0_i32_1 = arith.constant 0 : i32
    return %c0_i32, %c0_i32_0 : i32, i32
  }
  func.func @transform_1(%arg0: i32) -> (i32, i32) {
    %c0_i32 = arith.constant 0 : i32
    %c0_i32_0 = arith.constant 0 : i32
    return %arg0, %c0_i32 : i32, i32
  }
}

module attributes {stable_mosaic.version = 11 : i64} {
  func.func @_gemm_bn_kernel(%arg0: i32, %arg1: i32, %arg2: i32, %arg3: memref<512x392xbf16, #tpu.memory_space<vmem>>, %arg4: memref<392x64xbf16, #tpu.memory_space<vmem>>, %arg5: memref<1x64xf32, #tpu.memory_space<vmem>>, %arg6: memref<1x64xf32, #tpu.memory_space<vmem>>, %arg7: memref<512x64xbf16, #tpu.memory_space<vmem>>, %arg8: memref<512x64xf32, #tpu.memory_space<vmem>>) attributes {dimension_semantics = [#tpu.dimension_semantics<parallel>, #tpu.dimension_semantics<parallel>, #tpu.dimension_semantics<arbitrary>], iteration_bounds = array<i64: 4, 1, 1>, scalar_prefetch = 0 : i64, scratch_operands = 1 : i64, tpu.core_type = #tpu.core_type<tc>, window_params = [{transform_indices = @transform_0, window_bounds = array<i64: 512, 392>}, {transform_indices = @transform_1, window_bounds = array<i64: 392, 64>}, {transform_indices = @transform_2, window_bounds = array<i64: 1, 64>}, {transform_indices = @transform_3, window_bounds = array<i64: 1, 64>}, {transform_indices = @transform_4, window_bounds = array<i64: 512, 64>}]} {
    %c0_i32 = arith.constant 0 : i32
    %0 = arith.cmpi eq, %arg2, %c0_i32 : i32
    %1 = arith.extui %0 : i1 to i32
    %c0_i32_0 = arith.constant 0 : i32
    %2 = arith.cmpi ne, %1, %c0_i32_0 : i32
    scf.if %2 {
      %cst_10 = arith.constant 0.000000e+00 : f32
      %12 = vector.broadcast %cst_10 : f32 to vector<512x64xf32>
      %c0_11 = arith.constant 0 : index
      %c0_12 = arith.constant 0 : index
      %13 = vector.load %arg8[%c0_11, %c0_12] : memref<512x64xf32, #tpu.memory_space<vmem>>, vector<512x64xf32>
      tpu.vector_store %arg8[%c0_11, %c0_12], %12 {strides = array<i32>} : memref<512x64xf32, #tpu.memory_space<vmem>>, vector<512x64xf32>,
    } else {
    }
    %c0 = arith.constant 0 : index
    %c0_1 = arith.constant 0 : index
    %3 = vector.load %arg8[%c0, %c0_1] : memref<512x64xf32, #tpu.memory_space<vmem>>, vector<512x64xf32>
    %c0_2 = arith.constant 0 : index
    %c0_3 = arith.constant 0 : index
    %4 = vector.load %arg3[%c0_2, %c0_3] : memref<512x392xbf16, #tpu.memory_space<vmem>>, vector<512x392xbf16>
    %c0_4 = arith.constant 0 : index
    %c0_5 = arith.constant 0 : index
    %5 = vector.load %arg4[%c0_4, %c0_5] : memref<392x64xbf16, #tpu.memory_space<vmem>>, vector<392x64xbf16>
    %cst = arith.constant dense<0.000000e+00> : vector<512x64xf32>
    %6 = tpu.matmul %4, %5, %cst {dimension_numbers = #tpu.dot_dimension_numbers<[1], [0], [0], [1], [0, 0, 1, 1], [], []>} : vector<512x392xbf16>, vector<392x64xbf16>, vector<512x64xf32> -> vector<512x64xf32>
    %7 = arith.addf %3, %6 : vector<512x64xf32>
    %c0_6 = arith.constant 0 : index
    %c0_7 = arith.constant 0 : index
    %8 = vector.load %arg8[%c0_6, %c0_7] : memref<512x64xf32, #tpu.memory_space<vmem>>, vector<512x64xf32>
    tpu.vector_store %arg8[%c0_6, %c0_7], %7 {strides = array<i32>} : memref<512x64xf32, #tpu.memory_space<vmem>>, vector<512x64xf32>,
    %c0_i32_8 = arith.constant 0 : i32
    %9 = arith.cmpi eq, %arg2, %c0_i32_8 : i32
    %10 = arith.extui %9 : i1 to i32
    %c0_i32_9 = arith.constant 0 : i32
    %11 = arith.cmpi ne, %10, %c0_i32_9 : i32
    scf.if %11 {
      %c0_10 = arith.constant 0 : index
      %c0_11 = arith.constant 0 : index
      %12 = vector.load %arg8[%c0_10, %c0_11] : memref<512x64xf32, #tpu.memory_space<vmem>>, vector<512x64xf32>
      %c0_12 = arith.constant 0 : index
      %c0_13 = arith.constant 0 : index
      %13 = vector.load %arg5[%c0_12, %c0_13] : memref<1x64xf32, #tpu.memory_space<vmem>>, vector<1x64xf32>
      %14 = vector.broadcast %13 : vector<1x64xf32> to vector<512x64xf32>
      %15 = arith.mulf %12, %14 : vector<512x64xf32>
      %c0_14 = arith.constant 0 : index
      %c0_15 = arith.constant 0 : index
      %16 = vector.load %arg6[%c0_14, %c0_15] : memref<1x64xf32, #tpu.memory_space<vmem>>, vector<1x64xf32>
      %17 = vector.broadcast %16 : vector<1x64xf32> to vector<512x64xf32>
      %18 = arith.addf %15, %17 : vector<512x64xf32>
      %cst_16 = arith.constant 0.000000e+00 : f32
      %19 = vector.broadcast %cst_16 : f32 to vector<512x64xf32>
      %20 = arith.maximumf %18, %19 : vector<512x64xf32>
      %21 = arith.truncf %20 : vector<512x64xf32> to vector<512x64xbf16>
      %c0_17 = arith.constant 0 : index
      %c0_18 = arith.constant 0 : index
      %22 = vector.load %arg7[%c0_17, %c0_18] : memref<512x64xbf16, #tpu.memory_space<vmem>>, vector<512x64xbf16>
      tpu.vector_store %arg7[%c0_17, %c0_18], %21 {strides = array<i32>} : memref<512x64xbf16, #tpu.memory_space<vmem>>, vector<512x64xbf16>,
    } else {
    }
    return
  }
  func.func @transform_0(%arg0: i32, %arg1: i32, %arg2: i32) -> (i32, i32) {
    %c0_i32 = arith.constant 0 : i32
    return %arg0, %arg2 : i32, i32
  }
  func.func @transform_1(%arg0: i32, %arg1: i32, %arg2: i32) -> (i32, i32) {
    %c0_i32 = arith.constant 0 : i32
    return %arg2, %arg1 : i32, i32
  }
  func.func @transform_2(%arg0: i32, %arg1: i32, %arg2: i32) -> (i32, i32) {
    %c0_i32 = arith.constant 0 : i32
    %c0_i32_0 = arith.constant 0 : i32
    return %c0_i32, %arg1 : i32, i32
  }
  func.func @transform_3(%arg0: i32, %arg1: i32, %arg2: i32) -> (i32, i32) {
    %c0_i32 = arith.constant 0 : i32
    %c0_i32_0 = arith.constant 0 : i32
    return %c0_i32, %arg1 : i32, i32
  }
  func.func @transform_4(%arg0: i32, %arg1: i32, %arg2: i32) -> (i32, i32) {
    %c0_i32 = arith.constant 0 : i32
    return %arg0, %arg1 : i32, i32
  }
}

</mosaic_0001>

<bundles_post_ra>
// kernel: tpu_custom_call.1
= control target key start
LH: loop header
LB: loop body
LE: loop exit
PB: predicated region body
PF: predicated region fallthrough
CT: control target
= control target key end

     0   :  { %6 = vsyncpa [#allocation3], 0  ;;  %s440_s0 = inlined_call_operand.hbm [shape: f32[16,128], index: 0, kind: input, shape index: {}]   ;;  %s441_s1 = inlined_call_operand.hbm [shape: f32[16,128], index: 1, kind: output, shape index: {}]  }
   0x1   :  { %7 = vsyncpa [#allocation4], 0 }
   0x2   :  { %9 = vsyncpa [#allocation4 + $0x1], 0  ;;  %s356_s6 = smov 0   ;;  %s358_s7 = smov 0  }
   0x3   :  { %s360_s8 = smov 0   ;;  %s362_s9 = smov 0  }
   0x4 LB: > { %s377_s10 = sadd.s32 4294967295, %s343_s9   ;;  %s187_s11 = sadd.s32 4294967294, %s343_s9   ;;  %s343_s9 = sphi %s362_s9, %s447_s9   ;;  %s339_s8 = sphi %s360_s8, %s446_s8   ;;  %s335_s7 = sphi %s358_s7, %s445_s7   ;;  %s331_s6 = sphi %s356_s6, %s444_s6  }
   0x5   : > { %s381_s12 = sadd.s32 1, %s343_s9   ;;  %s43_s13 = sadd.s32 1, %s339_s8 }
   0x6   : > { %s40_s14 = ssub.s32 %s343_s9, %s381_s12  ;;  %p53_p0 = scmp.ne.s32.totalorder %s339_s8, %s335_s7 }
   0x7   : > { %p41_p1 = scmp.eq.s32.totalorder %s40_s14, 0  ;;  %p54_p2 = scmp.eq.s32.totalorder %s377_s10, 1 }
   0x8   : > { %p59_p3 = scmp.ne.s32.totalorder %s335_s7, %s331_s6  ;;  %p60_p4 = scmp.eq.s32.totalorder %s187_s11, 1 }
   0x9   : > { %s392_s15 = scalar_select %p41_p1, %s339_s8, %s43_s13  }
   0xa   : > { %p394_p5 = por %p54_p2, %p53_p0  ;;  %p398_p6 = por %p60_p4, %p59_p3 }
   0xb   : > { %p188_p7 = scmp.ge.s32.totalorder %s343_s9, 1  ;;  %p67_p8 = scmp.lt.s32.totalorder %s343_s9, 3 }
   0xc   : > { %p211_p9 = scmp.eq.s32.totalorder %s377_s10, 0  ;;  %s79_s20 = sshll.u32 %s440_s0, 4  ;;  %s80_s20 = int_to_ptr.hbm [resolvable:$true] %s79_s20 }
   0xd   : > { %p68_p10 = pnand %p188_p7, %p67_p8  ;;  %s345_s21 = smov [#allocation2]  }
   0xe   : > { %s81_s22 = sshll.u32 %s345_s21, 4  ;;  %s82_s22 = int_to_ptr.vmem [resolvable:$true] %s81_s22 }
   0xf   : > { %p203_p11 = pneg %p68_p10  ;;  %94 = sbr.rel (%p68_p10) target bundleno = 37 (0x25), region = 24 }
  0x11   : > { %p204_p12 = pnand %p211_p9, %p203_p11 }
  0x13   : > { %206 = dma.hbm_to_vmem [thread:$0]  (!%p204_p12), %s80_s20, 128, %s82_s22, [#allocation3]  }
  0x14   : > { %322 = dma.done.wait (%p211_p9), [#allocation3], 128  }
  0x15   : > { %324 = vsyncadd (%p211_p9), [#allocation3], 4294967168  ;;  %s107_s23 = sand.u32 1, %s335_s7   ;;  %s194_s24 = sshll.u32 %s377_s10, 3  ;;  %v110_v0 = vld [vmem:[#allocation2] sm:$0xff] }
  0x16   : > { %s192_s25 = sshll.u32 %s107_s23, 3  ;;  %s123_s28 = scalar_lea.hbm %s441_s1, %s194_s24 }
  0x17   : > { %s109_s29 = scalar_lea.vmem [#allocation5], %s192_s25  ;;  %s127_s2 = sshll.u32 %s123_s28, 4  ;;  %s128_s2 = int_to_ptr.hbm [resolvable:$true] %s127_s2 }
  0x18   : > { %s125_s30 = sshll.u32 %s109_s29, 4  ;;  %111 = vst [vmem:[%s109_s29] sm:$0xff] %v110_v0  ;;  %s113_s3 = scalar_lea.sflag [#allocation4], %s107_s23  ;;  %s126_s30 = int_to_ptr.vmem [resolvable:$true] %s125_s30 }
  0x19   : > { %s291_s4 = sshra.s32 %s128_s2, 4  ;;  %s297_s13 = scalar_lea.hbm %s441_s1, 16  ;;  %s292_s4 = int_to_ptr.hbm [resolvable:$true] %s291_s4 }
  0x1a   : > { %s293_s5 = scalar_lea.hbm %s292_s4, 8  ;;  %p298_p2 = scmp.lt.s32.totalorder %s292_s4, %s441_s1 }
  0x1b   : > { %p294_p13 = scmp.ne.s32.totalorder %s292_s4, %s293_s5  ;;  %p299_p3 = scmp.lt.s32.totalorder %s297_s13, %s293_s5 }
  0x1d   : > { %p295_p0 = pnand %p294_p13, %p394_p5  ;;  %p300_p4 = por %p299_p3, %p298_p2 }
  0x1f   : > { %p296_p1 = pneg %p295_p0 }
  0x21   : > { %p301_p7 = pnand %p300_p4, %p296_p1 }
  0x23   : > { %304 = shalt.err (!%p301_p7)
}
  0x24   : > { %201 = dma.vmem_to_hbm [thread:$0]  (%p394_p5), %s126_s30, 128, %s128_s2, %s113_s3  }
  0x25 PF: > { %p213_p8 = scmp.ge.s32.totalorder %s343_s9, 2  ;;  %s139_s19 = sand.u32 1, %s331_s6  }
  0x26   : > { %s140_s20 = scalar_lea.sflag [#allocation4], %s139_s19 }
  0x27   : > { %p208_p9 = pnand %p213_p8, %p398_p6 }
  0x29   : > { %p209_p10 = pneg %p208_p9 }
  0x2b   : > { %326 = dma.done.wait (%p209_p10), %s140_s20, 128  }
  0x2c   : > { %328 = vsyncadd (%p209_p10), %s140_s20, 4294967168  ;;  %p12_p11 = scmp.ge.s32.totalorder %s381_s12, 4   ;;  %s444_s6 = smov %s335_s7 }
  0x2d   : > { %s445_s7 = smov %s339_s8  ;;  %s446_s8 = smov %s392_s15 }
  0x2e   : > { %s447_s9 = smov %s381_s12  ;;  %14 = sbr.rel (!%p12_p11) target bundleno = 4 (0x4), region = 61 }
  0x33   :  { %146 = vsyncpa [#allocation3], 1 }
  0x34   :  { %148 = vsyncpa [#allocation3 + $0x1], 1 }
  0x35   :  { %149 = vsyncpa [#allocation4], 1 }
  0x36   :  { %151 = vsyncpa [#allocation4 + $0x1], 1 }

// kernel: tpu_custom_call.1
= control target key start
LH: loop header
LB: loop body
LE: loop exit
PB: predicated region body
PF: predicated region fallthrough
CT: control target
= control target key end

     0   :  { %s3691_s15 = smov 0   ;;  %s3693_s16 = smov 0   ;;  %s4657_s0 = inlined_call_operand.vmem [shape: bf16[2048,392], index: 0, kind: input, shape index: {}]   ;;  %s4658_s1 = inlined_call_operand.vmem [shape: bf16[392,64], index: 1, kind: input, shape index: {}]   ;;  %s4659_s2 = inlined_call_operand.vmem [shape: f32[1,64], index: 2, kind: input, shape index: {}]   ;;  %s4660_s3 = inlined_call_operand.vmem [shape: f32[1,64], index: 3, kind: input, shape index: {}]   ;;  %s4661_s4 = inlined_call_operand.vmem [shape: bf16[2048,64], index: 4, kind: output, shape index: {}]  }
   0x1   :  { %s3695_s17 = smov 0  }
   0x2 LB: > { %s33_s18 = sadd.s32 1, %s3659_s16  ;;  %p2809_p0 = scmp.ge.s32.totalorder %s3663_s17, 1  ;;  %s3663_s17 = sphi %s3695_s17, %s14_s17   ;;  %s3659_s16 = sphi %s3693_s16, %s4663_s16   ;;  %s3655_s15 = sphi %s3691_s15, %s4662_s15  }
   0x3   : > { %p35_p1 = scmp.ge.s32.totalorder %s33_s18, 4  ;;  %p224_p2 = scmp.lt.s32.totalorder %s3663_s17, 5 }
   0x5   : > { %s4665_s18 = smov (%p35_p1, %s33_s18), 0  ;;  %p225_p3 = pnand %p2809_p0, %p224_p2 }
   0x6   : > { %s2810_s25 = sshll.u32 (!%p225_p3), %s3655_s15, 6 }
   0x7   : > { %228 = sbr.rel (%p225_p3) target bundleno = 705 (0x2c1), region = 36  ;;  %p274_p4 = scmp.lt.s32.totalorder (!%p225_p3), %s2810_s25, 255 }
   0xc   : > { %v3593_v0 = vld [vmem:[%s4658_s1 + $0x38] sm:$0xff]  ;;  %v3592_v3 = vld [vmem:[%s4658_s1 + $0x30] sm:$0xff]  ;;  %s4667_s25 = smov (!%p274_p4, %s2810_s25), 255  ;;  %v3591_v6 = vld [vmem:[%s4658_s1 + $0x28] sm:$0xff]  ;;  %vm1471_vm0 = vcmask 1043456   ;;  %vm1374_vm1 = vcmask 64512  }
   0xd   : > { %v3601_v1 = vld [vmem:[%s4658_s1 + $0x78] sm:$0xff]  ;;  %1475 = vmatpush.bf16.msra.mxu0 %v3593_v0  ;;  %v3600_v4 = vld [vmem:[%s4658_s1 + $0x70] sm:$0xff]  ;;  %s3457_s6 = sshll.u32 %s4667_s25, 4  ;;  %v3599_v7 = vld [vmem:[%s4658_s1 + $0x68] sm:$0xff]  ;;  %vm313_vm2 = vcmask 523264   ;;  %s2814_s9 = sshll.u32 %s4667_s25, 2 }
   0xe   : > { %v3609_v2 = vld [vmem:[%s4658_s1 + $0xb8] sm:$0xff]  ;;  %1644 = vmatpush.bf16.msra.mxu1 %v3601_v1  ;;  %v3608_v5 = vld [vmem:[%s4658_s1 + $0xb0] sm:$0xff]  ;;  %v618_v8 = vld [vmem:[%s4658_s1 + $0xc0] sm:$0xf]  ;;  %s3742_s15 = scalar_lea.vmem %s4657_s0, %s3457_s6  ;;  %s4020_s11 = scalar_lea.vmem %s4661_s4, %s2814_s9  ;;  %vm2611_vm3 = vcmask 519168  }
   0xf   : > { %1813 = vmatpush.bf16.msra.mxu2 %v3609_v2  ;;  %v3607_v9 = vld [vmem:[%s4658_s1 + $0xa8] sm:$0xff]  ;;  %v1324_v10 = vunpack.c.l.b16 %v618_v8  ;;  %v2827_v12 = vld [vmem:[%s3742_s15 + $0x18] sm:$0xf0]  ;;  %v3590_v14 = vld [vmem:[%s4658_s1 + $0x20] sm:$0xff] }
  0x10   : > { %v3459_v11 = vld [vmem:[%s3742_s15 + $0xc] sm:$0xf]  ;;  %v3598_v15 = vld [vmem:[%s4658_s1 + $0x60] sm:$0xff]  ;;  %v3589_v19 = vld [vmem:[%s4658_s1 + $0x18] sm:$0xff] }
  0x11   : > { %1476 = vmatpush.bf16.msra.mxu0 %v3592_v3  ;;  %v1349_v13 = vpack.c.b16 %v1324_v10, %v1324_v10  ;;  %v3606_v16 = vld [vmem:[%s4658_s1 + $0xa0] sm:$0xff]  ;;  %v2830_v18 = vor.u32 %v3459_v11, %v2827_v12  ;;  %v3597_v20 = vld [vmem:[%s4658_s1 + $0x58] sm:$0xff]  ;;  %v3588_v22 = vld [vmem:[%s4658_s1 + $0x10] sm:$0xff] }
  0x12   : > { %1645 = vmatpush.bf16.msra.mxu1 %v3600_v4  ;;  %v3605_v21 = vld [vmem:[%s4658_s1 + $0x98] sm:$0xff]  ;;  %v3596_v23 = vld [vmem:[%s4658_s1 + $0x50] sm:$0xff]  ;;  %v3587_v25 = vld [vmem:[%s4658_s1 + $0x8] sm:$0xff] }
  0x13   : > { %1814 = vmatpush.bf16.msra.mxu2 %v3608_v5  ;;  %v1473_v17 = vsel %vm1471_vm0, %v1349_v13, 0  ;;  %v3604_v24 = vld [vmem:[%s4658_s1 + $0x90] sm:$0xff]  ;;  %v3595_v26 = vld [vmem:[%s4658_s1 + $0x48] sm:$0xff]  ;;  %v2843_v29 = vld [vmem:[%s3742_s15 + $0x38] sm:$0xf0] }
  0x14   : > { %1989 = vmatpush.bf16.msra.mxu3 %v1473_v17  ;;  %v3603_v27 = vld [vmem:[%s4658_s1 + $0x88] sm:$0xff]  ;;  %v3586_v30 = vld [vmem:[%s4658_s1] sm:$0xff]  ;;  %v3460_v33 = vld [vmem:[%s3742_s15 + $0xc] sm:$0xf0] }
  0x15   : > { %1477 = vmatpush.bf16.msra.mxu0 %v3591_v6  ;;  %v3463_v28 = vld [vmem:[%s3742_s15 + $0x2c] sm:$0xf]  ;;  %v3594_v31 = vld [vmem:[%s4658_s1 + $0x40] sm:$0xff]  ;;  %v2819_v35 = vld [vmem:[%s3742_s15 + $0x10] sm:$0xf0] }
  0x16   : > { %1646 = vmatpush.bf16.msra.mxu1 %v3599_v7  ;;  %v2817_v32 = vld [vmem:[%s3742_s15] sm:$0xf]  ;;  %v3458_v34 = vld [vmem:[%s3742_s15 + $0x4] sm:$0xf]  ;;  %v2825_v37 = vld [vmem:[%s3742_s15 + $0x8] sm:$0xf]  ;;  %v2846_v39 = vor.u32 %v3463_v28, %v2843_v29 }
  0x17   : > { %1815 = vmatpush.bf16.msra.mxu2 %v3607_v9  ;;  %3423 = vmatmul.msk.bf16.vlgmr.msra.gmra.mxu3 %vm1374_vm1, %v2830_v18  ;;  %v3602_v36 = vld [vmem:[%s4658_s1 + $0x80] sm:$0xff]  ;;  %v3461_v38 = vld [vmem:[%s3742_s15 + $0x14] sm:$0xf0]  ;;  %v2818_v40 = vor.u32 %v3460_v33, %v2817_v32  ;;  %v2822_v41 = vor.u32 %v3458_v34, %v2819_v35  ;;  %v3467_v43 = vld [vmem:[%s3742_s15 + $0x4c] sm:$0xf] }
  0x18   : > { %v2826_v42 = vor.u32 %v3461_v38, %v2825_v37  ;;  %v2859_v44 = vld [vmem:[%s3742_s15 + $0x58] sm:$0xf0]  ;;  %v2833_v45 = vld [vmem:[%s3742_s15 + $0x20] sm:$0xf]  ;;  %v3464_v46 = vld [vmem:[%s3742_s15 + $0x2c] sm:$0xf0] }
  0x19   : > { %1478 = vmatpush.bf16.msra.mxu0 %v3590_v14  ;;  %v3462_v47 = vld [vmem:[%s3742_s15 + $0x24] sm:$0xf]  ;;  %v2835_v48 = vld [vmem:[%s3742_s15 + $0x30] sm:$0xf0]  ;;  %v2841_v49 = vld [vmem:[%s3742_s15 + $0x28] sm:$0xf]  ;;  %v2862_v51 = vor.u32 %v3467_v43, %v2859_v44  ;;  %v2834_v52 = vor.u32 %v3464_v46, %v2833_v45 }
  0x1a   : > { %1647 = vmatpush.bf16.msra.mxu1 %v3598_v15  ;;  %v3465_v50 = vld [vmem:[%s3742_s15 + $0x34] sm:$0xf0]  ;;  %v2838_v53 = vor.u32 %v3462_v47, %v2835_v48  ;;  %v3471_v55 = vld [vmem:[%s3742_s15 + $0x6c] sm:$0xf]  ;;  %v2875_v56 = vld [vmem:[%s3742_s15 + $0x78] sm:$0xf0] }
  0x1b   : > { %1816 = vmatpush.bf16.msra.mxu2 %v3606_v16  ;;  %v2842_v54 = vor.u32 %v3465_v50, %v2841_v49  ;;  %v2849_v57 = vld [vmem:[%s3742_s15 + $0x40] sm:$0xf]  ;;  %v3468_v58 = vld [vmem:[%s3742_s15 + $0x4c] sm:$0xf0]  ;;  %v3466_v59 = vld [vmem:[%s3742_s15 + $0x44] sm:$0xf]  ;;  %v2878_v63 = vor.u32 %v3471_v55, %v2875_v56 }
  0x1c   : > { %v2851_v60 = vld [vmem:[%s3742_s15 + $0x50] sm:$0xf0]  ;;  %v2857_v61 = vld [vmem:[%s3742_s15 + $0x48] sm:$0xf]  ;;  %v3469_v62 = vld [vmem:[%s3742_s15 + $0x54] sm:$0xf0]  ;;  %v2850_v0 = vor.u32 %v3468_v58, %v2849_v57 }
  0x1d   : > { %1479 = vmatpush.bf16.msra.mxu0 %v3589_v19  ;;  %v2854_v1 = vor.u32 %v3466_v59, %v2851_v60  ;;  %v2858_v2 = vor.u32 %v3469_v62, %v2857_v61  ;;  %v3475_v3 = vld [vmem:[%s3742_s15 + $0x8c] sm:$0xf]  ;;  %v2891_v4 = vld [vmem:[%s3742_s15 + $0x98] sm:$0xf0]  ;;  %v2865_v5 = vld [vmem:[%s3742_s15 + $0x60] sm:$0xf] }
  0x1e   : > { %1648 = vmatpush.bf16.msra.mxu1 %v3597_v20  ;;  %v3472_v6 = vld [vmem:[%s3742_s15 + $0x6c] sm:$0xf0]  ;;  %v3470_v7 = vld [vmem:[%s3742_s15 + $0x64] sm:$0xf]  ;;  %v2867_v8 = vld [vmem:[%s3742_s15 + $0x70] sm:$0xf0]  ;;  %v2894_v11 = vor.u32 %v3475_v3, %v2891_v4 }
  0x1f   : > { %1817 = vmatpush.bf16.msra.mxu2 %v3605_v21  ;;  %v2873_v9 = vld [vmem:[%s3742_s15 + $0x68] sm:$0xf]  ;;  %v3473_v10 = vld [vmem:[%s3742_s15 + $0x74] sm:$0xf0]  ;;  %v2866_v12 = vor.u32 %v3472_v6, %v2865_v5  ;;  %v2870_v13 = vor.u32 %v3470_v7, %v2867_v8  ;;  %v3479_v15 = vld [vmem:[%s3742_s15 + $0xac] sm:$0xf] }
  0x20   : > { %v2874_v14 = vor.u32 %v3473_v10, %v2873_v9  ;;  %v2907_v16 = vld [vmem:[%s3742_s15 + $0xb8] sm:$0xf0]  ;;  %v2881_v17 = vld [vmem:[%s3742_s15 + $0x80] sm:$0xf]  ;;  %v3476_v18 = vld [vmem:[%s3742_s15 + $0x8c] sm:$0xf0] }
  0x21   : > { %1480 = vmatpush.bf16.msra.mxu0 %v3588_v22  ;;  %v3474_v19 = vld [vmem:[%s3742_s15 + $0x84] sm:$0xf]  ;;  %v2883_v20 = vld [vmem:[%s3742_s15 + $0x90] sm:$0xf0]  ;;  %v2889_v21 = vld [vmem:[%s3742_s15 + $0x88] sm:$0xf] }
  0x22   : > { %1649 = vmatpush.bf16.msra.mxu1 %v3596_v23  ;;  %v3477_v22 = vld [vmem:[%s3742_s15 + $0x94] sm:$0xf0]  ;;  %v2910_v23 = vor.u32 %v3479_v15, %v2907_v16  ;;  %v2923_v28 = vld [vmem:[%s3742_s15 + $0xd8] sm:$0xf0]  ;;  %v2897_v29 = vld [vmem:[%s3742_s15 + $0xa0] sm:$0xf] }
  0x23   : > { %1818 = vmatpush.bf16.msra.mxu2 %v3604_v24  ;;  %v2882_v24 = vor.u32 %v3476_v18, %v2881_v17  ;;  %v2899_v32 = vld [vmem:[%s3742_s15 + $0xb0] sm:$0xf0]  ;;  %v2905_v33 = vld [vmem:[%s3742_s15 + $0xa8] sm:$0xf]  ;;  %v3481_v34 = vld [vmem:[%s3742_s15 + $0xb4] sm:$0xf0] }
  0x24   : > { %v2906_v38 = vor.u32 %v3481_v34, %v2905_v33  ;;  %v3482_v43 = vld [vmem:[%s3742_s15 + $0xc4] sm:$0xf]  ;;  %v2915_v44 = vld [vmem:[%s3742_s15 + $0xd0] sm:$0xf0]  ;;  %v2921_v45 = vld [vmem:[%s3742_s15 + $0xc8] sm:$0xf] }
  0x25   : > { %1481 = vmatpush.bf16.msra.mxu0 %v3587_v25  ;;  %v2886_v25 = vor.u32 %v3474_v19, %v2883_v20  ;;  %v3485_v46 = vld [vmem:[%s3742_s15 + $0xd4] sm:$0xf0]  ;;  %v2918_v49 = vor.u32 %v3482_v43, %v2915_v44  ;;  %v3488_v55 = vld [vmem:[%s3742_s15 + $0xec] sm:$0xf0]  ;;  %v3486_v56 = vld [vmem:[%s3742_s15 + $0xe4] sm:$0xf] }
  0x26   : > { %1650 = vmatpush.bf16.msra.mxu1 %v3595_v26  ;;  %v2890_v26 = vor.u32 %v3477_v22, %v2889_v21  ;;  %v2922_v50 = vor.u32 %v3485_v46, %v2921_v45  ;;  %v2931_v57 = vld [vmem:[%s3742_s15 + $0xf0] sm:$0xf0]  ;;  %v2937_v58 = vld [vmem:[%s3742_s15 + $0xe8] sm:$0xf]  ;;  %v3489_v59 = vld [vmem:[%s3742_s15 + $0xf4] sm:$0xf0] }
  0x27   : > { %1819 = vmatpush.bf16.msra.mxu2 %v3603_v27  ;;  %3424 = vmatmul.msk.bf16.gmra.mxu3 %vm1374_vm1, %v2846_v39  ;;  %v3483_v27 = vld [vmem:[%s3742_s15 + $0xcc] sm:$0xf]  ;;  %v2934_v62 = vor.u32 %v3486_v56, %v2931_v57  ;;  %v2945_v3 = vld [vmem:[%s3742_s15 + $0x100] sm:$0xf]  ;;  %v3492_v4 = vld [vmem:[%s3742_s15 + $0x10c] sm:$0xf0] }
  0x28   : > { %v2926_v35 = vor.u32 %v3483_v27, %v2923_v28  ;;  %v3487_v39 = vld [vmem:[%s3742_s15 + $0xec] sm:$0xf]  ;;  %v3490_v5 = vld [vmem:[%s3742_s15 + $0x104] sm:$0xf]  ;;  %v2947_v6 = vld [vmem:[%s3742_s15 + $0x110] sm:$0xf0] }
  0x29   : > { %1482 = vmatpush.bf16.msra.mxu0 %v3586_v30  ;;  %v3480_v30 = vld [vmem:[%s3742_s15 + $0xac] sm:$0xf0]  ;;  %v2953_v8 = vld [vmem:[%s3742_s15 + $0x108] sm:$0xf]  ;;  %v3493_v9 = vld [vmem:[%s3742_s15 + $0x114] sm:$0xf0] }
  0x2a   : > { %1651 = vmatpush.bf16.msra.mxu1 %v3594_v31  ;;  %v3478_v31 = vld [vmem:[%s3742_s15 + $0xa4] sm:$0xf]  ;;  %v2954_v15 = vor.u32 %v3493_v9, %v2953_v8  ;;  %v2987_v27 = vld [vmem:[%s3742_s15 + $0x158] sm:$0xf0]  ;;  %v3497_v33 = vld [vmem:[%s3742_s15 + $0x134] sm:$0xf0] }
  0x2b   : > { %1820 = vmatpush.bf16.msra.mxu2 %v3602_v36  ;;  %v2898_v36 = vor.u32 %v3480_v30, %v2897_v29  ;;  %v2902_v37 = vor.u32 %v3478_v31, %v2899_v32  ;;  %v3494_v29 = vld [vmem:[%s3742_s15 + $0x124] sm:$0xf]  ;;  %v2963_v30 = vld [vmem:[%s3742_s15 + $0x130] sm:$0xf0]  ;;  %v2969_v32 = vld [vmem:[%s3742_s15 + $0x128] sm:$0xf] }
  0x2c   : > { %1483 = vmatmul.bf16.vlgmr.msra.gmra.mxu0 %v2818_v40  ;;  %v2939_v40 = vld [vmem:[%s3742_s15 + $0xf8] sm:$0xf0]  ;;  %v3500_v56 = vld [vmem:[%s3742_s15 + $0x14c] sm:$0xf0] }
  0x2d   : > { %1652 = vmatmul.bf16.vlgmr.msra.gmra.mxu1 %v2822_v41  ;;  %v2913_v41 = vld [vmem:[%s3742_s15 + $0xc0] sm:$0xf]  ;;  %v2942_v47 = vor.u32 %v3487_v39, %v2939_v40  ;;  %v2970_v40 = vor.u32 %v3497_v33, %v2969_v32  ;;  %v3502_v32 = vld [vmem:[%s3742_s15 + $0x164] sm:$0xf]  ;;  %v2995_v33 = vld [vmem:[%s3742_s15 + $0x170] sm:$0xf0] }
  0x2e   : > { %1821 = vmatmul.bf16.vlgmr.msra.gmra.mxu2 %v2826_v42  ;;  %v3484_v42 = vld [vmem:[%s3742_s15 + $0xcc] sm:$0xf0] }
  0x2f   : > { %v2914_v48 = vor.u32 %v3484_v42, %v2913_v41  ;;  %v3985_v41 = vld [vmem:[%s4659_s2] ss:$0 sm:$0xff] }
  0x30   : > { %v3994_v42 = vld [vmem:[%s4660_s3] ss:$0 sm:$0xff] }
  0x37   : > { %3425 = vmatmul.msk.bf16.gmra.mxu3 %vm1374_vm1, %v2862_v51  ;;  %v3665_v51 = vmov 0.0  }
  0x38   : > { %314 = vst.msk [vmem:[#allocation2] sm:$0xff] %vm313_vm2, %v3665_v51 }
  0x39   : > { %315 = vst.msk [vmem:[#allocation2 + $0x8] sm:$0xff] %vm313_vm2, %v3665_v51 }
  0x3a   : > { %316 = vst.msk [vmem:[#allocation2 + $0x10] sm:$0xff] %vm313_vm2, %v3665_v51 }
  0x3b   : > { %317 = vst.msk [vmem:[#allocation2 + $0x18] sm:$0xff] %vm313_vm2, %v3665_v51 }
  0x3c   : > { %1488 = vmatmul.bf16.gmra.mxu0 %v2834_v52  ;;  %318 = vst.msk [vmem:[#allocation2 + $0x20] sm:$0xff] %vm313_vm2, %v3665_v51  ;;  %v3491_v52 = vld [vmem:[%s3742_s15 + $0x10c] sm:$0xf] }
  0x3d   : > { %1657 = vmatmul.bf16.gmra.mxu1 %v2838_v53  ;;  %319 = vst.msk [vmem:[#allocation2 + $0x28] sm:$0xff] %vm313_vm2, %v3665_v51  ;;  %v2955_v53 = vld [vmem:[%s3742_s15 + $0x118] sm:$0xf0] }
  0x3e   : > { %1826 = vmatmul.bf16.gmra.mxu2 %v2842_v54  ;;  %320 = vst.msk [vmem:[#allocation2 + $0x30] sm:$0xff] %vm313_vm2, %v3665_v51  ;;  %v2929_v54 = vld [vmem:[%s3742_s15 + $0xe0] sm:$0xf]  ;;  %v2958_v60 = vor.u32 %v3491_v52, %v2955_v53 }
  0x3f   : > { %321 = vst.msk [vmem:[#allocation2 + $0x38] sm:$0xff] %vm313_vm2, %v3665_v51  ;;  %v2930_v61 = vor.u32 %v3488_v55, %v2929_v54  ;;  %v378_v22 = vld [vmem:[#allocation2] sm:$0xff] }
  0x40   : > { %322 = vst.msk [vmem:[#allocation2 + $0x40] sm:$0xff] %vm313_vm2, %v3665_v51  ;;  %v2977_v55 = vld [vmem:[%s3742_s15 + $0x140] sm:$0xf] }
  0x41   : > { %323 = vst.msk [vmem:[#allocation2 + $0x48] sm:$0xff] %vm313_vm2, %v3665_v51  ;;  %v2978_v9 = vor.u32 %v3500_v56, %v2977_v55 }
  0x42   : > { %324 = vst.msk [vmem:[#allocation2 + $0x50] sm:$0xff] %vm313_vm2, %v3665_v51 }
  0x43   : > { %325 = vst.msk [vmem:[#allocation2 + $0x58] sm:$0xff] %vm313_vm2, %v3665_v51 }
  0x44   : > { %326 = vst.msk [vmem:[#allocation2 + $0x60] sm:$0xff] %vm313_vm2, %v3665_v51 }
  0x45   : > { %327 = vst.msk [vmem:[#allocation2 + $0x68] sm:$0xff] %vm313_vm2, %v3665_v51 }
  0x46   : > { %328 = vst.msk [vmem:[#allocation2 + $0x70] sm:$0xff] %vm313_vm2, %v3665_v51 }
  0x47   : > { %3426 = vmatmul.msk.bf16.gmra.mxu3 %vm1374_vm1, %v2878_v63  ;;  %v2938_v63 = vor.u32 %v3489_v59, %v2937_v58  ;;  %329 = vst.msk [vmem:[#allocation2 + $0x78] sm:$0xff] %vm313_vm2, %v3665_v51  ;;  %v3503_v58 = vld [vmem:[%s3742_s15 + $0x16c] sm:$0xf]  ;;  %v3003_v59 = vld [vmem:[%s3742_s15 + $0x178] sm:$0xf0] }
  0x48   : > { %330 = vst.msk [vmem:[#allocation2 + $0x80] sm:$0xff] %vm313_vm2, %v3665_v51 }
  0x49   : > { %331 = vst.msk [vmem:[#allocation2 + $0x88] sm:$0xff] %vm313_vm2, %v3665_v51 }
  0x4a   : > { %332 = vst.msk [vmem:[#allocation2 + $0x90] sm:$0xff] %vm313_vm2, %v3665_v51 }
  0x4b   : > { %333 = vst.msk [vmem:[#allocation2 + $0x98] sm:$0xff] %vm313_vm2, %v3665_v51 }
  0x4c   : > { %1493 = vmatmul.bf16.gmra.mxu0 %v2850_v0  ;;  %334 = vst.msk [vmem:[#allocation2 + $0xa0] sm:$0xff] %vm313_vm2, %v3665_v51 }
  0x4d   : > { %1662 = vmatmul.bf16.gmra.mxu1 %v2854_v1  ;;  %335 = vst.msk [vmem:[#allocation2 + $0xa8] sm:$0xff] %vm313_vm2, %v3665_v51  ;;  %v3495_v1 = vld [vmem:[%s3742_s15 + $0x12c] sm:$0xf] }
  0x4e   : > { %1831 = vmatmul.bf16.gmra.mxu2 %v2858_v2  ;;  %336 = vst.msk [vmem:[#allocation2 + $0xb0] sm:$0xff] %vm313_vm2, %v3665_v51  ;;  %v2971_v2 = vld [vmem:[%s3742_s15 + $0x138] sm:$0xf0] }
  0x4f   : > { %337 = vst.msk [vmem:[#allocation2 + $0xb8] sm:$0xff] %vm313_vm2, %v3665_v51  ;;  %v2974_v10 = vor.u32 %v3495_v1, %v2971_v2  ;;  %v3501_v1 = vld [vmem:[%s3742_s15 + $0x154] sm:$0xf0]  ;;  %v3006_v2 = vor.u32 %v3503_v58, %v3003_v59  ;;  %v383_v59 = vld [vmem:[#allocation2 + $0x28] sm:$0xff] }
  0x50   : > { %338 = vst.msk [vmem:[#allocation2 + $0xc0] sm:$0xff] %vm313_vm2, %v3665_v51 }
  0x51   : > { %339 = vst.msk [vmem:[#allocation2 + $0xc8] sm:$0xff] %vm313_vm2, %v3665_v51 }
  0x52   : > { %340 = vst.msk [vmem:[#allocation2 + $0xd0] sm:$0xff] %vm313_vm2, %v3665_v51 }
  0x53   : > { %341 = vst.msk [vmem:[#allocation2 + $0xd8] sm:$0xff] %vm313_vm2, %v3665_v51 }
  0x54   : > { %342 = vst.msk [vmem:[#allocation2 + $0xe0] sm:$0xff] %vm313_vm2, %v3665_v51 }
  0x55   : > { %343 = vst.msk [vmem:[#allocation2 + $0xe8] sm:$0xff] %vm313_vm2, %v3665_v51 }
  0x56   : > { %344 = vst.msk [vmem:[#allocation2 + $0xf0] sm:$0xff] %vm313_vm2, %v3665_v51 }
  0x57   : > { %3427 = vmatmul.msk.bf16.gmra.mxu3 %vm1374_vm1, %v2894_v11  ;;  %v2946_v11 = vor.u32 %v3492_v4, %v2945_v3  ;;  %345 = vst.msk [vmem:[#allocation2 + $0xf8] sm:$0xff] %vm313_vm2, %v3665_v51 }
  0x58   : > { %346 = vst.msk [vmem:[#allocation2 + $0x100] sm:$0xff] %vm313_vm2, %v3665_v51 }
  0x59   : > { %347 = vst.msk [vmem:[#allocation2 + $0x108] sm:$0xff] %vm313_vm2, %v3665_v51 }
  0x5a   : > { %348 = vst.msk [vmem:[#allocation2 + $0x110] sm:$0xff] %vm313_vm2, %v3665_v51 }
  0x5b   : > { %349 = vst.msk [vmem:[#allocation2 + $0x118] sm:$0xff] %vm313_vm2, %v3665_v51 }
  0x5c   : > { %1498 = vmatmul.bf16.gmra.mxu0 %v2866_v12  ;;  %v2950_v12 = vor.u32 %v3490_v5, %v2947_v6  ;;  %350 = vst.msk [vmem:[#allocation2 + $0x120] sm:$0xff] %vm313_vm2, %v3665_v51  ;;  %v379_v5 = vld [vmem:[#allocation2 + $0x8] sm:$0xff] }
  0x5d   : > { %1667 = vmatmul.bf16.gmra.mxu1 %v2870_v13  ;;  %351 = vst.msk [vmem:[#allocation2 + $0x128] sm:$0xff] %vm313_vm2, %v3665_v51 }
  0x5e   : > { %1836 = vmatmul.bf16.gmra.mxu2 %v2874_v14  ;;  %352 = vst.msk [vmem:[#allocation2 + $0x130] sm:$0xff] %vm313_vm2, %v3665_v51 }
  0x5f   : > { %353 = vst.msk [vmem:[#allocation2 + $0x138] sm:$0xff] %vm313_vm2, %v3665_v51 }
  0x60   : > { %354 = vst.msk [vmem:[#allocation2 + $0x140] sm:$0xff] %vm313_vm2, %v3665_v51 }
  0x61   : > { %355 = vst.msk [vmem:[#allocation2 + $0x148] sm:$0xff] %vm313_vm2, %v3665_v51 }
  0x62   : > { %356 = vst.msk [vmem:[#allocation2 + $0x150] sm:$0xff] %vm313_vm2, %v3665_v51 }
  0x63   : > { %357 = vst.msk [vmem:[#allocation2 + $0x158] sm:$0xff] %vm313_vm2, %v3665_v51 }
  0x64   : > { %358 = vst.msk [vmem:[#allocation2 + $0x160] sm:$0xff] %vm313_vm2, %v3665_v51 }
  0x65   : > { %359 = vst.msk [vmem:[#allocation2 + $0x168] sm:$0xff] %vm313_vm2, %v3665_v51 }
  0x66   : > { %360 = vst.msk [vmem:[#allocation2 + $0x170] sm:$0xff] %vm313_vm2, %v3665_v51 }
  0x67   : > { %3428 = vmatmul.msk.bf16.gmra.mxu3 %vm1374_vm1, %v2910_v23  ;;  %361 = vst.msk [vmem:[#allocation2 + $0x178] sm:$0xff] %vm313_vm2, %v3665_v51 }
  0x68   : > { %362 = vst.msk [vmem:[#allocation2 + $0x180] sm:$0xff] %vm313_vm2, %v3665_v51 }
  0x69   : > { %363 = vst.msk [vmem:[#allocation2 + $0x188] sm:$0xff] %vm313_vm2, %v3665_v51 }
  0x6a   : > { %364 = vst.msk [vmem:[#allocation2 + $0x190] sm:$0xff] %vm313_vm2, %v3665_v51 }
  0x6b   : > { %365 = vst.msk [vmem:[#allocation2 + $0x198] sm:$0xff] %vm313_vm2, %v3665_v51 }
  0x6c   : > { %1503 = vmatmul.bf16.gmra.mxu0 %v2882_v24  ;;  %v2961_v24 = vld [vmem:[%s3742_s15 + $0x120] sm:$0xf]  ;;  %366 = vst.msk [vmem:[#allocation2 + $0x1a0] sm:$0xff] %vm313_vm2, %v3665_v51 }
  0x6d   : > { %1672 = vmatmul.bf16.gmra.mxu1 %v2886_v25  ;;  %v3496_v25 = vld [vmem:[%s3742_s15 + $0x12c] sm:$0xf0]  ;;  %367 = vst.msk [vmem:[#allocation2 + $0x1a8] sm:$0xff] %vm313_vm2, %v3665_v51 }
  0x6e   : > { %1841 = vmatmul.bf16.gmra.mxu2 %v2890_v26  ;;  %v3499_v26 = vld [vmem:[%s3742_s15 + $0x14c] sm:$0xf]  ;;  %368 = vst.msk [vmem:[#allocation2 + $0x1b0] sm:$0xff] %vm313_vm2, %v3665_v51 }
  0x6f   : > { %v2990_v34 = vor.u32 %v3499_v26, %v2987_v27  ;;  %369 = vst.msk [vmem:[#allocation2 + $0x1b8] sm:$0xff] %vm313_vm2, %v3665_v51  ;;  %v382_v26 = vld [vmem:[#allocation2 + $0x20] sm:$0xff] }
  0x70   : > { %370 = vst.msk [vmem:[#allocation2 + $0x1c0] sm:$0xff] %vm313_vm2, %v3665_v51 }
  0x71   : > { %371 = vst.msk [vmem:[#allocation2 + $0x1c8] sm:$0xff] %vm313_vm2, %v3665_v51 }
  0x72   : > { %372 = vst.msk [vmem:[#allocation2 + $0x1d0] sm:$0xff] %vm313_vm2, %v3665_v51 }
  0x73   : > { %373 = vst.msk [vmem:[#allocation2 + $0x1d8] sm:$0xff] %vm313_vm2, %v3665_v51 }
  0x74   : > { %374 = vst.msk [vmem:[#allocation2 + $0x1e0] sm:$0xff] %vm313_vm2, %v3665_v51 }
  0x75   : > { %375 = vst.msk [vmem:[#allocation2 + $0x1e8] sm:$0xff] %vm313_vm2, %v3665_v51 }
  0x76   : > { %376 = vst.msk [vmem:[#allocation2 + $0x1f0] sm:$0xff] %vm313_vm2, %v3665_v51 }
  0x77   : > { %3429 = vmatmul.msk.bf16.gmra.mxu3 %vm1374_vm1, %v2926_v35  ;;  %377 = vst.msk [vmem:[#allocation2 + $0x1f8] sm:$0xff] %vm313_vm2, %v3665_v51 }
  0x7c   : > { %1508 = vmatmul.bf16.gmra.mxu0 %v2898_v36  ;;  %v2962_v36 = vor.u32 %v3496_v25, %v2961_v24 }
  0x7d   : > { %1677 = vmatmul.bf16.gmra.mxu1 %v2902_v37  ;;  %v2966_v37 = vor.u32 %v3494_v29, %v2963_v30  ;;  %v3507_v29 = vld [vmem:[%s3742_s15 + $0x18c] sm:$0xf]  ;;  %v3019_v30 = vld [vmem:[%s3742_s15 + $0x198] sm:$0xf0] }
  0x7e   : > { %1846 = vmatmul.bf16.gmra.mxu2 %v2906_v38 }
  0x87   : > { %3430 = vmatmul.msk.bf16.gmra.mxu3 %vm1374_vm1, %v2942_v47 }
  0x8c   : > { %1513 = vmatmul.bf16.gmra.mxu0 %v2914_v48 }
  0x8d   : > { %1682 = vmatmul.bf16.gmra.mxu1 %v2918_v49 }
  0x8e   : > { %1851 = vmatmul.bf16.gmra.mxu2 %v2922_v50 }
  0x97   : > { %3431 = vmatmul.msk.bf16.gmra.mxu3 %vm1374_vm1, %v2958_v60 }
  0x9a   : > { %v1991_v0 = vpop.f32.mrf.mxu3 }
  0x9c   : > { %1518 = vmatmul.bf16.gmra.mxu0 %v2930_v61  ;;  %v3498_v61 = vld [vmem:[%s3742_s15 + $0x144] sm:$0xf] }
  0x9d   : > { %1687 = vmatmul.bf16.gmra.mxu1 %v2934_v62  ;;  %v2979_v62 = vld [vmem:[%s3742_s15 + $0x150] sm:$0xf0] }
  0x9e   : > { %1856 = vmatmul.bf16.gmra.mxu2 %v2938_v63 }
  0xa2   : > { %v3923_v7 = vpop.f32.mrf.mxu3 }
  0xa7   : > { %3432 = vmatmul.msk.bf16.gmra.mxu3 %vm1374_vm1, %v2974_v10  ;;  %v2982_v10 = vor.u32 %v3498_v61, %v2979_v62 }
  0xa9   : > { %v1484_v13 = vpop.f32.mrf.mxu0 }
  0xaa   : > { %v1653_v14 = vpop.f32.mrf.mxu1  ;;  %v3944_v17 = vpop.f32.mrf.mxu3 }
  0xab   : > { %v1654_v16 = vadd.f32 %v1653_v14, %v1484_v13 }
  0xac   : > { %1523 = vmatmul.bf16.gmra.mxu0 %v2946_v11  ;;  %v380_v11 = vld [vmem:[#allocation2 + $0x10] sm:$0xff] }
  0xad   : > { %1692 = vmatmul.bf16.gmra.mxu1 %v2950_v12 }
  0xae   : > { %1861 = vmatmul.bf16.gmra.mxu2 %v2954_v15 }
  0xb1   : > { %v1822_v18 = vpop.f32.mrf.mxu2  ;;  %v1486_v20 = vpop.f32.mrf.mxu0 }
  0xb2   : > { %v1823_v19 = vadd.f32 %v1822_v18, %v1654_v16  ;;  %v1655_v21 = vpop.f32.mrf.mxu1  ;;  %v3968_v31 = vpop.f32.mrf.mxu3 }
  0xb3   : > { %v1656_v49 = vadd.f32 %v1655_v21, %v1486_v20 }
  0xb4   : > { %v1992_v23 = vadd.f32 %v1991_v0, %v1823_v19  ;;  %v2985_v0 = vld [vmem:[%s3742_s15 + $0x148] sm:$0xf] }
  0xb5   : > { %v2986_v15 = vor.u32 %v3501_v1, %v2985_v0 }
  0xb6   : > { %v2151_v28 = vadd.f32 %v1992_v23, %v378_v22 }
  0xb7   : > { %3433 = vmatmul.msk.bf16.gmra.mxu3 %vm1374_vm1, %v2990_v34 }
  0xb8   : > { %2216 = vst.msk [vmem:[#allocation2] sm:$0xff] %vm313_vm2, %v2151_v28  ;;  %v2993_v28 = vld [vmem:[%s3742_s15 + $0x160] sm:$0xf] }
  0xb9   : > { %v1824_v35 = vpop.f32.mrf.mxu2  ;;  %v1489_v38 = vpop.f32.mrf.mxu0 }
  0xba   : > { %v1658_v39 = vpop.f32.mrf.mxu1  ;;  %v3998_v43 = vpop.f32.mrf.mxu3  ;;  %v1825_v54 = vadd.f32 %v1824_v35, %v1656_v49 }
  0xbb   : > { %v1659_v46 = vadd.f32 %v1658_v39, %v1489_v38  ;;  %v3022_v38 = vor.u32 %v3507_v29, %v3019_v30 }
  0xbc   : > { %1528 = vmatmul.bf16.gmra.mxu0 %v2962_v36  ;;  %v1994_v3 = vadd.f32 %v3923_v7, %v1825_v54  ;;  %v381_v7 = vld [vmem:[#allocation2 + $0x18] sm:$0xff]  ;;  %v3001_v36 = vld [vmem:[%s3742_s15 + $0x168] sm:$0xf] }
  0xbd   : > { %1697 = vmatmul.bf16.gmra.mxu1 %v2966_v37  ;;  %v3505_v37 = vld [vmem:[%s3742_s15 + $0x174] sm:$0xf0] }
  0xbe   : > { %1866 = vmatmul.bf16.gmra.mxu2 %v2970_v40  ;;  %v2152_v16 = vadd.f32 %v1994_v3, %v379_v5  ;;  %v3002_v55 = vor.u32 %v3505_v37, %v3001_v36  ;;  %v385_v37 = vld [vmem:[#allocation2 + $0x38] sm:$0xff] }
  0xbf   : > { %v2283_v44 = vld [vmem:[#allocation2] sm:$0xff] }
  0xc0   : > { %v2351_v45 = vmul.f32 %v3985_v41, %v2283_v44  ;;  %2217 = vst.msk [vmem:[#allocation2 + $0x8] sm:$0xff] %vm313_vm2, %v2152_v16  ;;  %v3511_v16 = vld [vmem:[%s3742_s15 + $0x1ac] sm:$0xf] }
  0xc1   : > { %v1827_v47 = vpop.f32.mrf.mxu2  ;;  %v1491_v50 = vpop.f32.mrf.mxu0 }
  0xc2   : > { %v2419_v48 = vadd.f32 %v3994_v42, %v2351_v45  ;;  %v1660_v52 = vpop.f32.mrf.mxu1  ;;  %v1828_v57 = vadd.f32 %v1827_v47, %v1659_v46  ;;  %v4030_v63 = vpop.f32.mrf.mxu3 }
  0xc3   : > { %v1661_v4 = vadd.f32 %v1660_v52, %v1491_v50 }
  0xc4   : > { %v2483_v53 = vmax.f32 %v2419_v48, 0.0  ;;  %v1997_v6 = vadd.f32 %v3944_v17, %v1828_v57  ;;  %v2998_v48 = vor.u32 %v3502_v32, %v2995_v33 }
  0xc6   : > { %v2547_v60 = vpack.c.bf16 %v2483_v53, %v2483_v53  ;;  %v2153_v18 = vadd.f32 %v1997_v6, %v380_v11 }
  0xc7   : > { %3434 = vmatmul.msk.bf16.gmra.mxu3 %vm1374_vm1, %v3006_v2  ;;  %v2284_v35 = vld [vmem:[#allocation2 + $0x8] sm:$0xff] }
  0xc8   : > { %2612 = vst.msk [vmem:[%s4020_s11] sm:$0xf] %vm2611_vm3, %v2547_v60  ;;  %v2352_v39 = vmul.f32 %v3985_v41, %v2284_v35 }
  0xc9   : > { %v1829_v8 = vpop.f32.mrf.mxu2  ;;  %v1494_v13 = vpop.f32.mrf.mxu0  ;;  %2218 = vst.msk [vmem:[#allocation2 + $0x10] sm:$0xff] %vm313_vm2, %v2153_v18 }
  0xca   : > { %v1830_v12 = vadd.f32 %v1829_v8, %v1661_v4  ;;  %v1663_v14 = vpop.f32.mrf.mxu1  ;;  %v4054_v21 = vpop.f32.mrf.mxu3  ;;  %v2420_v49 = vadd.f32 %v3994_v42, %v2352_v39 }
  0xcb   : > { %v1664_v20 = vadd.f32 %v1663_v14, %v1494_v13  ;;  %v384_v13 = vld [vmem:[#allocation2 + $0x30] sm:$0xff] }
  0xcc   : > { %v1999_v17 = vadd.f32 %v3968_v31, %v1830_v12  ;;  %1533 = vmatmul.bf16.gmra.mxu0 %v2978_v9  ;;  %v3504_v31 = vld [vmem:[%s3742_s15 + $0x16c] sm:$0xf0]  ;;  %v2484_v57 = vmax.f32 %v2420_v49, 0.0 }
  0xcd   : > { %1702 = vmatmul.bf16.gmra.mxu1 %v2982_v10  ;;  %v2994_v47 = vor.u32 %v3504_v31, %v2993_v28 }
  0xce   : > { %v2154_v19 = vadd.f32 %v1999_v17, %v381_v7  ;;  %1871 = vmatmul.bf16.gmra.mxu2 %v2986_v15  ;;  %v2548_v62 = vpack.c.bf16 %v2484_v57, %v2484_v57  ;;  %v3009_v7 = vld [vmem:[%s3742_s15 + $0x180] sm:$0xf]  ;;  %v3035_v17 = vld [vmem:[%s3742_s15 + $0x1b8] sm:$0xf0] }
  0xd0   : > { %2219 = vst.msk [vmem:[#allocation2 + $0x18] sm:$0xff] %vm313_vm2, %v2154_v19  ;;  %v2285_v40 = vld [vmem:[#allocation2 + $0x10] sm:$0xff] }
  0xd1   : > { %v1832_v22 = vpop.f32.mrf.mxu2  ;;  %v1496_v24 = vpop.f32.mrf.mxu0  ;;  %2613 = vst.msk [vmem:[%s4020_s11 + $0x4] sm:$0xf] %vm2611_vm3, %v2548_v62  ;;  %v3510_v62 = vld [vmem:[%s3742_s15 + $0x1a4] sm:$0xf] }
  0xd2   : > { %v1833_v23 = vadd.f32 %v1832_v22, %v1664_v20  ;;  %v1665_v25 = vpop.f32.mrf.mxu1  ;;  %v4068_v34 = vpop.f32.mrf.mxu3  ;;  %v3508_v20 = vld [vmem:[%s3742_s15 + $0x18c] sm:$0xf0]  ;;  %v3506_v22 = vld [vmem:[%s3742_s15 + $0x184] sm:$0xf] }
  0xd3   : > { %v1666_v44 = vadd.f32 %v1665_v25, %v1496_v24  ;;  %v3017_v25 = vld [vmem:[%s3742_s15 + $0x188] sm:$0xf] }
  0xd4   : > { %v2002_v27 = vadd.f32 %v3998_v43, %v1833_v23  ;;  %v2353_v43 = vmul.f32 %v3985_v41, %v2285_v40  ;;  %v3011_v23 = vld [vmem:[%s3742_s15 + $0x190] sm:$0xf0] }
  0xd5   : > { %v3014_v30 = vor.u32 %v3506_v22, %v3011_v23 }
  0xd6   : > { %v2155_v51 = vadd.f32 %v2002_v27, %v382_v26  ;;  %v2421_v56 = vadd.f32 %v3994_v42, %v2353_v43  ;;  %v3509_v26 = vld [vmem:[%s3742_s15 + $0x194] sm:$0xf0]  ;;  %v3038_v27 = vor.u32 %v3511_v16, %v3035_v17  ;;  %v387_v16 = vld [vmem:[#allocation2 + $0x48] sm:$0xff] }
  0xd7   : > { %v2286_v45 = vld [vmem:[#allocation2 + $0x18] sm:$0xff]  ;;  %3435 = vmatmul.msk.bf16.gmra.mxu3 %vm1374_vm1, %v3022_v38  ;;  %v3018_v35 = vor.u32 %v3509_v26, %v3017_v25 }
  0xd8   : > { %2220 = vst.msk [vmem:[#allocation2 + $0x20] sm:$0xff] %vm313_vm2, %v2155_v51  ;;  %v2354_v50 = vmul.f32 %v3985_v41, %v2286_v45  ;;  %v2485_v61 = vmax.f32 %v2421_v56, 0.0  ;;  %v3025_v56 = vld [vmem:[%s3742_s15 + $0x1a0] sm:$0xf] }
  0xd9   : > { %v1834_v46 = vpop.f32.mrf.mxu2  ;;  %v1499_v53 = vpop.f32.mrf.mxu0 }
  0xda   : > { %v1835_v52 = vadd.f32 %v1834_v46, %v1666_v44  ;;  %v1668_v54 = vpop.f32.mrf.mxu1  ;;  %v2422_v58 = vadd.f32 %v3994_v42, %v2354_v50  ;;  %v4081_v2 = vpop.f32.mrf.mxu3  ;;  %v2549_v3 = vpack.c.bf16 %v2485_v61, %v2485_v61  ;;  %v3512_v61 = vld [vmem:[%s3742_s15 + $0x1ac] sm:$0xf0] }
  0xdb   : > { %v1669_v1 = vadd.f32 %v1668_v54, %v1499_v53  ;;  %v386_v54 = vld [vmem:[#allocation2 + $0x40] sm:$0xff] }
  0xdc   : > { %v2004_v60 = vadd.f32 %v4030_v63, %v1835_v52  ;;  %1538 = vmatmul.bf16.gmra.mxu0 %v2994_v47  ;;  %v2486_v0 = vmax.f32 %v2422_v58, 0.0  ;;  %2614 = vst.msk [vmem:[%s4020_s11 + $0x8] sm:$0xf] %vm2611_vm3, %v2549_v3  ;;  %v3515_v58 = vld [vmem:[%s3742_s15 + $0x1cc] sm:$0xf] }
  0xdd   : > { %1707 = vmatmul.bf16.gmra.mxu1 %v2998_v48 }
  0xde   : > { %1876 = vmatmul.bf16.gmra.mxu2 %v3002_v55  ;;  %v2156_v5 = vadd.f32 %v2004_v60, %v383_v59  ;;  %v2550_v6 = vpack.c.bf16 %v2486_v0, %v2486_v0  ;;  %v3051_v59 = vld [vmem:[%s3742_s15 + $0x1d8] sm:$0xf0]  ;;  %v3027_v0 = vld [vmem:[%s3742_s15 + $0x1b0] sm:$0xf0] }
  0xdf   : > { %v2287_v4 = vld [vmem:[#allocation2 + $0x20] sm:$0xff] }
  0xe0   : > { %v2355_v63 = vmul.f32 %v3985_v41, %v2287_v4  ;;  %2615 = vst.msk [vmem:[%s4020_s11 + $0xc] sm:$0xf] %vm2611_vm3, %v2550_v6  ;;  %v3513_v6 = vld [vmem:[%s3742_s15 + $0x1b4] sm:$0xf0] }
  0xe1   : > { %v1837_v8 = vpop.f32.mrf.mxu2  ;;  %v1501_v11 = vpop.f32.mrf.mxu0  ;;  %2221 = vst.msk [vmem:[#allocation2 + $0x28] sm:$0xff] %vm313_vm2, %v2156_v5  ;;  %v3033_v5 = vld [vmem:[%s3742_s15 + $0x1a8] sm:$0xf] }
  0xe2   : > { %v2423_v9 = vadd.f32 %v3994_v42, %v2355_v63  ;;  %v1838_v10 = vadd.f32 %v1837_v8, %v1669_v1  ;;  %v1670_v12 = vpop.f32.mrf.mxu1  ;;  %v4099_v24 = vpop.f32.mrf.mxu3  ;;  %v3054_v63 = vor.u32 %v3515_v58, %v3051_v59  ;;  %v389_v58 = vld [vmem:[#allocation2 + $0x58] sm:$0xff] }
  0xe3   : > { %v1671_v28 = vadd.f32 %v1670_v12, %v1501_v11  ;;  %v3030_v11 = vor.u32 %v3510_v62, %v3027_v0 }
  0xe4   : > { %v2487_v14 = vmax.f32 %v2423_v9, 0.0  ;;  %v2007_v15 = vadd.f32 %v4054_v21, %v1838_v10  ;;  %v3010_v21 = vor.u32 %v3508_v20, %v3009_v7  ;;  %v3026_v10 = vor.u32 %v3512_v61, %v3025_v56 }
  0xe5   : > { %v3034_v7 = vor.u32 %v3513_v6, %v3033_v5 }
  0xe6   : > { %v2551_v18 = vpack.c.bf16 %v2487_v14, %v2487_v14  ;;  %v2157_v19 = vadd.f32 %v2007_v15, %v384_v13 }
  0xe7   : > { %3436 = vmatmul.msk.bf16.gmra.mxu3 %vm1374_vm1, %v3038_v27 }
  0xe8   : > { %2616 = vst.msk [vmem:[%s4020_s11 + $0x10] sm:$0xf] %vm2611_vm3, %v2551_v18  ;;  %v2288_v51 = vld [vmem:[#allocation2 + $0x28] sm:$0xff] }
  0xe9   : > { %2222 = vst.msk [vmem:[#allocation2 + $0x30] sm:$0xff] %vm313_vm2, %v2157_v19  ;;  %v1839_v29 = vpop.f32.mrf.mxu2  ;;  %v1504_v32 = vpop.f32.mrf.mxu0  ;;  %v2356_v36 = vmul.f32 %v3985_v41, %v2288_v51 }
  0xea   : > { %v1840_v31 = vadd.f32 %v1839_v29, %v1671_v28  ;;  %v1673_v33 = vpop.f32.mrf.mxu1  ;;  %v2016_v43 = vpop.f32.mrf.mxu3 }
  0xeb   : > { %v2424_v39 = vadd.f32 %v3994_v42, %v2356_v36  ;;  %v1674_v44 = vadd.f32 %v1673_v33, %v1504_v32  ;;  %v3041_v32 = vld [vmem:[%s3742_s15 + $0x1c0] sm:$0xf]  ;;  %v3519_v33 = vld [vmem:[%s3742_s15 + $0x1ec] sm:$0xf] }
  0xec   : > { %v2009_v38 = vadd.f32 %v4068_v34, %v1840_v31  ;;  %1543 = vmatmul.bf16.gmra.mxu0 %v3010_v21 }
  0xed   : > { %1712 = vmatmul.bf16.gmra.mxu1 %v3014_v30  ;;  %v2488_v45 = vmax.f32 %v2424_v39, 0.0  ;;  %v388_v30 = vld [vmem:[#allocation2 + $0x50] sm:$0xff]  ;;  %v3514_v39 = vld [vmem:[%s3742_s15 + $0x1c4] sm:$0xf] }
  0xee   : > { %v2158_v40 = vadd.f32 %v2009_v38, %v385_v37  ;;  %1881 = vmatmul.bf16.gmra.mxu2 %v3018_v35  ;;  %v3067_v35 = vld [vmem:[%s3742_s15 + $0x1f8] sm:$0xf0]  ;;  %v3516_v38 = vld [vmem:[%s3742_s15 + $0x1cc] sm:$0xf0] }
  0xef   : > { %v2552_v47 = vpack.c.bf16 %v2488_v45, %v2488_v45  ;;  %v3049_v45 = vld [vmem:[%s3742_s15 + $0x1c8] sm:$0xf] }
  0xf0   : > { %v2289_v46 = vld [vmem:[#allocation2 + $0x30] sm:$0xff]  ;;  %2223 = vst.msk [vmem:[#allocation2 + $0x38] sm:$0xff] %vm313_vm2, %v2158_v40 }
  0xf1   : > { %v2357_v34 = vmul.f32 %v3985_v41, %v2289_v46  ;;  %v1842_v48 = vpop.f32.mrf.mxu2  ;;  %v1506_v50 = vpop.f32.mrf.mxu0  ;;  %2617 = vst.msk [vmem:[%s4020_s11 + $0x14] sm:$0xf] %vm2611_vm3, %v2552_v47  ;;  %v3043_v40 = vld [vmem:[%s3742_s15 + $0x1d0] sm:$0xf0]  ;;  %v3517_v46 = vld [vmem:[%s3742_s15 + $0x1d4] sm:$0xf0]  ;;  %v3070_v47 = vor.u32 %v3519_v33, %v3067_v35 }
  0xf2   : > { %v1843_v49 = vadd.f32 %v1842_v48, %v1674_v44  ;;  %v1675_v52 = vpop.f32.mrf.mxu1  ;;  %v4122_v1 = vpop.f32.mrf.mxu3  ;;  %v3050_v56 = vor.u32 %v3517_v46, %v3049_v45  ;;  %v391_v33 = vld [vmem:[#allocation2 + $0x68] sm:$0xff] }
  0xf3   : > { %v2425_v53 = vadd.f32 %v3994_v42, %v2357_v34 }
  0xf4   : > { %v2012_v55 = vadd.f32 %v4081_v2, %v1843_v49  ;;  %v1676_v2 = vadd.f32 %v1675_v52, %v1506_v50  ;;  %v3042_v50 = vor.u32 %v3516_v38, %v3041_v32  ;;  %v3046_v52 = vor.u32 %v3514_v39, %v3043_v40 }
  0xf5   : > { %v2489_v57 = vmax.f32 %v2425_v53, 0.0 }
  0xf6   : > { %v2159_v60 = vadd.f32 %v2012_v55, %v386_v54 }
  0xf7   : > { %v2553_v3 = vpack.c.bf16 %v2489_v57, %v2489_v57  ;;  %v2290_v4 = vld [vmem:[#allocation2 + $0x38] sm:$0xff]  ;;  %3437 = vmatmul.msk.bf16.gmra.mxu3 %vm1374_vm1, %v3054_v63 }
  0xf8   : > { %v2358_v8 = vmul.f32 %v3985_v41, %v2290_v4  ;;  %2224 = vst.msk [vmem:[#allocation2 + $0x40] sm:$0xff] %vm313_vm2, %v2159_v60 }
  0xf9   : > { %2618 = vst.msk [vmem:[%s4020_s11 + $0x18] sm:$0xf] %vm2611_vm3, %v2553_v3  ;;  %v1844_v9 = vpop.f32.mrf.mxu2  ;;  %v1509_v14 = vpop.f32.mrf.mxu0 }
  0xfa   : > { %v2426_v12 = vadd.f32 %v3994_v42, %v2358_v8  ;;  %v1845_v13 = vadd.f32 %v1844_v9, %v1676_v2  ;;  %v1678_v15 = vpop.f32.mrf.mxu1  ;;  %v2021_v23 = vpop.f32.mrf.mxu3  ;;  %v390_v9 = vld [vmem:[#allocation2 + $0x60] sm:$0xff] }
  0xfb   : > { %v1679_v22 = vadd.f32 %v1678_v15, %v1509_v14  ;;  %v3083_v14 = vld [vmem:[%s3742_s15 + $0x218] sm:$0xf0] }
  0xfc   : > { %v2490_v17 = vmax.f32 %v2426_v12, 0.0  ;;  %v2014_v18 = vadd.f32 %v4099_v24, %v1845_v13  ;;  %1548 = vmatmul.bf16.gmra.mxu0 %v3026_v10  ;;  %v3523_v13 = vld [vmem:[%s3742_s15 + $0x20c] sm:$0xf] }
  0xfd   : > { %1717 = vmatmul.bf16.gmra.mxu1 %v3030_v11  ;;  %v3057_v11 = vld [vmem:[%s3742_s15 + $0x1e0] sm:$0xf] }
  0xfe   : > { %v2554_v19 = vpack.c.bf16 %v2490_v17, %v2490_v17  ;;  %v2160_v20 = vadd.f32 %v2014_v18, %v387_v16  ;;  %1886 = vmatmul.bf16.gmra.mxu2 %v3034_v7  ;;  %v3520_v7 = vld [vmem:[%s3742_s15 + $0x1ec] sm:$0xf0]  ;;  %v3518_v16 = vld [vmem:[%s3742_s15 + $0x1e4] sm:$0xf]  ;;  %v3059_v17 = vld [vmem:[%s3742_s15 + $0x1f0] sm:$0xf0] }
  0xff   : > { %v2291_v25 = vld [vmem:[#allocation2 + $0x40] sm:$0xff] }
 0x100   : > { %2619 = vst.msk [vmem:[%s4020_s11 + $0x1c] sm:$0xf] %vm2611_vm3, %v2554_v19  ;;  %v2359_v26 = vmul.f32 %v3985_v41, %v2291_v25  ;;  %v3521_v25 = vld [vmem:[%s3742_s15 + $0x1f4] sm:$0xf0] }
 0x101   : > { %2225 = vst.msk [vmem:[#allocation2 + $0x48] sm:$0xff] %vm313_vm2, %v2160_v20  ;;  %v1847_v24 = vpop.f32.mrf.mxu2  ;;  %v1511_v29 = vpop.f32.mrf.mxu0 }
 0x102   : > { %v2427_v27 = vadd.f32 %v3994_v42, %v2359_v26  ;;  %v1848_v28 = vadd.f32 %v1847_v24, %v1679_v22  ;;  %v1680_v21 = vpop.f32.mrf.mxu1  ;;  %v4144_v44 = vpop.f32.mrf.mxu3  ;;  %v3065_v22 = vld [vmem:[%s3742_s15 + $0x1e8] sm:$0xf]  ;;  %v3086_v26 = vor.u32 %v3523_v13, %v3083_v14  ;;  %v393_v13 = vld [vmem:[#allocation2 + $0x78] sm:$0xff] }
 0x103   : > { %v1681_v48 = vadd.f32 %v1680_v21, %v1511_v29  ;;  %v3062_v29 = vor.u32 %v3518_v16, %v3059_v17  ;;  %v3066_v32 = vor.u32 %v3521_v25, %v3065_v22 }
 0x104   : > { %v2491_v51 = vmax.f32 %v2427_v27, 0.0  ;;  %v2017_v31 = vadd.f32 %v2016_v43, %v1848_v28  ;;  %v3058_v28 = vor.u32 %v3520_v7, %v3057_v11 }
 0x106   : > { %v2555_v36 = vpack.c.bf16 %v2491_v51, %v2491_v51  ;;  %v2161_v37 = vadd.f32 %v2017_v31, %v388_v30 }
 0x107   : > { %3438 = vmatmul.msk.bf16.gmra.mxu3 %vm1374_vm1, %v3070_v47 }
 0x108   : > { %2620 = vst.msk [vmem:[%s4020_s11 + $0x20] sm:$0xf] %vm2611_vm3, %v2555_v36  ;;  %v2292_v34 = vld [vmem:[#allocation2 + $0x48] sm:$0xff] }
 0x109   : > { %v2360_v49 = vmul.f32 %v3985_v41, %v2292_v34  ;;  %2226 = vst.msk [vmem:[#allocation2 + $0x50] sm:$0xff] %vm313_vm2, %v2161_v37  ;;  %v1849_v43 = vpop.f32.mrf.mxu2  ;;  %v1514_v54 = vpop.f32.mrf.mxu0 }
 0x10a   : > { %v1850_v53 = vadd.f32 %v1849_v43, %v1681_v48  ;;  %v1683_v55 = vpop.f32.mrf.mxu1  ;;  %v2026_v0 = vpop.f32.mrf.mxu3  ;;  %v392_v43 = vld [vmem:[#allocation2 + $0x70] sm:$0xff] }
 0x10b   : > { %v2428_v57 = vadd.f32 %v3994_v42, %v2360_v49  ;;  %v1684_v62 = vadd.f32 %v1683_v55, %v1514_v54  ;;  %v3527_v54 = vld [vmem:[%s3742_s15 + $0x22c] sm:$0xf]  ;;  %v3099_v55 = vld [vmem:[%s3742_s15 + $0x238] sm:$0xf0] }
 0x10c   : > { %v2019_v59 = vadd.f32 %v4122_v1, %v1850_v53  ;;  %1553 = vmatmul.bf16.gmra.mxu0 %v3042_v50  ;;  %v3073_v53 = vld [vmem:[%s3742_s15 + $0x200] sm:$0xf] }
 0x10d   : > { %v2492_v60 = vmax.f32 %v2428_v57, 0.0  ;;  %1722 = vmatmul.bf16.gmra.mxu1 %v3046_v52 }
 0x10e   : > { %v2162_v61 = vadd.f32 %v2019_v59, %v389_v58  ;;  %1891 = vmatmul.bf16.gmra.mxu2 %v3050_v56  ;;  %v3524_v58 = vld [vmem:[%s3742_s15 + $0x20c] sm:$0xf0]  ;;  %v3522_v59 = vld [vmem:[%s3742_s15 + $0x204] sm:$0xf] }
 0x10f   : > { %v2556_v3 = vpack.c.bf16 %v2492_v60, %v2492_v60  ;;  %v3075_v60 = vld [vmem:[%s3742_s15 + $0x210] sm:$0xf0] }
 0x110   : > { %v2293_v4 = vld [vmem:[#allocation2 + $0x50] sm:$0xff]  ;;  %2227 = vst.msk [vmem:[#allocation2 + $0x58] sm:$0xff] %vm313_vm2, %v2162_v61 }
 0x111   : > { %2621 = vst.msk [vmem:[%s4020_s11 + $0x24] sm:$0xf] %vm2611_vm3, %v2556_v3  ;;  %v2361_v1 = vmul.f32 %v3985_v41, %v2293_v4  ;;  %v1852_v5 = vpop.f32.mrf.mxu2  ;;  %v1516_v63 = vpop.f32.mrf.mxu0  ;;  %v3525_v3 = vld [vmem:[%s3742_s15 + $0x214] sm:$0xf0]  ;;  %v3102_v4 = vor.u32 %v3527_v54, %v3099_v55  ;;  %v395_v54 = vld [vmem:[#allocation2 + $0x88] sm:$0xff] }
 0x112   : > { %v1853_v6 = vadd.f32 %v1852_v5, %v1684_v62  ;;  %v1685_v8 = vpop.f32.mrf.mxu1  ;;  %v4166_v18 = vpop.f32.mrf.mxu3  ;;  %v3081_v62 = vld [vmem:[%s3742_s15 + $0x208] sm:$0xf] }
 0x113   : > { %v2429_v2 = vadd.f32 %v3994_v42, %v2361_v1  ;;  %v3082_v11 = vor.u32 %v3525_v3, %v3081_v62 }
 0x114   : > { %v2022_v10 = vadd.f32 %v2021_v23, %v1853_v6  ;;  %v1686_v23 = vadd.f32 %v1685_v8, %v1516_v63  ;;  %v3074_v63 = vor.u32 %v3524_v58, %v3073_v53  ;;  %v3078_v8 = vor.u32 %v3522_v59, %v3075_v60 }
 0x115   : > { %v2493_v12 = vmax.f32 %v2429_v2, 0.0 }
 0x116   : > { %v2163_v15 = vadd.f32 %v2022_v10, %v390_v9 }
 0x117   : > { %v2557_v19 = vpack.c.bf16 %v2493_v12, %v2493_v12  ;;  %v2294_v20 = vld [vmem:[#allocation2 + $0x58] sm:$0xff]  ;;  %3439 = vmatmul.msk.bf16.gmra.mxu3 %vm1374_vm1, %v3086_v26 }
 0x118   : > { %v2362_v24 = vmul.f32 %v3985_v41, %v2294_v20  ;;  %2228 = vst.msk [vmem:[#allocation2 + $0x60] sm:$0xff] %vm313_vm2, %v2163_v15 }
 0x119   : > { %2622 = vst.msk [vmem:[%s4020_s11 + $0x28] sm:$0xf] %vm2611_vm3, %v2557_v19  ;;  %v1854_v27 = vpop.f32.mrf.mxu2  ;;  %v1519_v51 = vpop.f32.mrf.mxu0 }
 0x11a   : > { %v2430_v21 = vadd.f32 %v3994_v42, %v2362_v24  ;;  %v1855_v30 = vadd.f32 %v1854_v27, %v1686_v23  ;;  %v1688_v31 = vpop.f32.mrf.mxu1  ;;  %v2031_v40 = vpop.f32.mrf.mxu3  ;;  %v394_v27 = vld [vmem:[#allocation2 + $0x80] sm:$0xff] }
 0x11b   : > { %v1689_v39 = vadd.f32 %v1688_v31, %v1519_v51  ;;  %v3115_v51 = vld [vmem:[%s3742_s15 + $0x258] sm:$0xf0] }
 0x11c   : > { %v2494_v35 = vmax.f32 %v2430_v21, 0.0  ;;  %v2024_v36 = vadd.f32 %v4144_v44, %v1855_v30  ;;  %1558 = vmatmul.bf16.gmra.mxu0 %v3058_v28  ;;  %v3531_v30 = vld [vmem:[%s3742_s15 + $0x24c] sm:$0xf] }
 0x11d   : > { %1727 = vmatmul.bf16.gmra.mxu1 %v3062_v29  ;;  %v3089_v29 = vld [vmem:[%s3742_s15 + $0x220] sm:$0xf] }
 0x11e   : > { %v2558_v37 = vpack.c.bf16 %v2494_v35, %v2494_v35  ;;  %v2164_v38 = vadd.f32 %v2024_v36, %v391_v33  ;;  %1896 = vmatmul.bf16.gmra.mxu2 %v3066_v32  ;;  %v3528_v32 = vld [vmem:[%s3742_s15 + $0x22c] sm:$0xf0]  ;;  %v3526_v33 = vld [vmem:[%s3742_s15 + $0x224] sm:$0xf]  ;;  %v3091_v35 = vld [vmem:[%s3742_s15 + $0x230] sm:$0xf0] }
 0x11f   : > { %v2295_v45 = vld [vmem:[#allocation2 + $0x60] sm:$0xff] }
 0x120   : > { %2623 = vst.msk [vmem:[%s4020_s11 + $0x2c] sm:$0xf] %vm2611_vm3, %v2558_v37  ;;  %v2363_v46 = vmul.f32 %v3985_v41, %v2295_v45  ;;  %v3529_v45 = vld [vmem:[%s3742_s15 + $0x234] sm:$0xf0] }
 0x121   : > { %2229 = vst.msk [vmem:[#allocation2 + $0x68] sm:$0xff] %vm313_vm2, %v2164_v38  ;;  %v1857_v44 = vpop.f32.mrf.mxu2  ;;  %v1521_v48 = vpop.f32.mrf.mxu0 }
 0x122   : > { %v2431_v47 = vadd.f32 %v3994_v42, %v2363_v46  ;;  %v1858_v34 = vadd.f32 %v1857_v44, %v1689_v39  ;;  %v1690_v49 = vpop.f32.mrf.mxu1  ;;  %v4188_v61 = vpop.f32.mrf.mxu3  ;;  %v3097_v39 = vld [vmem:[%s3742_s15 + $0x228] sm:$0xf]  ;;  %v3118_v46 = vor.u32 %v3531_v30, %v3115_v51  ;;  %v397_v30 = vld [vmem:[#allocation2 + $0x98] sm:$0xff] }
 0x123   : > { %v1691_v5 = vadd.f32 %v1690_v49, %v1521_v48  ;;  %v3094_v48 = vor.u32 %v3526_v33, %v3091_v35  ;;  %v3098_v53 = vor.u32 %v3529_v45, %v3097_v39 }
 0x124   : > { %v2495_v50 = vmax.f32 %v2431_v47, 0.0  ;;  %v2027_v52 = vadd.f32 %v2026_v0, %v1858_v34  ;;  %v3090_v34 = vor.u32 %v3528_v32, %v3089_v29 }
 0x126   : > { %v2559_v56 = vpack.c.bf16 %v2495_v50, %v2495_v50  ;;  %v2165_v57 = vadd.f32 %v2027_v52, %v392_v43 }
 0x127   : > { %3440 = vmatmul.msk.bf16.gmra.mxu3 %vm1374_vm1, %v3102_v4 }
 0x128   : > { %2624 = vst.msk [vmem:[%s4020_s11 + $0x30] sm:$0xf] %vm2611_vm3, %v2559_v56  ;;  %v2296_v1 = vld [vmem:[#allocation2 + $0x68] sm:$0xff] }
 0x129   : > { %v2364_v6 = vmul.f32 %v3985_v41, %v2296_v1  ;;  %2230 = vst.msk [vmem:[#allocation2 + $0x70] sm:$0xff] %vm313_vm2, %v2165_v57  ;;  %v1859_v0 = vpop.f32.mrf.mxu2  ;;  %v1524_v9 = vpop.f32.mrf.mxu0 }
 0x12a   : > { %v1860_v2 = vadd.f32 %v1859_v0, %v1691_v5  ;;  %v1693_v10 = vpop.f32.mrf.mxu1  ;;  %v2036_v17 = vpop.f32.mrf.mxu3  ;;  %v396_v0 = vld [vmem:[#allocation2 + $0x90] sm:$0xff] }
 0x12b   : > { %v2432_v12 = vadd.f32 %v3994_v42, %v2364_v6  ;;  %v1694_v16 = vadd.f32 %v1693_v10, %v1524_v9  ;;  %v3535_v9 = vld [vmem:[%s3742_s15 + $0x26c] sm:$0xf]  ;;  %v3131_v10 = vld [vmem:[%s3742_s15 + $0x278] sm:$0xf0] }
 0x12c   : > { %v2029_v14 = vadd.f32 %v4166_v18, %v1860_v2  ;;  %1563 = vmatmul.bf16.gmra.mxu0 %v3074_v63  ;;  %v3105_v2 = vld [vmem:[%s3742_s15 + $0x240] sm:$0xf] }
 0x12d   : > { %v2496_v15 = vmax.f32 %v2432_v12, 0.0  ;;  %1732 = vmatmul.bf16.gmra.mxu1 %v3078_v8 }
 0x12e   : > { %v2166_v7 = vadd.f32 %v2029_v14, %v393_v13  ;;  %1901 = vmatmul.bf16.gmra.mxu2 %v3082_v11  ;;  %v3532_v13 = vld [vmem:[%s3742_s15 + $0x24c] sm:$0xf0]  ;;  %v3530_v14 = vld [vmem:[%s3742_s15 + $0x244] sm:$0xf] }
 0x12f   : > { %v2560_v19 = vpack.c.bf16 %v2496_v15, %v2496_v15  ;;  %v3107_v15 = vld [vmem:[%s3742_s15 + $0x250] sm:$0xf0] }
 0x130   : > { %v2297_v20 = vld [vmem:[#allocation2 + $0x70] sm:$0xff]  ;;  %2231 = vst.msk [vmem:[#allocation2 + $0x78] sm:$0xff] %vm313_vm2, %v2166_v7 }
 0x131   : > { %2625 = vst.msk [vmem:[%s4020_s11 + $0x34] sm:$0xf] %vm2611_vm3, %v2560_v19  ;;  %v2365_v18 = vmul.f32 %v3985_v41, %v2297_v20  ;;  %v1862_v22 = vpop.f32.mrf.mxu2  ;;  %v1526_v26 = vpop.f32.mrf.mxu0  ;;  %v3533_v19 = vld [vmem:[%s3742_s15 + $0x254] sm:$0xf0]  ;;  %v3134_v20 = vor.u32 %v3535_v9, %v3131_v10  ;;  %v399_v9 = vld [vmem:[#allocation2 + $0xa8] sm:$0xff] }
 0x132   : > { %v1863_v25 = vadd.f32 %v1862_v22, %v1694_v16  ;;  %v1695_v24 = vpop.f32.mrf.mxu1  ;;  %v4210_v36 = vpop.f32.mrf.mxu3  ;;  %v3113_v16 = vld [vmem:[%s3742_s15 + $0x248] sm:$0xf] }
 0x133   : > { %v2433_v23 = vadd.f32 %v3994_v42, %v2365_v18  ;;  %v3114_v29 = vor.u32 %v3533_v19, %v3113_v16  ;;  %v4279_v19 = vld [vmem:[%s4660_s3] ss:$0 sm:$0xff] }
 0x134   : > { %v2032_v28 = vadd.f32 %v2031_v40, %v1863_v25  ;;  %v1696_v40 = vadd.f32 %v1695_v24, %v1526_v26  ;;  %v3106_v26 = vor.u32 %v3532_v13, %v3105_v2  ;;  %v3110_v24 = vor.u32 %v3530_v14, %v3107_v15  ;;  %v4272_v15 = vld [vmem:[%s4659_s2] ss:$0 sm:$0xff] }
 0x135   : > { %v2497_v21 = vmax.f32 %v2433_v23, 0.0 }
 0x136   : > { %v2167_v31 = vadd.f32 %v2032_v28, %v394_v27 }
 0x137   : > { %v2561_v37 = vpack.c.bf16 %v2497_v21, %v2497_v21  ;;  %v2298_v38 = vld [vmem:[#allocation2 + $0x78] sm:$0xff]  ;;  %3441 = vmatmul.msk.bf16.gmra.mxu3 %vm1374_vm1, %v3118_v46 }
 0x138   : > { %v2366_v44 = vmul.f32 %v3985_v41, %v2298_v38  ;;  %2232 = vst.msk [vmem:[#allocation2 + $0x80] sm:$0xff] %vm313_vm2, %v2167_v31 }
 0x139   : > { %2626 = vst.msk [vmem:[%s4020_s11 + $0x38] sm:$0xf] %vm2611_vm3, %v2561_v37  ;;  %v1864_v47 = vpop.f32.mrf.mxu2  ;;  %v1529_v50 = vpop.f32.mrf.mxu0 }
 0x13a   : > { %v2434_v49 = vadd.f32 %v3994_v42, %v2366_v44  ;;  %v1865_v43 = vadd.f32 %v1864_v47, %v1696_v40  ;;  %v1698_v52 = vpop.f32.mrf.mxu1  ;;  %v2041_v60 = vpop.f32.mrf.mxu3  ;;  %v398_v47 = vld [vmem:[#allocation2 + $0xa0] sm:$0xff] }
 0x13b   : > { %v1699_v59 = vadd.f32 %v1698_v52, %v1529_v50  ;;  %v3147_v50 = vld [vmem:[%s3742_s15 + $0x298] sm:$0xf0] }
 0x13c   : > { %v2498_v55 = vmax.f32 %v2434_v49, 0.0  ;;  %v2034_v56 = vadd.f32 %v4188_v61, %v1865_v43  ;;  %1568 = vmatmul.bf16.gmra.mxu0 %v3090_v34  ;;  %v3539_v43 = vld [vmem:[%s3742_s15 + $0x28c] sm:$0xf] }
 0x13d   : > { %1737 = vmatmul.bf16.gmra.mxu1 %v3094_v48  ;;  %v3121_v48 = vld [vmem:[%s3742_s15 + $0x260] sm:$0xf] }
 0x13e   : > { %v2562_v57 = vpack.c.bf16 %v2498_v55, %v2498_v55  ;;  %v2168_v58 = vadd.f32 %v2034_v56, %v395_v54  ;;  %1906 = vmatmul.bf16.gmra.mxu2 %v3098_v53  ;;  %v3536_v53 = vld [vmem:[%s3742_s15 + $0x26c] sm:$0xf0]  ;;  %v3534_v54 = vld [vmem:[%s3742_s15 + $0x264] sm:$0xf]  ;;  %v3123_v55 = vld [vmem:[%s3742_s15 + $0x270] sm:$0xf0] }
 0x13f   : > { %v2299_v62 = vld [vmem:[#allocation2 + $0x80] sm:$0xff] }
 0x140   : > { %2627 = vst.msk [vmem:[%s4020_s11 + $0x3c] sm:$0xf] %vm2611_vm3, %v2562_v57  ;;  %v2367_v3 = vmul.f32 %v3985_v41, %v2299_v62  ;;  %v3537_v62 = vld [vmem:[%s3742_s15 + $0x274] sm:$0xf0] }
 0x141   : > { %2233 = vst.msk [vmem:[#allocation2 + $0x88] sm:$0xff] %vm313_vm2, %v2168_v58  ;;  %v1867_v61 = vpop.f32.mrf.mxu2  ;;  %v1531_v5 = vpop.f32.mrf.mxu0 }
 0x142   : > { %v2435_v4 = vadd.f32 %v3994_v42, %v2367_v3  ;;  %v1868_v1 = vadd.f32 %v1867_v61, %v1699_v59  ;;  %v1700_v6 = vpop.f32.mrf.mxu1  ;;  %v4232_v7 = vpop.f32.mrf.mxu3  ;;  %v3129_v59 = vld [vmem:[%s3742_s15 + $0x268] sm:$0xf]  ;;  %v3150_v3 = vor.u32 %v3539_v43, %v3147_v50  ;;  %v401_v43 = vld [vmem:[#allocation2 + $0xb8] sm:$0xff] }
 0x143   : > { %v1701_v22 = vadd.f32 %v1700_v6, %v1531_v5  ;;  %v3126_v5 = vor.u32 %v3534_v54, %v3123_v55  ;;  %v3130_v2 = vor.u32 %v3537_v62, %v3129_v59 }
 0x144   : > { %v2499_v63 = vmax.f32 %v2435_v4, 0.0  ;;  %v2037_v8 = vadd.f32 %v2036_v17, %v1868_v1  ;;  %v3122_v1 = vor.u32 %v3536_v53, %v3121_v48 }
 0x146   : > { %v2563_v11 = vpack.c.bf16 %v2499_v63, %v2499_v63  ;;  %v2169_v12 = vadd.f32 %v2037_v8, %v396_v0 }
 0x147   : > { %3442 = vmatmul.msk.bf16.gmra.mxu3 %vm1374_vm1, %v3134_v20 }
 0x148   : > { %2628 = vst.msk [vmem:[%s4020_s11 + $0x40] sm:$0xf] %vm2611_vm3, %v2563_v11  ;;  %v2300_v18 = vld [vmem:[#allocation2 + $0x88] sm:$0xff] }
 0x149   : > { %v2368_v25 = vmul.f32 %v3985_v41, %v2300_v18  ;;  %2234 = vst.msk [vmem:[#allocation2 + $0x90] sm:$0xff] %vm313_vm2, %v2169_v12  ;;  %v1869_v17 = vpop.f32.mrf.mxu2  ;;  %v1534_v27 = vpop.f32.mrf.mxu0 }
 0x14a   : > { %v1870_v23 = vadd.f32 %v1869_v17, %v1701_v22  ;;  %v1703_v28 = vpop.f32.mrf.mxu1  ;;  %v4243_v35 = vpop.f32.mrf.mxu3  ;;  %v400_v17 = vld [vmem:[#allocation2 + $0xb0] sm:$0xff] }
 0x14b   : > { %v2436_v21 = vadd.f32 %v3994_v42, %v2368_v25  ;;  %v1704_v33 = vadd.f32 %v1703_v28, %v1534_v27  ;;  %v3543_v27 = vld [vmem:[%s3742_s15 + $0x2ac] sm:$0xf]  ;;  %v3163_v28 = vld [vmem:[%s3742_s15 + $0x2b8] sm:$0xf0] }
 0x14c   : > { %v2039_v51 = vadd.f32 %v4210_v36, %v1870_v23  ;;  %1573 = vmatmul.bf16.gmra.mxu0 %v3106_v26  ;;  %v3137_v23 = vld [vmem:[%s3742_s15 + $0x280] sm:$0xf] }
 0x14d   : > { %v2500_v31 = vmax.f32 %v2436_v21, 0.0  ;;  %1742 = vmatmul.bf16.gmra.mxu1 %v3110_v24 }
 0x14e   : > { %v2170_v32 = vadd.f32 %v2039_v51, %v397_v30  ;;  %1911 = vmatmul.bf16.gmra.mxu2 %v3114_v29  ;;  %v3540_v30 = vld [vmem:[%s3742_s15 + $0x28c] sm:$0xf0]  ;;  %v3538_v51 = vld [vmem:[%s3742_s15 + $0x284] sm:$0xf] }
 0x14f   : > { %v2564_v37 = vpack.c.bf16 %v2500_v31, %v2500_v31  ;;  %v3139_v31 = vld [vmem:[%s3742_s15 + $0x290] sm:$0xf0] }
 0x150   : > { %v2301_v38 = vld [vmem:[#allocation2 + $0x90] sm:$0xff]  ;;  %2235 = vst.msk [vmem:[#allocation2 + $0x98] sm:$0xff] %vm313_vm2, %v2170_v32 }
 0x151   : > { %2629 = vst.msk [vmem:[%s4020_s11 + $0x44] sm:$0xf] %vm2611_vm3, %v2564_v37  ;;  %v2369_v36 = vmul.f32 %v3985_v41, %v2301_v38  ;;  %v1872_v39 = vpop.f32.mrf.mxu2  ;;  %v1536_v46 = vpop.f32.mrf.mxu0  ;;  %v3541_v37 = vld [vmem:[%s3742_s15 + $0x294] sm:$0xf0]  ;;  %v3166_v38 = vor.u32 %v3543_v27, %v3163_v28  ;;  %v403_v27 = vld [vmem:[#allocation2 + $0xc8] sm:$0xff] }
 0x152   : > { %v1873_v45 = vadd.f32 %v1872_v39, %v1704_v33  ;;  %v1705_v44 = vpop.f32.mrf.mxu1  ;;  %v4256_v56 = vpop.f32.mrf.mxu3  ;;  %v3145_v33 = vld [vmem:[%s3742_s15 + $0x288] sm:$0xf] }
 0x153   : > { %v2437_v40 = vadd.f32 %v3994_v42, %v2369_v36  ;;  %v3146_v48 = vor.u32 %v3541_v37, %v3145_v33 }
 0x154   : > { %v2042_v34 = vadd.f32 %v2041_v60, %v1873_v45  ;;  %v1706_v60 = vadd.f32 %v1705_v44, %v1536_v46  ;;  %v3138_v46 = vor.u32 %v3540_v30, %v3137_v23  ;;  %v3142_v44 = vor.u32 %v3538_v51, %v3139_v31 }
 0x155   : > { %v2501_v49 = vmax.f32 %v2437_v40, 0.0 }
 0x156   : > { %v2171_v52 = vadd.f32 %v2042_v34, %v398_v47 }
 0x157   : > { %v2565_v57 = vpack.c.bf16 %v2501_v49, %v2501_v49  ;;  %v2302_v58 = vld [vmem:[#allocation2 + $0x98] sm:$0xff]  ;;  %3443 = vmatmul.msk.bf16.gmra.mxu3 %vm1374_vm1, %v3150_v3 }
 0x158   : > { %v2370_v61 = vmul.f32 %v3985_v41, %v2302_v58  ;;  %2236 = vst.msk [vmem:[#allocation2 + $0xa0] sm:$0xff] %vm313_vm2, %v2171_v52 }
 0x159   : > { %2630 = vst.msk [vmem:[%s4020_s11 + $0x48] sm:$0xf] %vm2611_vm3, %v2565_v57  ;;  %v1874_v4 = vpop.f32.mrf.mxu2  ;;  %v1539_v63 = vpop.f32.mrf.mxu0 }
 0x15a   : > { %v2438_v6 = vadd.f32 %v3994_v42, %v2370_v61  ;;  %v1875_v0 = vadd.f32 %v1874_v4, %v1706_v60  ;;  %v1708_v8 = vpop.f32.mrf.mxu1  ;;  %v2051_v14 = vpop.f32.mrf.mxu3  ;;  %v402_v4 = vld [vmem:[#allocation2 + $0xc0] sm:$0xff] }
 0x15b   : > { %v1709_v13 = vadd.f32 %v1708_v8, %v1539_v63  ;;  %v3179_v63 = vld [vmem:[%s3742_s15 + $0x2d8] sm:$0xf0] }
 0x15c   : > { %v2502_v10 = vmax.f32 %v2438_v6, 0.0  ;;  %v2044_v41 = vadd.f32 %v4232_v7, %v1875_v0  ;;  %1578 = vmatmul.bf16.gmra.mxu0 %v3122_v1  ;;  %v3547_v0 = vld [vmem:[%s3742_s15 + $0x2cc] sm:$0xf] }
 0x15d   : > { %1747 = vmatmul.bf16.gmra.mxu1 %v3126_v5  ;;  %v3153_v5 = vld [vmem:[%s3742_s15 + $0x2a0] sm:$0xf] }
 0x15e   : > { %v2566_v11 = vpack.c.bf16 %v2502_v10, %v2502_v10  ;;  %v2172_v12 = vadd.f32 %v2044_v41, %v399_v9  ;;  %1916 = vmatmul.bf16.gmra.mxu2 %v3130_v2  ;;  %v3544_v2 = vld [vmem:[%s3742_s15 + $0x2ac] sm:$0xf0]  ;;  %v3542_v9 = vld [vmem:[%s3742_s15 + $0x2a4] sm:$0xf]  ;;  %v3155_v10 = vld [vmem:[%s3742_s15 + $0x2b0] sm:$0xf0] }
 0x15f   : > { %v2303_v42 = vld [vmem:[#allocation2 + $0xa0] sm:$0xff] }
 0x160   : > { %2631 = vst.msk [vmem:[%s4020_s11 + $0x4c] sm:$0xf] %vm2611_vm3, %v2566_v11  ;;  %v2371_v7 = vmul.f32 %v4272_v15, %v2303_v42  ;;  %v3545_v42 = vld [vmem:[%s3742_s15 + $0x2b4] sm:$0xf0] }
 0x161   : > { %2237 = vst.msk [vmem:[#allocation2 + $0xa8] sm:$0xff] %vm313_vm2, %v2172_v12  ;;  %v1877_v16 = vpop.f32.mrf.mxu2  ;;  %v1541_v22 = vpop.f32.mrf.mxu0 }
 0x162   : > { %v2439_v20 = vadd.f32 %v4279_v19, %v2371_v7  ;;  %v1878_v18 = vadd.f32 %v1877_v16, %v1709_v13  ;;  %v1710_v25 = vpop.f32.mrf.mxu1  ;;  %v4289_v32 = vpop.f32.mrf.mxu3  ;;  %v3161_v13 = vld [vmem:[%s3742_s15 + $0x2a8] sm:$0xf]  ;;  %v3182_v7 = vor.u32 %v3547_v0, %v3179_v63  ;;  %v405_v0 = vld [vmem:[#allocation2 + $0xd8] sm:$0xff] }
 0x163   : > { %v1711_v39 = vadd.f32 %v1710_v25, %v1541_v22  ;;  %v3158_v22 = vor.u32 %v3542_v9, %v3155_v10  ;;  %v3162_v23 = vor.u32 %v3545_v42, %v3161_v13 }
 0x164   : > { %v2503_v26 = vmax.f32 %v2439_v20, 0.0  ;;  %v2047_v24 = vadd.f32 %v4243_v35, %v1878_v18  ;;  %v3154_v18 = vor.u32 %v3544_v2, %v3153_v5 }
 0x166   : > { %v2567_v29 = vpack.c.bf16 %v2503_v26, %v2503_v26  ;;  %v2173_v21 = vadd.f32 %v2047_v24, %v400_v17 }
 0x167   : > { %3444 = vmatmul.msk.bf16.gmra.mxu3 %vm1374_vm1, %v3166_v38 }
 0x168   : > { %2632 = vst.msk [vmem:[%s4020_s11 + $0x50] sm:$0xf] %vm2611_vm3, %v2567_v29  ;;  %v2304_v36 = vld [vmem:[#allocation2 + $0xa8] sm:$0xff] }
 0x169   : > { %v2372_v45 = vmul.f32 %v4272_v15, %v2304_v36  ;;  %2238 = vst.msk [vmem:[#allocation2 + $0xb0] sm:$0xff] %vm313_vm2, %v2173_v21  ;;  %v1879_v35 = vpop.f32.mrf.mxu2  ;;  %v1544_v47 = vpop.f32.mrf.mxu0 }
 0x16a   : > { %v1880_v40 = vadd.f32 %v1879_v35, %v1711_v39  ;;  %v1713_v34 = vpop.f32.mrf.mxu1  ;;  %v2056_v55 = vpop.f32.mrf.mxu3  ;;  %v404_v35 = vld [vmem:[#allocation2 + $0xd0] sm:$0xff] }
 0x16b   : > { %v2440_v49 = vadd.f32 %v4279_v19, %v2372_v45  ;;  %v1714_v54 = vadd.f32 %v1713_v34, %v1544_v47  ;;  %v3551_v47 = vld [vmem:[%s3742_s15 + $0x2ec] sm:$0xf]  ;;  %v3195_v34 = vld [vmem:[%s3742_s15 + $0x2f8] sm:$0xf0] }
 0x16c   : > { %v2049_v50 = vadd.f32 %v4256_v56, %v1880_v40  ;;  %1583 = vmatmul.bf16.gmra.mxu0 %v3138_v46  ;;  %v3169_v40 = vld [vmem:[%s3742_s15 + $0x2c0] sm:$0xf] }
 0x16d   : > { %v2504_v52 = vmax.f32 %v2440_v49, 0.0  ;;  %1752 = vmatmul.bf16.gmra.mxu1 %v3142_v44 }
 0x16e   : > { %v2174_v53 = vadd.f32 %v2049_v50, %v401_v43  ;;  %1921 = vmatmul.bf16.gmra.mxu2 %v3146_v48  ;;  %v3548_v43 = vld [vmem:[%s3742_s15 + $0x2cc] sm:$0xf0]  ;;  %v3546_v50 = vld [vmem:[%s3742_s15 + $0x2c4] sm:$0xf] }
 0x16f   : > { %v2568_v57 = vpack.c.bf16 %v2504_v52, %v2504_v52  ;;  %v3171_v52 = vld [vmem:[%s3742_s15 + $0x2d0] sm:$0xf0] }
 0x170   : > { %v2305_v58 = vld [vmem:[#allocation2 + $0xb0] sm:$0xff]  ;;  %2239 = vst.msk [vmem:[#allocation2 + $0xb8] sm:$0xff] %vm313_vm2, %v2174_v53 }
 0x171   : > { %2633 = vst.msk [vmem:[%s4020_s11 + $0x54] sm:$0xf] %vm2611_vm3, %v2568_v57  ;;  %v2373_v56 = vmul.f32 %v4272_v15, %v2305_v58  ;;  %v1882_v59 = vpop.f32.mrf.mxu2  ;;  %v1546_v3 = vpop.f32.mrf.mxu0  ;;  %v3549_v57 = vld [vmem:[%s3742_s15 + $0x2d4] sm:$0xf0]  ;;  %v3198_v58 = vor.u32 %v3551_v47, %v3195_v34  ;;  %v407_v47 = vld [vmem:[#allocation2 + $0xe8] sm:$0xff] }
 0x172   : > { %v1883_v62 = vadd.f32 %v1882_v59, %v1714_v54  ;;  %v1715_v61 = vpop.f32.mrf.mxu1  ;;  %v4311_v41 = vpop.f32.mrf.mxu3  ;;  %v3177_v54 = vld [vmem:[%s3742_s15 + $0x2c8] sm:$0xf] }
 0x173   : > { %v2441_v60 = vadd.f32 %v4279_v19, %v2373_v56  ;;  %v3178_v5 = vor.u32 %v3549_v57, %v3177_v54 }
 0x174   : > { %v2052_v1 = vadd.f32 %v2051_v14, %v1883_v62  ;;  %v1716_v14 = vadd.f32 %v1715_v61, %v1546_v3  ;;  %v3170_v3 = vor.u32 %v3548_v43, %v3169_v40  ;;  %v3174_v61 = vor.u32 %v3546_v50, %v3171_v52 }
 0x175   : > { %v2505_v6 = vmax.f32 %v2441_v60, 0.0 }
 0x176   : > { %v2175_v8 = vadd.f32 %v2052_v1, %v402_v4 }
 0x177   : > { %v2569_v11 = vpack.c.bf16 %v2505_v6, %v2505_v6  ;;  %v2306_v12 = vld [vmem:[#allocation2 + $0xb8] sm:$0xff]  ;;  %3445 = vmatmul.msk.bf16.gmra.mxu3 %vm1374_vm1, %v3182_v7 }
 0x178   : > { %v2374_v16 = vmul.f32 %v4272_v15, %v2306_v12  ;;  %2240 = vst.msk [vmem:[#allocation2 + $0xc0] sm:$0xff] %vm313_vm2, %v2175_v8 }
 0x179   : > { %2634 = vst.msk [vmem:[%s4020_s11 + $0x58] sm:$0xf] %vm2611_vm3, %v2569_v11  ;;  %v1884_v20 = vpop.f32.mrf.mxu2  ;;  %v1549_v26 = vpop.f32.mrf.mxu0 }
 0x17a   : > { %v2442_v25 = vadd.f32 %v4279_v19, %v2374_v16  ;;  %v1885_v17 = vadd.f32 %v1884_v20, %v1716_v14  ;;  %v1718_v24 = vpop.f32.mrf.mxu1  ;;  %v2061_v31 = vpop.f32.mrf.mxu3  ;;  %v406_v20 = vld [vmem:[#allocation2 + $0xe0] sm:$0xff] }
 0x17b   : > { %v1719_v51 = vadd.f32 %v1718_v24, %v1549_v26  ;;  %v3211_v26 = vld [vmem:[%s3742_s15 + $0x318] sm:$0xf0] }
 0x17c   : > { %v2506_v28 = vmax.f32 %v2442_v25, 0.0  ;;  %v2054_v29 = vadd.f32 %v4289_v32, %v1885_v17  ;;  %1588 = vmatmul.bf16.gmra.mxu0 %v3154_v18  ;;  %v3555_v17 = vld [vmem:[%s3742_s15 + $0x30c] sm:$0xf] }
 0x17d   : > { %1757 = vmatmul.bf16.gmra.mxu1 %v3158_v22  ;;  %v3185_v22 = vld [vmem:[%s3742_s15 + $0x2e0] sm:$0xf] }
 0x17e   : > { %v2570_v21 = vpack.c.bf16 %v2506_v28, %v2506_v28  ;;  %v2176_v30 = vadd.f32 %v2054_v29, %v403_v27  ;;  %1926 = vmatmul.bf16.gmra.mxu2 %v3162_v23  ;;  %v3552_v23 = vld [vmem:[%s3742_s15 + $0x2ec] sm:$0xf0]  ;;  %v3550_v27 = vld [vmem:[%s3742_s15 + $0x2e4] sm:$0xf]  ;;  %v3187_v28 = vld [vmem:[%s3742_s15 + $0x2f0] sm:$0xf0] }
 0x17f   : > { %v2307_v33 = vld [vmem:[#allocation2 + $0xc0] sm:$0xff] }
 0x180   : > { %2635 = vst.msk [vmem:[%s4020_s11 + $0x5c] sm:$0xf] %vm2611_vm3, %v2570_v21  ;;  %v2375_v37 = vmul.f32 %v4272_v15, %v2307_v33  ;;  %v3553_v33 = vld [vmem:[%s3742_s15 + $0x2f4] sm:$0xf0] }
 0x181   : > { %2241 = vst.msk [vmem:[#allocation2 + $0xc8] sm:$0xff] %vm313_vm2, %v2176_v30  ;;  %v1887_v32 = vpop.f32.mrf.mxu2  ;;  %v1551_v39 = vpop.f32.mrf.mxu0 }
 0x182   : > { %v2443_v38 = vadd.f32 %v4279_v19, %v2375_v37  ;;  %v1888_v36 = vadd.f32 %v1887_v32, %v1719_v51  ;;  %v1720_v45 = vpop.f32.mrf.mxu1  ;;  %v4333_v53 = vpop.f32.mrf.mxu3  ;;  %v3193_v51 = vld [vmem:[%s3742_s15 + $0x2e8] sm:$0xf]  ;;  %v3214_v37 = vor.u32 %v3555_v17, %v3211_v26  ;;  %v409_v17 = vld [vmem:[#allocation2 + $0xf8] sm:$0xff] }
 0x183   : > { %v1721_v59 = vadd.f32 %v1720_v45, %v1551_v39  ;;  %v3190_v39 = vor.u32 %v3550_v27, %v3187_v28  ;;  %v3194_v40 = vor.u32 %v3553_v33, %v3193_v51 }
 0x184   : > { %v2507_v46 = vmax.f32 %v2443_v38, 0.0  ;;  %v2057_v44 = vadd.f32 %v2056_v55, %v1888_v36  ;;  %v3186_v36 = vor.u32 %v3552_v23, %v3185_v22 }
 0x186   : > { %v2571_v48 = vpack.c.bf16 %v2507_v46, %v2507_v46  ;;  %v2177_v49 = vadd.f32 %v2057_v44, %v404_v35 }
 0x187   : > { %3446 = vmatmul.msk.bf16.gmra.mxu3 %vm1374_vm1, %v3198_v58 }
 0x188   : > { %2636 = vst.msk [vmem:[%s4020_s11 + $0x60] sm:$0xf] %vm2611_vm3, %v2571_v48  ;;  %v2308_v56 = vld [vmem:[#allocation2 + $0xc8] sm:$0xff] }
 0x189   : > { %v2376_v62 = vmul.f32 %v4272_v15, %v2308_v56  ;;  %2242 = vst.msk [vmem:[#allocation2 + $0xd0] sm:$0xff] %vm313_vm2, %v2177_v49  ;;  %v1889_v55 = vpop.f32.mrf.mxu2  ;;  %v1554_v4 = vpop.f32.mrf.mxu0 }
 0x18a   : > { %v1890_v60 = vadd.f32 %v1889_v55, %v1721_v59  ;;  %v1723_v1 = vpop.f32.mrf.mxu1  ;;  %v2066_v10 = vpop.f32.mrf.mxu3  ;;  %v408_v55 = vld [vmem:[#allocation2 + $0xf0] sm:$0xff] }
 0x18b   : > { %v2444_v6 = vadd.f32 %v4279_v19, %v2376_v62  ;;  %v1724_v9 = vadd.f32 %v1723_v1, %v1554_v4  ;;  %v3559_v4 = vld [vmem:[%s3742_s15 + $0x32c] sm:$0xf]  ;;  %v3227_v1 = vld [vmem:[%s3742_s15 + $0x338] sm:$0xf0] }
 0x18c   : > { %v2059_v63 = vadd.f32 %v4311_v41, %v1890_v60  ;;  %1593 = vmatmul.bf16.gmra.mxu0 %v3170_v3  ;;  %v3201_v60 = vld [vmem:[%s3742_s15 + $0x300] sm:$0xf] }
 0x18d   : > { %v2508_v8 = vmax.f32 %v2444_v6, 0.0  ;;  %1762 = vmatmul.bf16.gmra.mxu1 %v3174_v61 }
 0x18e   : > { %v2178_v2 = vadd.f32 %v2059_v63, %v405_v0  ;;  %1931 = vmatmul.bf16.gmra.mxu2 %v3178_v5  ;;  %v3556_v0 = vld [vmem:[%s3742_s15 + $0x30c] sm:$0xf0]  ;;  %v3554_v63 = vld [vmem:[%s3742_s15 + $0x304] sm:$0xf] }
 0x18f   : > { %v2572_v11 = vpack.c.bf16 %v2508_v8, %v2508_v8  ;;  %v3203_v8 = vld [vmem:[%s3742_s15 + $0x310] sm:$0xf0] }
 0x190   : > { %v2309_v12 = vld [vmem:[#allocation2 + $0xd0] sm:$0xff]  ;;  %2243 = vst.msk [vmem:[#allocation2 + $0xd8] sm:$0xff] %vm313_vm2, %v2178_v2 }
 0x191   : > { %2637 = vst.msk [vmem:[%s4020_s11 + $0x64] sm:$0xf] %vm2611_vm3, %v2572_v11  ;;  %v2377_v41 = vmul.f32 %v4272_v15, %v2309_v12  ;;  %v1892_v13 = vpop.f32.mrf.mxu2  ;;  %v1556_v7 = vpop.f32.mrf.mxu0  ;;  %v3557_v11 = vld [vmem:[%s3742_s15 + $0x314] sm:$0xf0]  ;;  %v3230_v12 = vor.u32 %v3559_v4, %v3227_v1  ;;  %v411_v4 = vld [vmem:[#allocation2 + $0x108] sm:$0xff] }
 0x192   : > { %v1893_v42 = vadd.f32 %v1892_v13, %v1724_v9  ;;  %v1725_v16 = vpop.f32.mrf.mxu1  ;;  %v4355_v29 = vpop.f32.mrf.mxu3  ;;  %v3209_v9 = vld [vmem:[%s3742_s15 + $0x308] sm:$0xf] }
 0x193   : > { %v2445_v14 = vadd.f32 %v4279_v19, %v2377_v41  ;;  %v3210_v22 = vor.u32 %v3557_v11, %v3209_v9 }
 0x194   : > { %v2062_v18 = vadd.f32 %v2061_v31, %v1893_v42  ;;  %v1726_v31 = vadd.f32 %v1725_v16, %v1556_v7  ;;  %v3202_v7 = vor.u32 %v3556_v0, %v3201_v60  ;;  %v3206_v16 = vor.u32 %v3554_v63, %v3203_v8 }
 0x195   : > { %v2509_v25 = vmax.f32 %v2445_v14, 0.0 }
 0x196   : > { %v2179_v24 = vadd.f32 %v2062_v18, %v406_v20 }
 0x197   : > { %v2573_v21 = vpack.c.bf16 %v2509_v25, %v2509_v25  ;;  %v2310_v30 = vld [vmem:[#allocation2 + $0xd8] sm:$0xff]  ;;  %3447 = vmatmul.msk.bf16.gmra.mxu3 %vm1374_vm1, %v3214_v37 }
 0x198   : > { %v2378_v32 = vmul.f32 %v4272_v15, %v2310_v30  ;;  %2244 = vst.msk [vmem:[#allocation2 + $0xe0] sm:$0xff] %vm313_vm2, %v2179_v24 }
 0x199   : > { %2638 = vst.msk [vmem:[%s4020_s11 + $0x68] sm:$0xf] %vm2611_vm3, %v2573_v21  ;;  %v1894_v38 = vpop.f32.mrf.mxu2  ;;  %v1559_v46 = vpop.f32.mrf.mxu0 }
 0x19a   : > { %v2446_v45 = vadd.f32 %v4279_v19, %v2378_v32  ;;  %v1895_v35 = vadd.f32 %v1894_v38, %v1726_v31  ;;  %v1728_v44 = vpop.f32.mrf.mxu1  ;;  %v2071_v52 = vpop.f32.mrf.mxu3  ;;  %v410_v38 = vld [vmem:[#allocation2 + $0x100] sm:$0xff] }
 0x19b   : > { %v1729_v50 = vadd.f32 %v1728_v44, %v1559_v46  ;;  %v3243_v46 = vld [vmem:[%s3742_s15 + $0x358] sm:$0xf0] }
 0x19c   : > { %v2510_v34 = vmax.f32 %v2446_v45, 0.0  ;;  %v2064_v48 = vadd.f32 %v4333_v53, %v1895_v35  ;;  %1598 = vmatmul.bf16.gmra.mxu0 %v3186_v36  ;;  %v3563_v35 = vld [vmem:[%s3742_s15 + $0x34c] sm:$0xf] }
 0x19d   : > { %1767 = vmatmul.bf16.gmra.mxu1 %v3190_v39  ;;  %v3217_v39 = vld [vmem:[%s3742_s15 + $0x320] sm:$0xf] }
 0x19e   : > { %v2574_v49 = vpack.c.bf16 %v2510_v34, %v2510_v34  ;;  %v2180_v43 = vadd.f32 %v2064_v48, %v407_v47  ;;  %1936 = vmatmul.bf16.gmra.mxu2 %v3194_v40  ;;  %v3560_v40 = vld [vmem:[%s3742_s15 + $0x32c] sm:$0xf0]  ;;  %v3558_v47 = vld [vmem:[%s3742_s15 + $0x324] sm:$0xf]  ;;  %v3219_v34 = vld [vmem:[%s3742_s15 + $0x330] sm:$0xf0] }
 0x19f   : > { %v2311_v54 = vld [vmem:[#allocation2 + $0xe0] sm:$0xff] }
 0x1a0   : > { %2639 = vst.msk [vmem:[%s4020_s11 + $0x6c] sm:$0xf] %vm2611_vm3, %v2574_v49  ;;  %v2379_v57 = vmul.f32 %v4272_v15, %v2311_v54  ;;  %v3561_v54 = vld [vmem:[%s3742_s15 + $0x334] sm:$0xf0] }
 0x1a1   : > { %2245 = vst.msk [vmem:[#allocation2 + $0xe8] sm:$0xff] %vm313_vm2, %v2180_v43  ;;  %v1897_v53 = vpop.f32.mrf.mxu2  ;;  %v1561_v59 = vpop.f32.mrf.mxu0 }
 0x1a2   : > { %v2447_v58 = vadd.f32 %v4279_v19, %v2379_v57  ;;  %v1898_v56 = vadd.f32 %v1897_v53, %v1729_v50  ;;  %v1730_v62 = vpop.f32.mrf.mxu1  ;;  %v4377_v2 = vpop.f32.mrf.mxu3  ;;  %v3225_v50 = vld [vmem:[%s3742_s15 + $0x328] sm:$0xf]  ;;  %v3246_v57 = vor.u32 %v3563_v35, %v3243_v46  ;;  %v413_v35 = vld [vmem:[#allocation2 + $0x118] sm:$0xff] }
 0x1a3   : > { %v1731_v13 = vadd.f32 %v1730_v62, %v1561_v59  ;;  %v3222_v59 = vor.u32 %v3558_v47, %v3219_v34  ;;  %v3226_v60 = vor.u32 %v3561_v54, %v3225_v50 }
 0x1a4   : > { %v2511_v3 = vmax.f32 %v2447_v58, 0.0  ;;  %v2067_v61 = vadd.f32 %v2066_v10, %v1898_v56  ;;  %v3218_v56 = vor.u32 %v3560_v40, %v3217_v39 }
 0x1a6   : > { %v2575_v5 = vpack.c.bf16 %v2511_v3, %v2511_v3  ;;  %v2181_v6 = vadd.f32 %v2067_v61, %v408_v55 }
 0x1a7   : > { %3448 = vmatmul.msk.bf16.gmra.mxu3 %vm1374_vm1, %v3230_v12 }
 0x1a8   : > { %2640 = vst.msk [vmem:[%s4020_s11 + $0x70] sm:$0xf] %vm2611_vm3, %v2575_v5  ;;  %v2312_v41 = vld [vmem:[#allocation2 + $0xe8] sm:$0xff] }
 0x1a9   : > { %v2380_v42 = vmul.f32 %v4272_v15, %v2312_v41  ;;  %2246 = vst.msk [vmem:[#allocation2 + $0xf0] sm:$0xff] %vm313_vm2, %v2181_v6  ;;  %v1899_v10 = vpop.f32.mrf.mxu2  ;;  %v1564_v20 = vpop.f32.mrf.mxu0 }
 0x1aa   : > { %v1900_v14 = vadd.f32 %v1899_v10, %v1731_v13  ;;  %v1733_v18 = vpop.f32.mrf.mxu1  ;;  %v2076_v28 = vpop.f32.mrf.mxu3  ;;  %v412_v10 = vld [vmem:[#allocation2 + $0x110] sm:$0xff] }
 0x1ab   : > { %v2448_v25 = vadd.f32 %v4279_v19, %v2380_v42  ;;  %v1734_v27 = vadd.f32 %v1733_v18, %v1564_v20  ;;  %v3567_v20 = vld [vmem:[%s3742_s15 + $0x36c] sm:$0xf]  ;;  %v3259_v18 = vld [vmem:[%s3742_s15 + $0x378] sm:$0xf0] }
 0x1ac   : > { %v2069_v26 = vadd.f32 %v4355_v29, %v1900_v14  ;;  %1603 = vmatmul.bf16.gmra.mxu0 %v3202_v7  ;;  %v3233_v14 = vld [vmem:[%s3742_s15 + $0x340] sm:$0xf] }
 0x1ad   : > { %v2512_v24 = vmax.f32 %v2448_v25, 0.0  ;;  %1772 = vmatmul.bf16.gmra.mxu1 %v3206_v16 }
 0x1ae   : > { %v2182_v23 = vadd.f32 %v2069_v26, %v409_v17  ;;  %1941 = vmatmul.bf16.gmra.mxu2 %v3210_v22  ;;  %v3564_v17 = vld [vmem:[%s3742_s15 + $0x34c] sm:$0xf0]  ;;  %v3562_v26 = vld [vmem:[%s3742_s15 + $0x344] sm:$0xf] }
 0x1af   : > { %v2576_v21 = vpack.c.bf16 %v2512_v24, %v2512_v24  ;;  %v3235_v24 = vld [vmem:[%s3742_s15 + $0x350] sm:$0xf0] }
 0x1b0   : > { %v2313_v30 = vld [vmem:[#allocation2 + $0xf0] sm:$0xff]  ;;  %2247 = vst.msk [vmem:[#allocation2 + $0xf8] sm:$0xff] %vm313_vm2, %v2182_v23 }
 0x1b1   : > { %2641 = vst.msk [vmem:[%s4020_s11 + $0x74] sm:$0xf] %vm2611_vm3, %v2576_v21  ;;  %v2381_v29 = vmul.f32 %v4272_v15, %v2313_v30  ;;  %v1902_v51 = vpop.f32.mrf.mxu2  ;;  %v1566_v37 = vpop.f32.mrf.mxu0  ;;  %v3565_v21 = vld [vmem:[%s3742_s15 + $0x354] sm:$0xf0]  ;;  %v3262_v30 = vor.u32 %v3567_v20, %v3259_v18  ;;  %v415_v20 = vld [vmem:[#allocation2 + $0x128] sm:$0xff] }
 0x1b2   : > { %v1903_v33 = vadd.f32 %v1902_v51, %v1734_v27  ;;  %v1735_v32 = vpop.f32.mrf.mxu1  ;;  %v4399_v48 = vpop.f32.mrf.mxu3  ;;  %v3241_v27 = vld [vmem:[%s3742_s15 + $0x348] sm:$0xf] }
 0x1b3   : > { %v2449_v31 = vadd.f32 %v4279_v19, %v2381_v29  ;;  %v3242_v39 = vor.u32 %v3565_v21, %v3241_v27 }
 0x1b4   : > { %v2072_v36 = vadd.f32 %v2071_v52, %v1903_v33  ;;  %v1736_v52 = vadd.f32 %v1735_v32, %v1566_v37  ;;  %v3234_v37 = vor.u32 %v3564_v17, %v3233_v14  ;;  %v3238_v32 = vor.u32 %v3562_v26, %v3235_v24 }
 0x1b5   : > { %v2513_v45 = vmax.f32 %v2449_v31, 0.0 }
 0x1b6   : > { %v2183_v44 = vadd.f32 %v2072_v36, %v410_v38 }
 0x1b7   : > { %v2577_v49 = vpack.c.bf16 %v2513_v45, %v2513_v45  ;;  %v2314_v43 = vld [vmem:[#allocation2 + $0xf8] sm:$0xff]  ;;  %3449 = vmatmul.msk.bf16.gmra.mxu3 %vm1374_vm1, %v3246_v57 }
 0x1b8   : > { %v2382_v53 = vmul.f32 %v4272_v15, %v2314_v43  ;;  %2248 = vst.msk [vmem:[#allocation2 + $0x100] sm:$0xff] %vm313_vm2, %v2183_v44 }
 0x1b9   : > { %2642 = vst.msk [vmem:[%s4020_s11 + $0x78] sm:$0xf] %vm2611_vm3, %v2577_v49  ;;  %v1904_v58 = vpop.f32.mrf.mxu2  ;;  %v1569_v3 = vpop.f32.mrf.mxu0 }
 0x1ba   : > { %v2450_v62 = vadd.f32 %v4279_v19, %v2382_v53  ;;  %v1905_v55 = vadd.f32 %v1904_v58, %v1736_v52  ;;  %v1738_v61 = vpop.f32.mrf.mxu1  ;;  %v2081_v8 = vpop.f32.mrf.mxu3  ;;  %v414_v58 = vld [vmem:[#allocation2 + $0x120] sm:$0xff] }
 0x1bb   : > { %v1739_v63 = vadd.f32 %v1738_v61, %v1569_v3  ;;  %v3275_v3 = vld [vmem:[%s3742_s15 + $0x398] sm:$0xf0] }
 0x1bc   : > { %v2514_v1 = vmax.f32 %v2450_v62, 0.0  ;;  %v2074_v5 = vadd.f32 %v4377_v2, %v1905_v55  ;;  %1608 = vmatmul.bf16.gmra.mxu0 %v3218_v56  ;;  %v3571_v55 = vld [vmem:[%s3742_s15 + $0x38c] sm:$0xf] }
 0x1bd   : > { %1777 = vmatmul.bf16.gmra.mxu1 %v3222_v59  ;;  %v3249_v59 = vld [vmem:[%s3742_s15 + $0x360] sm:$0xf] }
 0x1be   : > { %v2578_v6 = vpack.c.bf16 %v2514_v1, %v2514_v1  ;;  %v2184_v0 = vadd.f32 %v2074_v5, %v411_v4  ;;  %1946 = vmatmul.bf16.gmra.mxu2 %v3226_v60  ;;  %v3568_v60 = vld [vmem:[%s3742_s15 + $0x36c] sm:$0xf0]  ;;  %v3566_v4 = vld [vmem:[%s3742_s15 + $0x364] sm:$0xf]  ;;  %v3251_v1 = vld [vmem:[%s3742_s15 + $0x370] sm:$0xf0] }
 0x1bf   : > { %v2315_v9 = vld [vmem:[#allocation2 + $0x100] sm:$0xff] }
 0x1c0   : > { %2643 = vst.msk [vmem:[%s4020_s11 + $0x7c] sm:$0xf] %vm2611_vm3, %v2578_v6  ;;  %v2383_v11 = vmul.f32 %v4272_v15, %v2315_v9  ;;  %v3569_v9 = vld [vmem:[%s3742_s15 + $0x374] sm:$0xf0] }
 0x1c1   : > { %2249 = vst.msk [vmem:[#allocation2 + $0x108] sm:$0xff] %vm313_vm2, %v2184_v0  ;;  %v1907_v2 = vpop.f32.mrf.mxu2  ;;  %v1571_v13 = vpop.f32.mrf.mxu0 }
 0x1c2   : > { %v2451_v12 = vadd.f32 %v4279_v19, %v2383_v11  ;;  %v1908_v41 = vadd.f32 %v1907_v2, %v1739_v63  ;;  %v1740_v42 = vpop.f32.mrf.mxu1  ;;  %v4421_v23 = vpop.f32.mrf.mxu3  ;;  %v3257_v63 = vld [vmem:[%s3742_s15 + $0x368] sm:$0xf]  ;;  %v3278_v11 = vor.u32 %v3571_v55, %v3275_v3  ;;  %v417_v55 = vld [vmem:[#allocation2 + $0x138] sm:$0xff] }
 0x1c3   : > { %v1741_v51 = vadd.f32 %v1740_v42, %v1571_v13  ;;  %v3254_v13 = vor.u32 %v3566_v4, %v3251_v1  ;;  %v3258_v14 = vor.u32 %v3569_v9, %v3257_v63 }
 0x1c4   : > { %v2515_v7 = vmax.f32 %v2451_v12, 0.0  ;;  %v2077_v16 = vadd.f32 %v2076_v28, %v1908_v41  ;;  %v3250_v41 = vor.u32 %v3568_v60, %v3249_v59 }
 0x1c6   : > { %v2579_v22 = vpack.c.bf16 %v2515_v7, %v2515_v7  ;;  %v2185_v25 = vadd.f32 %v2077_v16, %v412_v10 }
 0x1c7   : > { %3450 = vmatmul.msk.bf16.gmra.mxu3 %vm1374_vm1, %v3262_v30 }
 0x1c8   : > { %2644 = vst.msk [vmem:[%s4020_s11 + $0x80] sm:$0xf] %vm2611_vm3, %v2579_v22  ;;  %v2316_v29 = vld [vmem:[#allocation2 + $0x108] sm:$0xff] }
 0x1c9   : > { %v2384_v33 = vmul.f32 %v4272_v15, %v2316_v29  ;;  %2250 = vst.msk [vmem:[#allocation2 + $0x110] sm:$0xff] %vm313_vm2, %v2185_v25  ;;  %v1909_v28 = vpop.f32.mrf.mxu2  ;;  %v1574_v38 = vpop.f32.mrf.mxu0 }
 0x1ca   : > { %v1910_v31 = vadd.f32 %v1909_v28, %v1741_v51  ;;  %v1743_v36 = vpop.f32.mrf.mxu1  ;;  %v2086_v34 = vpop.f32.mrf.mxu3  ;;  %v416_v28 = vld [vmem:[#allocation2 + $0x130] sm:$0xff] }
 0x1cb   : > { %v2452_v45 = vadd.f32 %v4279_v19, %v2384_v33  ;;  %v1744_v47 = vadd.f32 %v1743_v36, %v1574_v38  ;;  %v3575_v38 = vld [vmem:[%s3742_s15 + $0x3ac] sm:$0xf]  ;;  %v3291_v36 = vld [vmem:[%s3742_s15 + $0x3b8] sm:$0xf0] }
 0x1cc   : > { %v2079_v46 = vadd.f32 %v4399_v48, %v1910_v31  ;;  %1613 = vmatmul.bf16.gmra.mxu0 %v3234_v37  ;;  %v3265_v31 = vld [vmem:[%s3742_s15 + $0x380] sm:$0xf] }
 0x1cd   : > { %v2516_v44 = vmax.f32 %v2452_v45, 0.0  ;;  %1782 = vmatmul.bf16.gmra.mxu1 %v3238_v32 }
 0x1ce   : > { %v2186_v40 = vadd.f32 %v2079_v46, %v413_v35  ;;  %1951 = vmatmul.bf16.gmra.mxu2 %v3242_v39  ;;  %v3572_v35 = vld [vmem:[%s3742_s15 + $0x38c] sm:$0xf0]  ;;  %v3570_v46 = vld [vmem:[%s3742_s15 + $0x384] sm:$0xf] }
 0x1cf   : > { %v2580_v49 = vpack.c.bf16 %v2516_v44, %v2516_v44  ;;  %v3267_v44 = vld [vmem:[%s3742_s15 + $0x390] sm:$0xf0] }
 0x1d0   : > { %v2317_v43 = vld [vmem:[#allocation2 + $0x110] sm:$0xff]  ;;  %2251 = vst.msk [vmem:[#allocation2 + $0x118] sm:$0xff] %vm313_vm2, %v2186_v40 }
 0x1d1   : > { %2645 = vst.msk [vmem:[%s4020_s11 + $0x84] sm:$0xf] %vm2611_vm3, %v2580_v49  ;;  %v2385_v48 = vmul.f32 %v4272_v15, %v2317_v43  ;;  %v1912_v50 = vpop.f32.mrf.mxu2  ;;  %v1576_v57 = vpop.f32.mrf.mxu0  ;;  %v3573_v49 = vld [vmem:[%s3742_s15 + $0x394] sm:$0xf0]  ;;  %v3294_v43 = vor.u32 %v3575_v38, %v3291_v36  ;;  %v419_v38 = vld [vmem:[#allocation2 + $0x148] sm:$0xff] }
 0x1d2   : > { %v1913_v54 = vadd.f32 %v1912_v50, %v1744_v47  ;;  %v1745_v53 = vpop.f32.mrf.mxu1  ;;  %v4443_v5 = vpop.f32.mrf.mxu3  ;;  %v3273_v47 = vld [vmem:[%s3742_s15 + $0x388] sm:$0xf] }
 0x1d3   : > { %v2453_v52 = vadd.f32 %v4279_v19, %v2385_v48  ;;  %v3274_v59 = vor.u32 %v3573_v49, %v3273_v47 }
 0x1d4   : > { %v2082_v56 = vadd.f32 %v2081_v8, %v1913_v54  ;;  %v1746_v8 = vadd.f32 %v1745_v53, %v1576_v57  ;;  %v3266_v57 = vor.u32 %v3572_v35, %v3265_v31  ;;  %v3270_v53 = vor.u32 %v3570_v46, %v3267_v44 }
 0x1d5   : > { %v2517_v62 = vmax.f32 %v2453_v52, 0.0 }
 0x1d6   : > { %v2187_v61 = vadd.f32 %v2082_v56, %v414_v58 }
 0x1d7   : > { %v2581_v6 = vpack.c.bf16 %v2517_v62, %v2517_v62  ;;  %v2318_v0 = vld [vmem:[#allocation2 + $0x118] sm:$0xff]  ;;  %3451 = vmatmul.msk.bf16.gmra.mxu3 %vm1374_vm1, %v3278_v11 }
 0x1d8   : > { %v2386_v2 = vmul.f32 %v4272_v15, %v2318_v0  ;;  %2252 = vst.msk [vmem:[#allocation2 + $0x120] sm:$0xff] %vm313_vm2, %v2187_v61 }
 0x1d9   : > { %2646 = vst.msk [vmem:[%s4020_s11 + $0x88] sm:$0xf] %vm2611_vm3, %v2581_v6  ;;  %v1914_v12 = vpop.f32.mrf.mxu2  ;;  %v1579_v7 = vpop.f32.mrf.mxu0 }
 0x1da   : > { %v2454_v42 = vadd.f32 %v4279_v19, %v2386_v2  ;;  %v1915_v10 = vadd.f32 %v1914_v12, %v1746_v8  ;;  %v1748_v16 = vpop.f32.mrf.mxu1  ;;  %v2091_v24 = vpop.f32.mrf.mxu3  ;;  %v418_v12 = vld [vmem:[#allocation2 + $0x140] sm:$0xff] }
 0x1db   : > { %v1749_v26 = vadd.f32 %v1748_v16, %v1579_v7  ;;  %v3307_v7 = vld [vmem:[%s3742_s15 + $0x3d8] sm:$0xf0] }
 0x1dc   : > { %v2518_v18 = vmax.f32 %v2454_v42, 0.0  ;;  %v2084_v22 = vadd.f32 %v4421_v23, %v1915_v10  ;;  %1618 = vmatmul.bf16.gmra.mxu0 %v3250_v41  ;;  %v3579_v10 = vld [vmem:[%s3742_s15 + $0x3cc] sm:$0xf] }
 0x1dd   : > { %1787 = vmatmul.bf16.gmra.mxu1 %v3254_v13  ;;  %v3281_v13 = vld [vmem:[%s3742_s15 + $0x3a0] sm:$0xf] }
 0x1de   : > { %v2582_v25 = vpack.c.bf16 %v2518_v18, %v2518_v18  ;;  %v2188_v17 = vadd.f32 %v2084_v22, %v415_v20  ;;  %1956 = vmatmul.bf16.gmra.mxu2 %v3258_v14  ;;  %v3576_v14 = vld [vmem:[%s3742_s15 + $0x3ac] sm:$0xf0]  ;;  %v3574_v20 = vld [vmem:[%s3742_s15 + $0x3a4] sm:$0xf]  ;;  %v3283_v18 = vld [vmem:[%s3742_s15 + $0x3b0] sm:$0xf0] }
 0x1df   : > { %v2319_v27 = vld [vmem:[#allocation2 + $0x120] sm:$0xff] }
 0x1e0   : > { %2647 = vst.msk [vmem:[%s4020_s11 + $0x8c] sm:$0xf] %vm2611_vm3, %v2582_v25  ;;  %v2387_v21 = vmul.f32 %v4272_v15, %v2319_v27  ;;  %v3577_v27 = vld [vmem:[%s3742_s15 + $0x3b4] sm:$0xf0] }
 0x1e1   : > { %2253 = vst.msk [vmem:[#allocation2 + $0x128] sm:$0xff] %vm313_vm2, %v2188_v17  ;;  %v1917_v23 = vpop.f32.mrf.mxu2  ;;  %v1581_v51 = vpop.f32.mrf.mxu0 }
 0x1e2   : > { %v2455_v30 = vadd.f32 %v4279_v19, %v2387_v21  ;;  %v1918_v29 = vadd.f32 %v1917_v23, %v1749_v26  ;;  %v1750_v33 = vpop.f32.mrf.mxu1  ;;  %v4465_v40 = vpop.f32.mrf.mxu3  ;;  %v3289_v26 = vld [vmem:[%s3742_s15 + $0x3a8] sm:$0xf]  ;;  %v3310_v21 = vor.u32 %v3579_v10, %v3307_v7  ;;  %v421_v10 = vld [vmem:[#allocation2 + $0x158] sm:$0xff] }
 0x1e3   : > { %v1751_v50 = vadd.f32 %v1750_v33, %v1581_v51  ;;  %v3286_v51 = vor.u32 %v3574_v20, %v3283_v18  ;;  %v3290_v31 = vor.u32 %v3577_v27, %v3289_v26 }
 0x1e4   : > { %v2519_v37 = vmax.f32 %v2455_v30, 0.0  ;;  %v2087_v32 = vadd.f32 %v2086_v34, %v1918_v29  ;;  %v3282_v29 = vor.u32 %v3576_v14, %v3281_v13 }
 0x1e6   : > { %v2583_v39 = vpack.c.bf16 %v2519_v37, %v2519_v37  ;;  %v2189_v45 = vadd.f32 %v2087_v32, %v416_v28 }
 0x1e7   : > { %3452 = vmatmul.msk.bf16.gmra.mxu3 %vm1374_vm1, %v3294_v43 }
 0x1e8   : > { %2648 = vst.msk [vmem:[%s4020_s11 + $0x90] sm:$0xf] %vm2611_vm3, %v2583_v39  ;;  %v2320_v48 = vld [vmem:[#allocation2 + $0x128] sm:$0xff] }
 0x1e9   : > { %v2388_v54 = vmul.f32 %v4272_v15, %v2320_v48  ;;  %2254 = vst.msk [vmem:[#allocation2 + $0x130] sm:$0xff] %vm313_vm2, %v2189_v45  ;;  %v1919_v34 = vpop.f32.mrf.mxu2  ;;  %v1584_v58 = vpop.f32.mrf.mxu0 }
 0x1ea   : > { %v1920_v52 = vadd.f32 %v1919_v34, %v1751_v50  ;;  %v1753_v56 = vpop.f32.mrf.mxu1  ;;  %v2096_v1 = vpop.f32.mrf.mxu3  ;;  %v420_v34 = vld [vmem:[#allocation2 + $0x150] sm:$0xff] }
 0x1eb   : > { %v2456_v62 = vadd.f32 %v4279_v19, %v2388_v54  ;;  %v1754_v4 = vadd.f32 %v1753_v56, %v1584_v58  ;;  %v3583_v58 = vld [vmem:[%s3742_s15 + $0x3ec] sm:$0xf]  ;;  %v3323_v56 = vld [vmem:[%s3742_s15 + $0x3f8] sm:$0xf0] }
 0x1ec   : > { %v2089_v3 = vadd.f32 %v4443_v5, %v1920_v52  ;;  %1623 = vmatmul.bf16.gmra.mxu0 %v3266_v57  ;;  %v3297_v52 = vld [vmem:[%s3742_s15 + $0x3c0] sm:$0xf] }
 0x1ed   : > { %v2520_v61 = vmax.f32 %v2456_v62, 0.0  ;;  %1792 = vmatmul.bf16.gmra.mxu1 %v3270_v53 }
 0x1ee   : > { %v2190_v60 = vadd.f32 %v2089_v3, %v417_v55  ;;  %1961 = vmatmul.bf16.gmra.mxu2 %v3274_v59  ;;  %v3580_v55 = vld [vmem:[%s3742_s15 + $0x3cc] sm:$0xf0]  ;;  %v3578_v3 = vld [vmem:[%s3742_s15 + $0x3c4] sm:$0xf] }
 0x1ef   : > { %v2584_v6 = vpack.c.bf16 %v2520_v61, %v2520_v61  ;;  %v3299_v61 = vld [vmem:[%s3742_s15 + $0x3d0] sm:$0xf0] }
 0x1f0   : > { %v2321_v0 = vld [vmem:[#allocation2 + $0x130] sm:$0xff]  ;;  %2255 = vst.msk [vmem:[#allocation2 + $0x138] sm:$0xff] %vm313_vm2, %v2190_v60 }
 0x1f1   : > { %2649 = vst.msk [vmem:[%s4020_s11 + $0x94] sm:$0xf] %vm2611_vm3, %v2584_v6  ;;  %v2389_v5 = vmul.f32 %v4272_v15, %v2321_v0  ;;  %v1922_v63 = vpop.f32.mrf.mxu2  ;;  %v1586_v11 = vpop.f32.mrf.mxu0  ;;  %v3581_v6 = vld [vmem:[%s3742_s15 + $0x3d4] sm:$0xf0]  ;;  %v3326_v0 = vor.u32 %v3583_v58, %v3323_v56 }
 0x1f2   : > { %v1923_v9 = vadd.f32 %v1922_v63, %v1754_v4  ;;  %v1755_v2 = vpop.f32.mrf.mxu1  ;;  %v4487_v22 = vpop.f32.mrf.mxu3  ;;  %v3305_v4 = vld [vmem:[%s3742_s15 + $0x3c8] sm:$0xf] }
 0x1f3   : > { %v2457_v8 = vadd.f32 %v4279_v19, %v2389_v5  ;;  %v3306_v13 = vor.u32 %v3581_v6, %v3305_v4 }
 0x1f4   : > { %v2092_v41 = vadd.f32 %v2091_v24, %v1923_v9  ;;  %v1756_v24 = vadd.f32 %v1755_v2, %v1586_v11  ;;  %v3298_v11 = vor.u32 %v3580_v55, %v3297_v52  ;;  %v3302_v2 = vor.u32 %v3578_v3, %v3299_v61 }
 0x1f5   : > { %v2521_v42 = vmax.f32 %v2457_v8, 0.0 }
 0x1f6   : > { %v2191_v16 = vadd.f32 %v2092_v41, %v418_v12 }
 0x1f7   : > { %v2585_v25 = vpack.c.bf16 %v2521_v42, %v2521_v42  ;;  %v2322_v17 = vld [vmem:[#allocation2 + $0x138] sm:$0xff]  ;;  %3453 = vmatmul.msk.bf16.gmra.mxu3 %vm1374_vm1, %v3310_v21 }
 0x1f8   : > { %v2390_v23 = vmul.f32 %v4272_v15, %v2322_v17  ;;  %2256 = vst.msk [vmem:[#allocation2 + $0x140] sm:$0xff] %vm313_vm2, %v2191_v16 }
 0x1f9   : > { %2650 = vst.msk [vmem:[%s4020_s11 + $0x98] sm:$0xf] %vm2611_vm3, %v2585_v25  ;;  %v1924_v30 = vpop.f32.mrf.mxu2  ;;  %v1589_v37 = vpop.f32.mrf.mxu0 }
 0x1fa   : > { %v2458_v33 = vadd.f32 %v4279_v19, %v2390_v23  ;;  %v1925_v28 = vadd.f32 %v1924_v30, %v1756_v24  ;;  %v1758_v32 = vpop.f32.mrf.mxu1  ;;  %v2101_v44 = vpop.f32.mrf.mxu3  ;;  %v4532_v23 = vld [vmem:[%s4660_s3] ss:$0 sm:$0xff] }
 0x1fb   : > { %v1759_v46 = vadd.f32 %v1758_v32, %v1589_v37  ;;  %v422_v30 = vld [vmem:[#allocation2 + $0x160] sm:$0xff]  ;;  %v3584_v37 = vld [vmem:[%s3742_s15 + $0x3ec] sm:$0xf0] }
 0x1fc   : > { %v2522_v36 = vmax.f32 %v2458_v33, 0.0  ;;  %v2094_v39 = vadd.f32 %v4465_v40, %v1925_v28  ;;  %1628 = vmatmul.bf16.gmra.mxu0 %v3282_v29  ;;  %v3313_v33 = vld [vmem:[%s3742_s15 + $0x3e0] sm:$0xf]  ;;  %v3582_v32 = vld [vmem:[%s3742_s15 + $0x3e4] sm:$0xf] }
 0x1fd   : > { %1797 = vmatmul.bf16.gmra.mxu1 %v3286_v51 }
 0x1fe   : > { %v2586_v45 = vpack.c.bf16 %v2522_v36, %v2522_v36  ;;  %v2192_v35 = vadd.f32 %v2094_v39, %v419_v38  ;;  %1966 = vmatmul.bf16.gmra.mxu2 %v3290_v31  ;;  %v3315_v31 = vld [vmem:[%s3742_s15 + $0x3f0] sm:$0xf0] }
 0x1ff   : > { %v2323_v47 = vld [vmem:[#allocation2 + $0x140] sm:$0xff] }
 0x200   : > { %2651 = vst.msk [vmem:[%s4020_s11 + $0x9c] sm:$0xf] %vm2611_vm3, %v2586_v45  ;;  %v2391_v49 = vmul.f32 %v4272_v15, %v2323_v47  ;;  %v3321_v45 = vld [vmem:[%s3742_s15 + $0x3e8] sm:$0xf] }
 0x201   : > { %2257 = vst.msk [vmem:[#allocation2 + $0x148] sm:$0xff] %vm313_vm2, %v2192_v35  ;;  %v1927_v40 = vpop.f32.mrf.mxu2  ;;  %v1591_v50 = vpop.f32.mrf.mxu0  ;;  %v3585_v35 = vld [vmem:[%s3742_s15 + $0x3f4] sm:$0xf0] }
 0x202   : > { %v2459_v43 = vadd.f32 %v4279_v19, %v2391_v49  ;;  %v1928_v48 = vadd.f32 %v1927_v40, %v1759_v46  ;;  %v1760_v54 = vpop.f32.mrf.mxu1  ;;  %v4509_v60 = vpop.f32.mrf.mxu3  ;;  %v3318_v40 = vor.u32 %v3582_v32, %v3315_v31 }
 0x203   : > { %v1761_v63 = vadd.f32 %v1760_v54, %v1591_v50 }
 0x204   : > { %v2523_v57 = vmax.f32 %v2459_v43, 0.0  ;;  %v2097_v53 = vadd.f32 %v2096_v1, %v1928_v48 }
 0x206   : > { %v2587_v59 = vpack.c.bf16 %v2523_v57, %v2523_v57  ;;  %v2193_v62 = vadd.f32 %v2097_v53, %v420_v34  ;;  %v3322_v34 = vor.u32 %v3585_v35, %v3321_v45  ;;  %v423_v57 = vld [vmem:[#allocation2 + $0x168] sm:$0xff] }
 0x207   : > { %3454 = vmatmul.msk.bf16.gmra.mxu3 %vm1374_vm1, %v3326_v0 }
 0x208   : > { %2652 = vst.msk [vmem:[%s4020_s11 + $0xa0] sm:$0xf] %vm2611_vm3, %v2587_v59  ;;  %v2324_v5 = vld [vmem:[#allocation2 + $0x148] sm:$0xff] }
 0x209   : > { %v2392_v9 = vmul.f32 %v4272_v15, %v2324_v5  ;;  %2258 = vst.msk [vmem:[#allocation2 + $0x150] sm:$0xff] %vm313_vm2, %v2193_v62  ;;  %v1929_v1 = vpop.f32.mrf.mxu2  ;;  %v1594_v12 = vpop.f32.mrf.mxu0  ;;  %v424_v5 = vld [vmem:[#allocation2 + $0x170] sm:$0xff] }
 0x20a   : > { %v1930_v8 = vadd.f32 %v1929_v1, %v1761_v63  ;;  %v1763_v41 = vpop.f32.mrf.mxu1  ;;  %v2106_v20 = vpop.f32.mrf.mxu3 }
 0x20b   : > { %v2460_v42 = vadd.f32 %v4279_v19, %v2392_v9  ;;  %v1764_v14 = vadd.f32 %v1763_v41, %v1594_v12  ;;  %v4526_v19 = vld [vmem:[%s4659_s2] ss:$0 sm:$0xff] }
 0x20c   : > { %v2099_v7 = vadd.f32 %v4487_v22, %v1930_v8  ;;  %1633 = vmatmul.bf16.gmra.mxu0 %v3298_v11 }
 0x20d   : > { %v2524_v16 = vmax.f32 %v2460_v42, 0.0  ;;  %1802 = vmatmul.bf16.gmra.mxu1 %v3302_v2 }
 0x20e   : > { %v2194_v15 = vadd.f32 %v2099_v7, %v421_v10  ;;  %1971 = vmatmul.bf16.gmra.mxu2 %v3306_v13 }
 0x20f   : > { %v2588_v18 = vpack.c.bf16 %v2524_v16, %v2524_v16 }
 0x210   : > { %v2325_v25 = vld [vmem:[#allocation2 + $0x150] sm:$0xff]  ;;  %2259 = vst.msk [vmem:[#allocation2 + $0x158] sm:$0xff] %vm313_vm2, %v2194_v15  ;;  %v425_v15 = vld [vmem:[#allocation2 + $0x178] sm:$0xff] }
 0x211   : > { %2653 = vst.msk [vmem:[%s4020_s11 + $0xa4] sm:$0xf] %vm2611_vm3, %v2588_v18  ;;  %v2393_v22 = vmul.f32 %v4526_v19, %v2325_v25  ;;  %v1932_v17 = vpop.f32.mrf.mxu2  ;;  %v1596_v27 = vpop.f32.mrf.mxu0 }
 0x212   : > { %v1933_v26 = vadd.f32 %v1932_v17, %v1764_v14  ;;  %v1765_v21 = vpop.f32.mrf.mxu1  ;;  %v2108_v38 = vpop.f32.mrf.mxu3 }
 0x213   : > { %v2461_v24 = vadd.f32 %v4532_v23, %v2393_v22  ;;  %v1766_v47 = vadd.f32 %v1765_v21, %v1596_v27 }
 0x214   : > { %v2102_v29 = vadd.f32 %v2101_v44, %v1933_v26  ;;  %v3314_v44 = vor.u32 %v3584_v37, %v3313_v33  ;;  %v426_v33 = vld [vmem:[#allocation2 + $0x180] sm:$0xff] }
 0x215   : > { %v2525_v51 = vmax.f32 %v2461_v24, 0.0 }
 0x216   : > { %v2195_v28 = vadd.f32 %v2102_v29, %v422_v30 }
 0x217   : > { %v2589_v36 = vpack.c.bf16 %v2525_v51, %v2525_v51  ;;  %v2326_v39 = vld [vmem:[#allocation2 + $0x158] sm:$0xff] }
 0x218   : > { %v2394_v46 = vmul.f32 %v4526_v19, %v2326_v39  ;;  %2260 = vst.msk [vmem:[#allocation2 + $0x160] sm:$0xff] %vm313_vm2, %v2195_v28 }
 0x219   : > { %2654 = vst.msk [vmem:[%s4020_s11 + $0xa8] sm:$0xf] %vm2611_vm3, %v2589_v36  ;;  %v1934_v49 = vpop.f32.mrf.mxu2  ;;  %v1599_v50 = vpop.f32.mrf.mxu0 }
 0x21a   : > { %v2462_v43 = vadd.f32 %v4532_v23, %v2394_v46  ;;  %v1935_v48 = vadd.f32 %v1934_v49, %v1766_v47  ;;  %v1768_v54 = vpop.f32.mrf.mxu1  ;;  %v2111_v62 = vpop.f32.mrf.mxu3 }
 0x21b   : > { %v1769_v59 = vadd.f32 %v1768_v54, %v1599_v50 }
 0x21c   : > { %v2526_v53 = vmax.f32 %v2462_v43, 0.0  ;;  %v2104_v52 = vadd.f32 %v4509_v60, %v1935_v48  ;;  %1638 = vmatmul.bf16.gmra.mxu0 %v3314_v44 }
 0x21d   : > { %1807 = vmatmul.bf16.gmra.mxu1 %v3318_v40  ;;  %v427_v40 = vld [vmem:[#allocation2 + $0x188] sm:$0xff] }
 0x21e   : > { %v2590_v58 = vpack.c.bf16 %v2526_v53, %v2526_v53  ;;  %v2196_v56 = vadd.f32 %v2104_v52, %v423_v57  ;;  %1976 = vmatmul.bf16.gmra.mxu2 %v3322_v34 }
 0x21f   : > { %v2327_v55 = vld [vmem:[#allocation2 + $0x160] sm:$0xff] }
 0x220   : > { %2655 = vst.msk [vmem:[%s4020_s11 + $0xac] sm:$0xf] %vm2611_vm3, %v2590_v58  ;;  %v2395_v3 = vmul.f32 %v4526_v19, %v2327_v55 }
 0x221   : > { %2261 = vst.msk [vmem:[#allocation2 + $0x168] sm:$0xff] %vm313_vm2, %v2196_v56  ;;  %v1937_v61 = vpop.f32.mrf.mxu2  ;;  %v1601_v60 = vpop.f32.mrf.mxu0 }
 0x222   : > { %v2463_v4 = vadd.f32 %v4532_v23, %v2395_v3  ;;  %v1938_v6 = vadd.f32 %v1937_v61, %v1769_v59  ;;  %v1770_v0 = vpop.f32.mrf.mxu1  ;;  %v2113_v2 = vpop.f32.mrf.mxu3  ;;  %v428_v3 = vld [vmem:[#allocation2 + $0x190] sm:$0xff] }
 0x223   : > { %v1771_v12 = vadd.f32 %v1770_v0, %v1601_v60 }
 0x224   : > { %v2527_v63 = vmax.f32 %v2463_v4, 0.0  ;;  %v2107_v9 = vadd.f32 %v2106_v20, %v1938_v6 }
 0x226   : > { %v2591_v1 = vpack.c.bf16 %v2527_v63, %v2527_v63  ;;  %v2197_v11 = vadd.f32 %v2107_v9, %v424_v5 }
 0x228   : > { %2656 = vst.msk [vmem:[%s4020_s11 + $0xb0] sm:$0xf] %vm2611_vm3, %v2591_v1  ;;  %v2328_v8 = vld [vmem:[#allocation2 + $0x168] sm:$0xff] }
 0x229   : > { %v2396_v41 = vmul.f32 %v4526_v19, %v2328_v8  ;;  %2262 = vst.msk [vmem:[#allocation2 + $0x170] sm:$0xff] %vm313_vm2, %v2197_v11  ;;  %v1939_v13 = vpop.f32.mrf.mxu2  ;;  %v1604_v10 = vpop.f32.mrf.mxu0 }
 0x22a   : > { %v1940_v42 = vadd.f32 %v1939_v13, %v1771_v12  ;;  %v1773_v7 = vpop.f32.mrf.mxu1  ;;  %v2116_v22 = vpop.f32.mrf.mxu3 }
 0x22b   : > { %v2464_v16 = vadd.f32 %v4532_v23, %v2396_v41  ;;  %v1774_v25 = vadd.f32 %v1773_v7, %v1604_v10  ;;  %v429_v41 = vld [vmem:[#allocation2 + $0x198] sm:$0xff] }
 0x22c   : > { %v2109_v14 = vadd.f32 %v2108_v38, %v1940_v42 }
 0x22d   : > { %v2528_v20 = vmax.f32 %v2464_v16, 0.0 }
 0x22e   : > { %v2198_v18 = vadd.f32 %v2109_v14, %v425_v15 }
 0x22f   : > { %v2592_v17 = vpack.c.bf16 %v2528_v20, %v2528_v20 }
 0x230   : > { %v2329_v26 = vld [vmem:[#allocation2 + $0x170] sm:$0xff]  ;;  %2263 = vst.msk [vmem:[#allocation2 + $0x178] sm:$0xff] %vm313_vm2, %v2198_v18 }
 0x231   : > { %2657 = vst.msk [vmem:[%s4020_s11 + $0xb4] sm:$0xf] %vm2611_vm3, %v2592_v17  ;;  %v2397_v27 = vmul.f32 %v4526_v19, %v2329_v26  ;;  %v1942_v21 = vpop.f32.mrf.mxu2  ;;  %v1606_v30 = vpop.f32.mrf.mxu0 }
 0x232   : > { %v1943_v24 = vadd.f32 %v1942_v21, %v1774_v25  ;;  %v1775_v29 = vpop.f32.mrf.mxu1  ;;  %v2118_v31 = vpop.f32.mrf.mxu3 }
 0x233   : > { %v2465_v51 = vadd.f32 %v4532_v23, %v2397_v27  ;;  %v1776_v45 = vadd.f32 %v1775_v29, %v1606_v30  ;;  %v430_v27 = vld [vmem:[#allocation2 + $0x1a0] sm:$0xff] }
 0x234   : > { %v2112_v28 = vadd.f32 %v2111_v62, %v1943_v24 }
 0x235   : > { %v2529_v37 = vmax.f32 %v2465_v51, 0.0 }
 0x236   : > { %v2199_v32 = vadd.f32 %v2112_v28, %v426_v33 }
 0x237   : > { %v2593_v38 = vpack.c.bf16 %v2529_v37, %v2529_v37  ;;  %v2330_v36 = vld [vmem:[#allocation2 + $0x178] sm:$0xff] }
 0x238   : > { %v2398_v39 = vmul.f32 %v4526_v19, %v2330_v36  ;;  %2264 = vst.msk [vmem:[#allocation2 + $0x180] sm:$0xff] %vm313_vm2, %v2199_v32 }
 0x239   : > { %2658 = vst.msk [vmem:[%s4020_s11 + $0xb8] sm:$0xf] %vm2611_vm3, %v2593_v38  ;;  %v1944_v35 = vpop.f32.mrf.mxu2  ;;  %v1609_v49 = vpop.f32.mrf.mxu0 }
 0x23a   : > { %v2466_v46 = vadd.f32 %v4532_v23, %v2398_v39  ;;  %v1945_v47 = vadd.f32 %v1944_v35, %v1776_v45  ;;  %v1778_v44 = vpop.f32.mrf.mxu1  ;;  %v2121_v57 = vpop.f32.mrf.mxu3  ;;  %v431_v39 = vld [vmem:[#allocation2 + $0x1a8] sm:$0xff] }
 0x23b   : > { %v1779_v34 = vadd.f32 %v1778_v44, %v1609_v49 }
 0x23c   : > { %v2530_v43 = vmax.f32 %v2466_v46, 0.0  ;;  %v2114_v48 = vadd.f32 %v2113_v2, %v1945_v47 }
 0x23e   : > { %v2594_v50 = vpack.c.bf16 %v2530_v43, %v2530_v43  ;;  %v2200_v54 = vadd.f32 %v2114_v48, %v427_v40 }
 0x23f   : > { %v2331_v53 = vld [vmem:[#allocation2 + $0x180] sm:$0xff] }
 0x240   : > { %2659 = vst.msk [vmem:[%s4020_s11 + $0xbc] sm:$0xf] %vm2611_vm3, %v2594_v50  ;;  %v2399_v52 = vmul.f32 %v4526_v19, %v2331_v53  ;;  %v432_v53 = vld [vmem:[#allocation2 + $0x1b0] sm:$0xff] }
 0x241   : > { %2265 = vst.msk [vmem:[#allocation2 + $0x188] sm:$0xff] %vm313_vm2, %v2200_v54  ;;  %v1947_v58 = vpop.f32.mrf.mxu2  ;;  %v1611_v62 = vpop.f32.mrf.mxu0 }
 0x242   : > { %v2467_v56 = vadd.f32 %v4532_v23, %v2399_v52  ;;  %v1948_v59 = vadd.f32 %v1947_v58, %v1779_v34  ;;  %v1780_v55 = vpop.f32.mrf.mxu1  ;;  %v2123_v0 = vpop.f32.mrf.mxu3 }
 0x243   : > { %v1781_v63 = vadd.f32 %v1780_v55, %v1611_v62 }
 0x244   : > { %v2531_v61 = vmax.f32 %v2467_v56, 0.0  ;;  %v2117_v4 = vadd.f32 %v2116_v22, %v1948_v59 }
 0x246   : > { %v2595_v6 = vpack.c.bf16 %v2531_v61, %v2531_v61  ;;  %v2201_v60 = vadd.f32 %v2117_v4, %v428_v3 }
 0x248   : > { %2660 = vst.msk [vmem:[%s4020_s11 + $0xc0] sm:$0xf] %vm2611_vm3, %v2595_v6  ;;  %v2332_v5 = vld [vmem:[#allocation2 + $0x188] sm:$0xff] }
 0x249   : > { %v2400_v9 = vmul.f32 %v4526_v19, %v2332_v5  ;;  %2266 = vst.msk [vmem:[#allocation2 + $0x190] sm:$0xff] %vm313_vm2, %v2201_v60  ;;  %v1949_v1 = vpop.f32.mrf.mxu2  ;;  %v1614_v2 = vpop.f32.mrf.mxu0 }
 0x24a   : > { %v1950_v11 = vadd.f32 %v1949_v1, %v1781_v63  ;;  %v1783_v8 = vpop.f32.mrf.mxu1  ;;  %v2126_v18 = vpop.f32.mrf.mxu3  ;;  %v433_v63 = vld [vmem:[#allocation2 + $0x1b8] sm:$0xff] }
 0x24b   : > { %v2468_v12 = vadd.f32 %v4532_v23, %v2400_v9  ;;  %v1784_v7 = vadd.f32 %v1783_v8, %v1614_v2 }
 0x24c   : > { %v2119_v13 = vadd.f32 %v2118_v31, %v1950_v11 }
 0x24d   : > { %v2532_v42 = vmax.f32 %v2468_v12, 0.0 }
 0x24e   : > { %v2202_v10 = vadd.f32 %v2119_v13, %v429_v41 }
 0x24f   : > { %v2596_v16 = vpack.c.bf16 %v2532_v42, %v2532_v42 }
 0x250   : > { %v2333_v15 = vld [vmem:[#allocation2 + $0x190] sm:$0xff]  ;;  %2267 = vst.msk [vmem:[#allocation2 + $0x198] sm:$0xff] %vm313_vm2, %v2202_v10 }
 0x251   : > { %2661 = vst.msk [vmem:[%s4020_s11 + $0xc4] sm:$0xf] %vm2611_vm3, %v2596_v16  ;;  %v2401_v14 = vmul.f32 %v4526_v19, %v2333_v15  ;;  %v1952_v20 = vpop.f32.mrf.mxu2  ;;  %v1616_v22 = vpop.f32.mrf.mxu0 }
 0x252   : > { %v1953_v25 = vadd.f32 %v1952_v20, %v1784_v7  ;;  %v1785_v17 = vpop.f32.mrf.mxu1  ;;  %v2128_v45 = vpop.f32.mrf.mxu3 }
 0x253   : > { %v2469_v26 = vadd.f32 %v4532_v23, %v2401_v14  ;;  %v1786_v28 = vadd.f32 %v1785_v17, %v1616_v22  ;;  %v434_v14 = vld [vmem:[#allocation2 + $0x1c0] sm:$0xff] }
 0x254   : > { %v2122_v21 = vadd.f32 %v2121_v57, %v1953_v25 }
 0x255   : > { %v2533_v24 = vmax.f32 %v2469_v26, 0.0 }
 0x256   : > { %v2203_v30 = vadd.f32 %v2122_v21, %v430_v27 }
 0x257   : > { %v2597_v29 = vpack.c.bf16 %v2533_v24, %v2533_v24  ;;  %v2334_v51 = vld [vmem:[#allocation2 + $0x198] sm:$0xff] }
 0x258   : > { %v2402_v33 = vmul.f32 %v4526_v19, %v2334_v51  ;;  %2268 = vst.msk [vmem:[#allocation2 + $0x1a0] sm:$0xff] %vm313_vm2, %v2203_v30 }
 0x259   : > { %2662 = vst.msk [vmem:[%s4020_s11 + $0xc8] sm:$0xf] %vm2611_vm3, %v2597_v29  ;;  %v1954_v37 = vpop.f32.mrf.mxu2  ;;  %v1619_v38 = vpop.f32.mrf.mxu0 }
 0x25a   : > { %v2470_v32 = vadd.f32 %v4532_v23, %v2402_v33  ;;  %v1955_v31 = vadd.f32 %v1954_v37, %v1786_v28  ;;  %v1788_v36 = vpop.f32.mrf.mxu1  ;;  %v2131_v56 = vpop.f32.mrf.mxu3  ;;  %v435_v28 = vld [vmem:[#allocation2 + $0x1c8] sm:$0xff] }
 0x25b   : > { %v1789_v44 = vadd.f32 %v1788_v36, %v1619_v38 }
 0x25c   : > { %v2534_v35 = vmax.f32 %v2470_v32, 0.0  ;;  %v2124_v46 = vadd.f32 %v2123_v0, %v1955_v31 }
 0x25e   : > { %v2598_v47 = vpack.c.bf16 %v2534_v35, %v2534_v35  ;;  %v2204_v49 = vadd.f32 %v2124_v46, %v431_v39 }
 0x25f   : > { %v2335_v40 = vld [vmem:[#allocation2 + $0x1a0] sm:$0xff] }
 0x260   : > { %2663 = vst.msk [vmem:[%s4020_s11 + $0xcc] sm:$0xf] %vm2611_vm3, %v2598_v47  ;;  %v2403_v43 = vmul.f32 %v4526_v19, %v2335_v40  ;;  %v436_v40 = vld [vmem:[#allocation2 + $0x1d0] sm:$0xff] }
 0x261   : > { %2269 = vst.msk [vmem:[#allocation2 + $0x1a8] sm:$0xff] %vm313_vm2, %v2204_v49  ;;  %v1957_v48 = vpop.f32.mrf.mxu2  ;;  %v1621_v34 = vpop.f32.mrf.mxu0 }
 0x262   : > { %v2471_v50 = vadd.f32 %v4532_v23, %v2403_v43  ;;  %v1958_v54 = vadd.f32 %v1957_v48, %v1789_v44  ;;  %v1790_v57 = vpop.f32.mrf.mxu1  ;;  %v2133_v12 = vpop.f32.mrf.mxu3 }
 0x263   : > { %v1791_v3 = vadd.f32 %v1790_v57, %v1621_v34 }
 0x264   : > { %v2535_v52 = vmax.f32 %v2471_v50, 0.0  ;;  %v2127_v58 = vadd.f32 %v2126_v18, %v1958_v54 }
 0x266   : > { %v2599_v59 = vpack.c.bf16 %v2535_v52, %v2535_v52  ;;  %v2205_v62 = vadd.f32 %v2127_v58, %v432_v53 }
 0x268   : > { %2664 = vst.msk [vmem:[%s4020_s11 + $0xd0] sm:$0xf] %vm2611_vm3, %v2599_v59  ;;  %v2336_v55 = vld [vmem:[#allocation2 + $0x1a8] sm:$0xff] }
 0x269   : > { %v2404_v61 = vmul.f32 %v4526_v19, %v2336_v55  ;;  %2270 = vst.msk [vmem:[#allocation2 + $0x1b0] sm:$0xff] %vm313_vm2, %v2205_v62  ;;  %v1959_v4 = vpop.f32.mrf.mxu2  ;;  %v1624_v60 = vpop.f32.mrf.mxu0 }
 0x26a   : > { %v1960_v6 = vadd.f32 %v1959_v4, %v1791_v3  ;;  %v1793_v0 = vpop.f32.mrf.mxu1  ;;  %v2136_v24 = vpop.f32.mrf.mxu3  ;;  %v437_v3 = vld [vmem:[#allocation2 + $0x1d8] sm:$0xff] }
 0x26b   : > { %v2472_v5 = vadd.f32 %v4532_v23, %v2404_v61  ;;  %v1794_v2 = vadd.f32 %v1793_v0, %v1624_v60 }
 0x26c   : > { %v2129_v9 = vadd.f32 %v2128_v45, %v1960_v6 }
 0x26d   : > { %v2536_v1 = vmax.f32 %v2472_v5, 0.0 }
 0x26e   : > { %v2206_v11 = vadd.f32 %v2129_v9, %v433_v63 }
 0x26f   : > { %v2600_v8 = vpack.c.bf16 %v2536_v1, %v2536_v1 }
 0x270   : > { %v2337_v41 = vld [vmem:[#allocation2 + $0x1b0] sm:$0xff]  ;;  %2271 = vst.msk [vmem:[#allocation2 + $0x1b8] sm:$0xff] %vm313_vm2, %v2206_v11 }
 0x271   : > { %2665 = vst.msk [vmem:[%s4020_s11 + $0xd4] sm:$0xf] %vm2611_vm3, %v2600_v8  ;;  %v2405_v13 = vmul.f32 %v4526_v19, %v2337_v41  ;;  %v1962_v42 = vpop.f32.mrf.mxu2  ;;  %v1626_v7 = vpop.f32.mrf.mxu0  ;;  %v438_v41 = vld [vmem:[#allocation2 + $0x1e0] sm:$0xff] }
 0x272   : > { %v1963_v10 = vadd.f32 %v1962_v42, %v1794_v2  ;;  %v1795_v16 = vpop.f32.mrf.mxu1  ;;  %v2138_v43 = vpop.f32.mrf.mxu3 }
 0x273   : > { %v2473_v15 = vadd.f32 %v4532_v23, %v2405_v13  ;;  %v1796_v27 = vadd.f32 %v1795_v16, %v1626_v7 }
 0x274   : > { %v2132_v20 = vadd.f32 %v2131_v56, %v1963_v10 }
 0x275   : > { %v2537_v18 = vmax.f32 %v2473_v15, 0.0 }
 0x276   : > { %v2207_v25 = vadd.f32 %v2132_v20, %v434_v14 }
 0x277   : > { %v2601_v22 = vpack.c.bf16 %v2537_v18, %v2537_v18  ;;  %v2338_v17 = vld [vmem:[#allocation2 + $0x1b8] sm:$0xff] }
 0x278   : > { %v2406_v26 = vmul.f32 %v4526_v19, %v2338_v17  ;;  %2272 = vst.msk [vmem:[#allocation2 + $0x1c0] sm:$0xff] %vm313_vm2, %v2207_v25  ;;  %v439_v17 = vld [vmem:[#allocation2 + $0x1e8] sm:$0xff] }
 0x279   : > { %2666 = vst.msk [vmem:[%s4020_s11 + $0xd8] sm:$0xf] %vm2611_vm3, %v2601_v22  ;;  %v1964_v21 = vpop.f32.mrf.mxu2  ;;  %v1629_v51 = vpop.f32.mrf.mxu0 }
 0x27a   : > { %v2474_v30 = vadd.f32 %v4532_v23, %v2406_v26  ;;  %v1965_v29 = vadd.f32 %v1964_v21, %v1796_v27  ;;  %v1798_v33 = vpop.f32.mrf.mxu1  ;;  %v2141_v6 = vpop.f32.mrf.mxu3 }
 0x27b   : > { %v1799_v36 = vadd.f32 %v1798_v33, %v1629_v51 }
 0x27c   : > { %v2538_v37 = vmax.f32 %v2474_v30, 0.0  ;;  %v2134_v32 = vadd.f32 %v2133_v12, %v1965_v29 }
 0x27e   : > { %v2602_v31 = vpack.c.bf16 %v2538_v37, %v2538_v37  ;;  %v2208_v38 = vadd.f32 %v2134_v32, %v435_v28 }
 0x27f   : > { %v2339_v39 = vld [vmem:[#allocation2 + $0x1c0] sm:$0xff] }
 0x280   : > { %2667 = vst.msk [vmem:[%s4020_s11 + $0xdc] sm:$0xf] %vm2611_vm3, %v2602_v31  ;;  %v2407_v45 = vmul.f32 %v4526_v19, %v2339_v39 }
 0x281   : > { %2273 = vst.msk [vmem:[#allocation2 + $0x1c8] sm:$0xff] %vm313_vm2, %v2208_v38  ;;  %v1967_v35 = vpop.f32.mrf.mxu2  ;;  %v1631_v49 = vpop.f32.mrf.mxu0 }
 0x282   : > { %v2475_v46 = vadd.f32 %v4532_v23, %v2407_v45  ;;  %v1968_v47 = vadd.f32 %v1967_v35, %v1799_v36  ;;  %v1800_v44 = vpop.f32.mrf.mxu1  ;;  %v2143_v15 = vpop.f32.mrf.mxu3  ;;  %v440_v36 = vld [vmem:[#allocation2 + $0x1f0] sm:$0xff] }
 0x283   : > { %v1801_v53 = vadd.f32 %v1800_v44, %v1631_v49 }
 0x284   : > { %v2539_v48 = vmax.f32 %v2475_v46, 0.0  ;;  %v2137_v50 = vadd.f32 %v2136_v24, %v1968_v47 }
 0x286   : > { %v2603_v54 = vpack.c.bf16 %v2539_v48, %v2539_v48  ;;  %v2209_v34 = vadd.f32 %v2137_v50, %v436_v40 }
 0x288   : > { %2668 = vst.msk [vmem:[%s4020_s11 + $0xe0] sm:$0xf] %vm2611_vm3, %v2603_v54  ;;  %v2340_v57 = vld [vmem:[#allocation2 + $0x1c8] sm:$0xff] }
 0x289   : > { %v2408_v52 = vmul.f32 %v4526_v19, %v2340_v57  ;;  %2274 = vst.msk [vmem:[#allocation2 + $0x1d0] sm:$0xff] %vm313_vm2, %v2209_v34  ;;  %v1969_v58 = vpop.f32.mrf.mxu2  ;;  %v1634_v59 = vpop.f32.mrf.mxu0  ;;  %v441_v57 = vld [vmem:[#allocation2 + $0x1f8] sm:$0xff] }
 0x28a   : > { %v1970_v56 = vadd.f32 %v1969_v58, %v1801_v53  ;;  %v1803_v62 = vpop.f32.mrf.mxu1  ;;  %v2146_v37 = vpop.f32.mrf.mxu3 }
 0x28b   : > { %v2476_v55 = vadd.f32 %v4532_v23, %v2408_v52  ;;  %v1804_v0 = vadd.f32 %v1803_v62, %v1634_v59 }
 0x28c   : > { %v2139_v61 = vadd.f32 %v2138_v43, %v1970_v56 }
 0x28d   : > { %v2540_v4 = vmax.f32 %v2476_v55, 0.0 }
 0x28e   : > { %v2210_v60 = vadd.f32 %v2139_v61, %v437_v3 }
 0x28f   : > { %v2604_v5 = vpack.c.bf16 %v2540_v4, %v2540_v4 }
 0x290   : > { %v2341_v63 = vld [vmem:[#allocation2 + $0x1d0] sm:$0xff]  ;;  %2275 = vst.msk [vmem:[#allocation2 + $0x1d8] sm:$0xff] %vm313_vm2, %v2210_v60 }
 0x291   : > { %2669 = vst.msk [vmem:[%s4020_s11 + $0xe4] sm:$0xf] %vm2611_vm3, %v2604_v5  ;;  %v2409_v9 = vmul.f32 %v4526_v19, %v2341_v63  ;;  %v1972_v1 = vpop.f32.mrf.mxu2  ;;  %v1636_v2 = vpop.f32.mrf.mxu0 }
 0x292   : > { %v1973_v11 = vadd.f32 %v1972_v1, %v1804_v0  ;;  %v1805_v8 = vpop.f32.mrf.mxu1  ;;  %v2148_v34 = vpop.f32.mrf.mxu3 }
 0x293   : > { %v2477_v12 = vadd.f32 %v4532_v23, %v2409_v9  ;;  %v1806_v20 = vadd.f32 %v1805_v8, %v1636_v2 }
 0x294   : > { %v2142_v13 = vadd.f32 %v2141_v6, %v1973_v11 }
 0x295   : > { %v2541_v42 = vmax.f32 %v2477_v12, 0.0 }
 0x296   : > { %v2211_v10 = vadd.f32 %v2142_v13, %v438_v41 }
 0x297   : > { %v2605_v7 = vpack.c.bf16 %v2541_v42, %v2541_v42  ;;  %v2342_v16 = vld [vmem:[#allocation2 + $0x1d8] sm:$0xff] }
 0x298   : > { %v2410_v14 = vmul.f32 %v4526_v19, %v2342_v16  ;;  %2276 = vst.msk [vmem:[#allocation2 + $0x1e0] sm:$0xff] %vm313_vm2, %v2211_v10 }
 0x299   : > { %2670 = vst.msk [vmem:[%s4020_s11 + $0xe8] sm:$0xf] %vm2611_vm3, %v2605_v7  ;;  %v1974_v18 = vpop.f32.mrf.mxu2  ;;  %v1639_v26 = vpop.f32.mrf.mxu0 }
 0x29a   : > { %v2478_v25 = vadd.f32 %v4532_v23, %v2410_v14  ;;  %v1975_v22 = vadd.f32 %v1974_v18, %v1806_v20  ;;  %v1808_v27 = vpop.f32.mrf.mxu1 }
 0x29b   : > { %v1809_v51 = vadd.f32 %v1808_v27, %v1639_v26 }
 0x29c   : > { %v2542_v21 = vmax.f32 %v2478_v25, 0.0  ;;  %v2144_v24 = vadd.f32 %v2143_v15, %v1975_v22 }
 0x29e   : > { %v2606_v30 = vpack.c.bf16 %v2542_v21, %v2542_v21  ;;  %v2212_v29 = vadd.f32 %v2144_v24, %v439_v17 }
 0x29f   : > { %v2343_v33 = vld [vmem:[#allocation2 + $0x1e0] sm:$0xff] }
 0x2a0   : > { %2671 = vst.msk [vmem:[%s4020_s11 + $0xec] sm:$0xf] %vm2611_vm3, %v2606_v30  ;;  %v2411_v28 = vmul.f32 %v4526_v19, %v2343_v33 }
 0x2a1   : > { %2277 = vst.msk [vmem:[#allocation2 + $0x1e8] sm:$0xff] %vm313_vm2, %v2212_v29  ;;  %v1977_v32 = vpop.f32.mrf.mxu2  ;;  %v1641_v35 = vpop.f32.mrf.mxu0 }
 0x2a2   : > { %v2479_v31 = vadd.f32 %v4532_v23, %v2411_v28  ;;  %v1978_v38 = vadd.f32 %v1977_v32, %v1809_v51  ;;  %v1810_v46 = vpop.f32.mrf.mxu1 }
 0x2a3   : > { %v1811_v40 = vadd.f32 %v1810_v46, %v1641_v35 }
 0x2a4   : > { %v2543_v39 = vmax.f32 %v2479_v31, 0.0  ;;  %v2147_v45 = vadd.f32 %v2146_v37, %v1978_v38 }
 0x2a6   : > { %v2607_v47 = vpack.c.bf16 %v2543_v39, %v2543_v39  ;;  %v2213_v49 = vadd.f32 %v2147_v45, %v440_v36 }
 0x2a8   : > { %2672 = vst.msk [vmem:[%s4020_s11 + $0xf0] sm:$0xf] %vm2611_vm3, %v2607_v47  ;;  %v2344_v44 = vld [vmem:[#allocation2 + $0x1e8] sm:$0xff] }
 0x2a9   : > { %v2412_v43 = vmul.f32 %v4526_v19, %v2344_v44  ;;  %2278 = vst.msk [vmem:[#allocation2 + $0x1f0] sm:$0xff] %vm313_vm2, %v2213_v49  ;;  %v1979_v48 = vpop.f32.mrf.mxu2 }
 0x2aa   : > { %v1980_v50 = vadd.f32 %v1979_v48, %v1811_v40 }
 0x2ab   : > { %v2480_v54 = vadd.f32 %v4532_v23, %v2412_v43 }
 0x2ac   : > { %v2149_v53 = vadd.f32 %v2148_v34, %v1980_v50 }
 0x2ad   : > { %v2544_v52 = vmax.f32 %v2480_v54, 0.0 }
 0x2ae   : > { %v2214_v58 = vadd.f32 %v2149_v53, %v441_v57 }
 0x2af   : > { %v2608_v56 = vpack.c.bf16 %v2544_v52, %v2544_v52 }
 0x2b0   : > { %v2345_v59 = vld [vmem:[#allocation2 + $0x1f0] sm:$0xff]  ;;  %2279 = vst.msk [vmem:[#allocation2 + $0x1f8] sm:$0xff] %vm313_vm2, %v2214_v58 }
 0x2b1   : > { %2673 = vst.msk [vmem:[%s4020_s11 + $0xf4] sm:$0xf] %vm2611_vm3, %v2608_v56  ;;  %v2413_v62 = vmul.f32 %v4526_v19, %v2345_v59 }
 0x2b3   : > { %v2481_v55 = vadd.f32 %v4532_v23, %v2413_v62 }
 0x2b5   : > { %v2545_v3 = vmax.f32 %v2481_v55, 0.0 }
 0x2b7   : > { %v2609_v61 = vpack.c.bf16 %v2545_v3, %v2545_v3  ;;  %v2346_v4 = vld [vmem:[#allocation2 + $0x1f8] sm:$0xff] }
 0x2b8   : > { %v2414_v6 = vmul.f32 %v4526_v19, %v2346_v4 }
 0x2b9   : > { %2674 = vst.msk [vmem:[%s4020_s11 + $0xf8] sm:$0xf] %vm2611_vm3, %v2609_v61 }
 0x2ba   : > { %v2482_v60 = vadd.f32 %v4532_v23, %v2414_v6 }
 0x2bc   : > { %v2546_v0 = vmax.f32 %v2482_v60, 0.0 }
 0x2be   : > { %v2610_v5 = vpack.c.bf16 %v2546_v0, %v2546_v0 }
 0x2c0   : > { %2675 = vst.msk [vmem:[%s4020_s11 + $0xfc] sm:$0xf] %vm2611_vm3, %v2610_v5 }
 0x2c1 PF: > { %s14_s17 = sadd.s32 1, %s3663_s17   ;;  %s4662_s15 = smov %s3659_s16 }
 0x2c2   : > { %p11_p5 = scmp.ge.s32.totalorder %s14_s17, 6   ;;  %s4663_s16 = smov %s4665_s18 }
 0x2c4   :  { %13 = sbr.rel (!%p11_p5) target bundleno = 2 (0x2), region = 83 }

</bundles_post_ra>
